<compile_context>
chip_gen: v7x
topology: tpu7x:2x2x1
jax: 0.10.0
libtpu: 0.0.40
codegen_flags: <defaults>
</compile_context>

<pallas_src>
from functools import partial

import jax
import jax.numpy as jnp
import numpy as np
from jax.experimental import pallas as pl
from jax.experimental.pallas import tpu as pltpu


_EPS = 1e-5
# Above v5e's 16 MiB scoped default, equal to v6e/v7x's 32 MiB default, and leaves
# headroom under v7x's 64 MiB physical VMEM.
_VMEM_LIMIT_BYTES = 32 * 1024 * 1024


def _round_up(v, d):
    return -(-v // d) * d


def _pick_row_tile(m, tm_max):
    """Largest row tile <= tm_max that is (8,128)-legal and divides m exactly."""
    if m <= tm_max:
        return m                       # single full-extent tile (always legal)
    t = (tm_max // 8) * 8
    while t >= 8:
        if m % t == 0:
            return t
        t -= 8
    return 0                           # no exact tile -> caller pads (rare)


def _pick_col_tile(cout, tn_max):
    """Cout tile: multiple of 128 dividing cout, else the full Cout."""
    if cout <= tn_max:
        return cout
    t = (tn_max // 128) * 128
    while t >= 128:
        if cout % t == 0:
            return t
        t -= 128
    return cout


# --------------------------------------------------------------------------------
# Fused  relu(x * scale + shift) @ W  (+ residual)  (+ per-channel partial stats)
# --------------------------------------------------------------------------------

def bn_relu_matmul(x, scale, shift, w, residual=None, *, want_stats=False,
                   out_dtype=jnp.bfloat16, tm_max=512, tn_max=512,
                   vmem_limit=_VMEM_LIMIT_BYTES):
    """y = relu(x * scale + shift) @ w (+ residual).

    x: (M, K) bf16, w: (K, Cout) bf16, scale/shift: (K,) f32.
    If want_stats, also returns per-row-tile partial sums / sums-of-squares of the
    *pre-residual* y (f32, shape (ni, 1, Cout)) so the caller can finish the next
    BatchNorm's batch statistics without re-reading y from HBM.
    """
    m, k = x.shape
    cout = w.shape[1]

    tn = _pick_col_tile(cout, tn_max)
    tm = _pick_row_tile(m, tm_max)
    if tm:
        mp = m
    else:                               # rare fallback: m not a multiple of 8
        tm = max(8, (tm_max // 8) * 8)
        mp = _round_up(m, tm)
    ni, nj = mp // tm, cout // tn

    xp = jnp.pad(x, ((0, mp - m), (0, 0))) if mp != m else x
    has_res = residual is not None
    rp = None
    if has_res:
        rp = jnp.pad(residual, ((0, mp - m), (0, 0))) if mp != m else residual

    scale2 = scale.reshape(1, k).astype(jnp.float32)
    shift2 = shift.reshape(1, k).astype(jnp.float32)

    # Grid order: stream the larger operand once, re-read the smaller one.
    #   cols-outer (nj, ni): x read nj times, w once.
    #   rows-outer (ni, nj): w read ni times, x once.
    x_bytes = mp * k * xp.dtype.itemsize
    w_bytes = k * cout * w.dtype.itemsize
    cols_outer = x_bytes * (nj - 1) <= w_bytes * (ni - 1)
    if cols_outer:
        grid = (nj, ni)
        row_axis = 1
        x_map = lambda j, i: (i, 0)
        p_map = lambda j, i: (0, 0)
        w_map = lambda j, i: (0, j)
        o_map = lambda j, i: (i, j)
        st_map = lambda j, i: (i, 0, j)
    else:
        grid = (ni, nj)
        row_axis = 0
        x_map = lambda i, j: (i, 0)
        p_map = lambda i, j: (0, 0)
        w_map = lambda i, j: (0, j)
        o_map = lambda i, j: (i, j)
        st_map = lambda i, j: (i, 0, j)

    def kernel(*refs):
        x_ref, s_ref, b_ref, w_ref = refs[:4]
        idx = 4
        r_ref = None
        if has_res:
            r_ref = refs[idx]
            idx += 1
        o_ref = refs[idx]
        idx += 1

        # BN folded to per-channel affine + ReLU in f32 (v5e-safe); bf16 at the MXU.
        # TODO(synk): on v6e/v7x this prologue could run in bf16 (bf16-capable VALU).
        a = jnp.maximum(x_ref[...].astype(jnp.float32) * s_ref[...] + b_ref[...], 0.0)
        acc = jnp.dot(a.astype(jnp.bfloat16), w_ref[...],
                      preferred_element_type=jnp.float32)

        if want_stats:
            ps_ref, pss_ref = refs[idx], refs[idx + 1]
            vals = acc                       # pre-residual y, as needed by the next BN
            if mp != m:                      # exclude padded rows from the statistics
                row = tm * pl.program_id(row_axis) + jax.lax.broadcasted_iota(
                    jnp.int32, (tm, 1), 0)
                vals = jnp.where(row < m, vals, 0.0)
            ps_ref[0] = jnp.sum(vals, axis=0, keepdims=True)
            pss_ref[0] = jnp.sum(vals * vals, axis=0, keepdims=True)

        if has_res:
            acc = acc + r_ref[...].astype(jnp.float32)
        o_ref[...] = acc.astype(o_ref.dtype)

    in_specs = [pl.BlockSpec((tm, k), x_map),
                pl.BlockSpec((1, k), p_map),
                pl.BlockSpec((1, k), p_map),
                pl.BlockSpec((k, tn), w_map)]
    args = [xp, scale2, shift2, w]
    if has_res:
        in_specs.append(pl.BlockSpec((tm, tn), o_map))
        args.append(rp)

    out_shape = [jax.ShapeDtypeStruct((mp, cout), out_dtype)]
    out_specs = [pl.BlockSpec((tm, tn), o_map)]
    if want_stats:
        out_shape += [jax.ShapeDtypeStruct((ni, 1, cout), jnp.float32)] * 2
        out_specs += [pl.BlockSpec((1, 1, tn), st_map)] * 2

    cparams = pltpu.CompilerParams(dimension_semantics=("parallel", "parallel"),
                                   vmem_limit_bytes=vmem_limit)

    if want_stats:
        out, ps, pss = pl.pallas_call(
            kernel, grid=grid, in_specs=in_specs,
            out_specs=tuple(out_specs), out_shape=tuple(out_shape),
            compiler_params=cparams)(*args)
        return (out[:m] if mp != m else out), ps, pss

    out = pl.pallas_call(
        kernel, grid=grid, in_specs=in_specs,
        out_specs=out_specs[0], out_shape=out_shape[0],
        compiler_params=cparams)(*args)
    return out[:m] if mp != m else out


# --------------------------------------------------------------------------------
# Fused 3x3 conv:  relu(x * scale + shift), kw taps folded into K (K = 3C),
# single dense VMEM slab store, 3 tap matmuls accumulated as a value,
# stride-aware partial stats for bn3.
# --------------------------------------------------------------------------------

def conv3x3_bn_relu(x_img, scale, shift, w_fold, *, spatial_hw, stride=1,
                    vmem_limit=_VMEM_LIMIT_BYTES):
    """x_img: (N, H*W, C) bf16, w_fold: (3, 3C, Cout) bf16 (K index = kw*C + cin).

    Returns (out (N, H*W, Cout) bf16, psum (N, 1, Cout) f32, psumsq (N, 1, Cout) f32)
    for a stride-1, padding-1 3x3 convolution of relu(x*scale+shift).  The partial
    sums only cover the positions kept by `stride`, so bn3's batch statistics never
    need another pass over the activation.
    """
    n_img, hw, c = x_img.shape
    h, w = spatial_hw
    assert hw == h * w
    c3 = 3 * c
    co = w_fold.shape[2]
    q_rows = (h + 2) * w            # (h+2) image rows x w columns, flattened

    def kernel(x_ref, s_ref, b_ref, w_ref, o_ref, ps_ref, pss_ref, q_ref):
        bf = jnp.bfloat16
        # Re-zero only the top/bottom halo rows each step (cheap); the interior is
        # fully overwritten below, so the kernel stays correct with a "parallel"
        # image axis (per-core scratch on multi-TensorCore parts).
        halo = jnp.zeros((w, c3), bf)
        q_ref[0:w, :] = halo
        q_ref[w + hw:q_rows, :] = halo

        # bn2 + relu prologue in f32 (v5e-safe); bf16 only at the MXU operand.
        # TODO(synk): on v6e/v7x this prologue could run in bf16 (bf16-capable VALU).
        act32 = jnp.maximum(
            x_ref[0].astype(jnp.float32) * s_ref[...] + b_ref[...], 0.0)   # (hw, C)

        # Fold the 3 kw taps into the contraction dim: lanes [0:C) = left neighbour,
        # [C:2C) = centre, [2C:3C) = right neighbour.  Built with bulk shifted copies
        # and written with ONE dense, lane-full store (no per-row misaligned stores).
        zrow = jnp.zeros((1, c), jnp.float32)
        ridx = jax.lax.broadcasted_iota(jnp.int32, (hw, 1), 0)
        left32 = jnp.where(ridx % w != 0,
                           jnp.concatenate([zrow, act32[:hw - 1]], axis=0), 0.0)
        right32 = jnp.where(ridx % w != w - 1,
                            jnp.concatenate([act32[1:], zrow], axis=0), 0.0)
        q_ref[w:w + hw, :] = jnp.concatenate(
            [left32, act32, right32], axis=1).astype(bf)

        # 3 tap matmuls with K = 3C, accumulated as a value: a single result store,
        # no f32-accumulator round trips through VMEM.
        acc = jnp.dot(q_ref[0:hw, :], w_ref[0], preferred_element_type=jnp.float32)
        acc = acc + jnp.dot(q_ref[w:w + hw, :], w_ref[1],
                            preferred_element_type=jnp.float32)
        acc = acc + jnp.dot(q_ref[2 * w:2 * w + hw, :], w_ref[2],
                            preferred_element_type=jnp.float32)
        o_ref[0] = acc.astype(o_ref.dtype)

        # bn3 partial statistics: two bulk reductions (no per-row serial chain),
        # restricted to the strided output positions when stride > 1.
        vals = acc
        if stride > 1:
            keep = jnp.logical_and((ridx // w) % stride == 0,
                                   (ridx % w) % stride == 0)
            vals = jnp.where(keep, acc, 0.0)
        ps_ref[0] = jnp.sum(vals, axis=0, keepdims=True)
        pss_ref[0] = jnp.sum(vals * vals, axis=0, keepdims=True)

    # TODO(synk): a second grid axis over row bands (with a 1-row halo) would deepen
    # the software pipeline and feed both v7x TensorCores at batch 1; kept per-image
    # here for simplicity.
    out, ps, pss = pl.pallas_call(
        kernel,
        grid=(n_img,),
        in_specs=[pl.BlockSpec((1, hw, c), lambda nn: (nn, 0, 0)),
                  pl.BlockSpec((1, c), lambda nn: (0, 0)),
                  pl.BlockSpec((1, c), lambda nn: (0, 0)),
                  pl.BlockSpec((3, c3, co), lambda nn: (0, 0, 0))],
        out_specs=(pl.BlockSpec((1, hw, co), lambda nn: (nn, 0, 0)),
                   pl.BlockSpec((1, 1, co), lambda nn: (nn, 0, 0)),
                   pl.BlockSpec((1, 1, co), lambda nn: (nn, 0, 0))),
        out_shape=(jax.ShapeDtypeStruct((n_img, hw, co), jnp.bfloat16),
                   jax.ShapeDtypeStruct((n_img, 1, co), jnp.float32),
                   jax.ShapeDtypeStruct((n_img, 1, co), jnp.float32)),
        scratch_shapes=[pltpu.VMEM((q_rows, c3), jnp.bfloat16)],
        compiler_params=pltpu.CompilerParams(dimension_semantics=("parallel",),
                                             vmem_limit_bytes=vmem_limit),
    )(x_img, scale.reshape(1, c).astype(jnp.float32),
      shift.reshape(1, c).astype(jnp.float32), w_fold)
    return out, ps, pss


# --------------------------------------------------------------------------------
# The full pre-activation bottleneck forward (JAX glue: layout, BN stat finishing).
# --------------------------------------------------------------------------------

@partial(jax.jit, static_argnums=(2, 3, 4))
def _forward(params, x_nchw, planes, stride, has_shortcut):
    eps = _EPS
    n, cin, h, w = x_nchw.shape
    out_planes = 4 * planes
    m = n * h * w

    # bn1 batch statistics directly on NCHW (no f32 NHWC materialization).
    mean1 = jnp.mean(x_nchw, axis=(0, 2, 3))
    var1 = jnp.mean(jnp.square(x_nchw), axis=(0, 2, 3)) - jnp.square(mean1)
    scale1 = params["g1"] * jax.lax.rsqrt(var1 + eps)
    shift1 = params["b1"] - mean1 * scale1

    # Single transpose + cast pass: NCHW f32 -> flattened NHWC bf16.
    x_flat = jnp.transpose(x_nchw, (0, 2, 3, 1)).astype(jnp.bfloat16).reshape(m, cin)

    # conv1 (bn1+relu fused) + bn2 partial statistics fused into the same kernel.
    out1, ps2, pss2 = bn_relu_matmul(x_flat, scale1, shift1, params["w1"],
                                     want_stats=True)
    mean2 = jnp.sum(ps2, axis=(0, 1)) / m
    var2 = jnp.sum(pss2, axis=(0, 1)) / m - jnp.square(mean2)
    scale2 = params["g2"] * jax.lax.rsqrt(var2 + eps)
    shift2 = params["b2"] - mean2 * scale2

    # Shortcut path (1x1 conv of relu(bn1(x)), optionally strided) or identity.
    if has_shortcut:
        if stride == 1:
            sc_in = x_flat
        else:
            sc_in = jnp.transpose(x_nchw[:, :, ::stride, ::stride],
                                  (0, 2, 3, 1)).astype(jnp.bfloat16).reshape(-1, cin)
        shortcut = bn_relu_matmul(sc_in, scale1, shift1, params["wsc"])
    else:
        # NOTE: identity residual is added from the bf16 copy of x (documented
        # precision downgrade vs. the f32 reference).
        shortcut = x_flat

    # conv2: fused bn2+relu + 3x3 conv (K=3C folded taps) + bn3 partial statistics.
    ho = (h - 1) // stride + 1
    wo = (w - 1) // stride + 1
    m2 = n * ho * wo
    out2_dense, ps3, pss3 = conv3x3_bn_relu(out1.reshape(n, h * w, planes),
                                            scale2, shift2, params["w2"],
                                            spatial_hw=(h, w), stride=stride)
    mean3 = jnp.sum(ps3, axis=(0, 1)) / m2
    var3 = jnp.sum(pss3, axis=(0, 1)) / m2 - jnp.square(mean3)
    scale3 = params["g3"] * jax.lax.rsqrt(var3 + eps)
    shift3 = params["b3"] - mean3 * scale3

    if stride == 1:
        out2 = out2_dense.reshape(m, planes)
    else:
        # TODO(synk): a stride-aware window inside conv3x3_bn_relu would avoid the
        # dense compute + subsample; the bn3 stats are already stride-aware (fused).
        out2 = out2_dense.reshape(n, h, w, planes)[:, ::stride, ::stride, :]
        out2 = out2.reshape(m2, planes)

    # conv3 (bn3+relu fused) + residual add, f32 block output.
    out = bn_relu_matmul(out2, scale3, shift3, params["w3"],
                         residual=shortcut, out_dtype=jnp.float32)
    out = out.reshape(n, ho, wo, out_planes)
    return jnp.transpose(out, (0, 3, 1, 2))                          # back to NCHW


class PreActBottleneckPallas:
    expansion = 4

    def __init__(self, in_planes, planes, stride=1, key=None):
        if key is None:
            key = jax.random.PRNGKey(0)
        ks = jax.random.split(key, 10)
        self.in_planes, self.planes, self.stride = in_planes, planes, stride
        out_planes = self.expansion * planes
        self.has_shortcut = (stride != 1) or (in_planes != out_planes)

        def kaiming(k, shape, fan_in):
            return (jax.random.normal(k, shape, jnp.float32)
                    * np.sqrt(2.0 / fan_in)).astype(jnp.float32)

        # f32 master weights (used by the pure-JAX reference).
        self.w1 = kaiming(ks[0], (in_planes, planes), in_planes)
        self.w2 = kaiming(ks[1], (3, 3, planes, planes), 9 * planes)        # HWIO
        self.w3 = kaiming(ks[2], (planes, out_planes), planes)
        if self.has_shortcut:
            self.w_sc = kaiming(ks[3], (in_planes, out_planes), in_planes)
        self.g1 = 1.0 + 0.1 * jax.random.normal(ks[4], (in_planes,), jnp.float32)
        self.b1 = 0.1 * jax.random.normal(ks[5], (in_planes,), jnp.float32)
        self.g2 = 1.0 + 0.1 * jax.random.normal(ks[6], (planes,), jnp.float32)
        self.b2 = 0.1 * jax.random.normal(ks[7], (planes,), jnp.float32)
        self.g3 = 1.0 + 0.1 * jax.random.normal(ks[8], (planes,), jnp.float32)
        self.b3 = 0.1 * jax.random.normal(ks[9], (planes,), jnp.float32)

        # bf16 / folded copies used by the Pallas forward (MXU-native operands,
        # half the weight DMA bytes).  BN affine params stay f32.
        params = dict(
            w1=self.w1.astype(jnp.bfloat16),
            # kw taps folded into the contraction axis: (3, 3*planes, planes).
            w2=self.w2.reshape(3, 3 * planes, planes).astype(jnp.bfloat16),
            w3=self.w3.astype(jnp.bfloat16),
            g1=self.g1, b1=self.b1, g2=self.g2, b2=self.b2,
            g3=self.g3, b3=self.b3)
        if self.has_shortcut:
            params["wsc"] = self.w_sc.astype(jnp.bfloat16)
        self.params = params

    def __call__(self, x_nchw):
        return _forward(self.params, x_nchw, self.planes, self.stride,
                        self.has_shortcut)


# ----------------------------- pure-JAX reference ----------------------------

def _reference(x_nchw, m, eps=_EPS):
    def bn_relu(x, g, b):
        mean = jnp.mean(x, axis=(0, 2, 3), keepdims=True)
        var = jnp.mean(jnp.square(x - mean), axis=(0, 2, 3), keepdims=True)
        y = g.reshape(1, -1, 1, 1) * (x - mean) * jax.lax.rsqrt(var + eps) \
            + b.reshape(1, -1, 1, 1)
        return jnp.maximum(y, 0.0)

    def conv(x, w_hwio, stride, pad):
        return jax.lax.conv_general_dilated(
            x, w_hwio, window_strides=(stride, stride), padding=pad,
            dimension_numbers=("NCHW", "HWIO", "NCHW"))

    s = m.stride
    act1 = bn_relu(x_nchw, m.g1, m.b1)
    if m.has_shortcut:
        shortcut = conv(act1, m.w_sc.reshape(1, 1, *m.w_sc.shape), s,
                        [(0, 0), (0, 0)])
    else:
        shortcut = x_nchw
    out = conv(act1, m.w1.reshape(1, 1, *m.w1.shape), 1, [(0, 0), (0, 0)])
    out = conv(bn_relu(out, m.g2, m.b2), m.w2, s, [(1, 1), (1, 1)])
    out = conv(bn_relu(out, m.g3, m.b3), m.w3.reshape(1, 1, *m.w3.shape), 1,
               [(0, 0), (0, 0)])
    return out + shortcut


# ---------------------------------- main --------------------------------------

if __name__ == "__main__":
    key = jax.random.PRNGKey(0)
    kx, kp = jax.random.split(key)
    N, in_planes, planes, stride = 2, 16, 8, 1
    H = W = 16
    x = jax.random.normal(kx, (N, in_planes, H, W), jnp.float32)

    block = PreActBottleneckPallas(in_planes, planes, stride=stride, key=kp)
    out = jax.block_until_ready(block(x))

    assert out.shape == (N, block.expansion * planes, H // stride, W // stride)
    ref = jax.block_until_ready(_reference(x, block))
    # bf16 activations / weights inside the Pallas path vs. a pure-f32 reference.
    np.testing.assert_allclose(np.asarray(out), np.asarray(ref), rtol=1e-1, atol=1e-1)
    print("KERNEL_OK")
</pallas_src>

<mosaic_0001>
module attributes {stable_mosaic.version = 11 : i64} {
  func.func @kernel(%arg0: i32, %arg1: i32, %arg2: memref<512x16xbf16, #tpu.memory_space<vmem>>, %arg3: memref<1x16xf32, #tpu.memory_space<vmem>>, %arg4: memref<1x16xf32, #tpu.memory_space<vmem>>, %arg5: memref<16x32xbf16, #tpu.memory_space<vmem>>, %arg6: memref<512x32xbf16, #tpu.memory_space<vmem>>) attributes {dimension_semantics = [#tpu.dimension_semantics<parallel>, #tpu.dimension_semantics<parallel>], iteration_bounds = array<i64: 1, 1>, scalar_prefetch = 0 : i64, scratch_operands = 0 : i64, tpu.core_type = #tpu.core_type<tc>, window_params = [{transform_indices = @transform_0, window_bounds = array<i64: 512, 16>}, {pipeline_mode = #tpu.pipeline_mode<synchronous>, transform_indices = @transform_1, window_bounds = array<i64: 1, 16>}, {pipeline_mode = #tpu.pipeline_mode<synchronous>, transform_indices = @transform_2, window_bounds = array<i64: 1, 16>}, {transform_indices = @transform_3, window_bounds = array<i64: 16, 32>}, {transform_indices = @transform_4, window_bounds = array<i64: 512, 32>}]} {
    %c0 = arith.constant 0 : index
    %c0_0 = arith.constant 0 : index
    %0 = vector.load %arg2[%c0, %c0_0] : memref<512x16xbf16, #tpu.memory_space<vmem>>, vector<512x16xbf16>
    %1 = arith.extf %0 : vector<512x16xbf16> to vector<512x16xf32>
    %c0_1 = arith.constant 0 : index
    %c0_2 = arith.constant 0 : index
    %2 = vector.load %arg3[%c0_1, %c0_2] : memref<1x16xf32, #tpu.memory_space<vmem>>, vector<1x16xf32>
    %3 = vector.broadcast %2 : vector<1x16xf32> to vector<512x16xf32>
    %4 = arith.mulf %1, %3 : vector<512x16xf32>
    %c0_3 = arith.constant 0 : index
    %c0_4 = arith.constant 0 : index
    %5 = vector.load %arg4[%c0_3, %c0_4] : memref<1x16xf32, #tpu.memory_space<vmem>>, vector<1x16xf32>
    %6 = vector.broadcast %5 : vector<1x16xf32> to vector<512x16xf32>
    %7 = arith.addf %4, %6 : vector<512x16xf32>
    %cst = arith.constant 0.000000e+00 : f32
    %8 = vector.broadcast %cst : f32 to vector<512x16xf32>
    %9 = arith.maximumf %7, %8 : vector<512x16xf32>
    %10 = arith.truncf %9 : vector<512x16xf32> to vector<512x16xbf16>
    %c0_5 = arith.constant 0 : index
    %c0_6 = arith.constant 0 : index
    %11 = vector.load %arg5[%c0_5, %c0_6] : memref<16x32xbf16, #tpu.memory_space<vmem>>, vector<16x32xbf16>
    %cst_7 = arith.constant dense<0.000000e+00> : vector<512x32xf32>
    %12 = tpu.matmul %10, %11, %cst_7 {dimension_numbers = #tpu.dot_dimension_numbers<[1], [0], [0], [1], [0, 0, 1, 1], [], []>} : vector<512x16xbf16>, vector<16x32xbf16>, vector<512x32xf32> -> vector<512x32xf32>
    %13 = arith.truncf %12 : vector<512x32xf32> to vector<512x32xbf16>
    %c0_8 = arith.constant 0 : index
    %c0_9 = arith.constant 0 : index
    %14 = vector.load %arg6[%c0_8, %c0_9] : memref<512x32xbf16, #tpu.memory_space<vmem>>, vector<512x32xbf16>
    tpu.vector_store %arg6[%c0_8, %c0_9], %13 {strides = array<i32>} : memref<512x32xbf16, #tpu.memory_space<vmem>>, vector<512x32xbf16>,
    return
  }
  func.func @transform_0(%arg0: i32, %arg1: i32) -> (i32, i32) {
    %c0_i32 = arith.constant 0 : i32
    %c0_i32_0 = arith.constant 0 : i32
    return %arg1, %c0_i32 : i32, i32
  }
  func.func @transform_1(%arg0: i32, %arg1: i32) -> (i32, i32) {
    %c0_i32 = arith.constant 0 : i32
    %c0_i32_0 = arith.constant 0 : i32
    %c0_i32_1 = arith.constant 0 : i32
    return %c0_i32, %c0_i32_0 : i32, i32
  }
  func.func @transform_2(%arg0: i32, %arg1: i32) -> (i32, i32) {
    %c0_i32 = arith.constant 0 : i32
    %c0_i32_0 = arith.constant 0 : i32
    %c0_i32_1 = arith.constant 0 : i32
    return %c0_i32, %c0_i32_0 : i32, i32
  }
  func.func @transform_3(%arg0: i32, %arg1: i32) -> (i32, i32) {
    %c0_i32 = arith.constant 0 : i32
    %c0_i32_0 = arith.constant 0 : i32
    return %c0_i32, %arg0 : i32, i32
  }
  func.func @transform_4(%arg0: i32, %arg1: i32) -> (i32, i32) {
    %c0_i32 = arith.constant 0 : i32
    return %arg1, %arg0 : i32, i32
  }
}

module attributes {stable_mosaic.version = 11 : i64} {
  func.func @kernel(%arg0: i32, %arg1: i32, %arg2: memref<512x16xbf16, #tpu.memory_space<vmem>>, %arg3: memref<1x16xf32, #tpu.memory_space<vmem>>, %arg4: memref<1x16xf32, #tpu.memory_space<vmem>>, %arg5: memref<16x8xbf16, #tpu.memory_space<vmem>>, %arg6: memref<512x8xbf16, #tpu.memory_space<vmem>>, %arg7: memref<1x1x8xf32, #tpu.memory_space<vmem>>, %arg8: memref<1x1x8xf32, #tpu.memory_space<vmem>>) attributes {dimension_semantics = [#tpu.dimension_semantics<parallel>, #tpu.dimension_semantics<parallel>], iteration_bounds = array<i64: 1, 1>, scalar_prefetch = 0 : i64, scratch_operands = 0 : i64, tpu.core_type = #tpu.core_type<tc>, window_params = [{transform_indices = @transform_0, window_bounds = array<i64: 512, 16>}, {pipeline_mode = #tpu.pipeline_mode<synchronous>, transform_indices = @transform_1, window_bounds = array<i64: 1, 16>}, {pipeline_mode = #tpu.pipeline_mode<synchronous>, transform_indices = @transform_2, window_bounds = array<i64: 1, 16>}, {transform_indices = @transform_3, window_bounds = array<i64: 16, 8>}, {transform_indices = @transform_4, window_bounds = array<i64: 512, 8>}, {transform_indices = @transform_5, window_bounds = array<i64: 1, 1, 8>}, {transform_indices = @transform_6, window_bounds = array<i64: 1, 1, 8>}]} {
    %c0 = arith.constant 0 : index
    %c0_0 = arith.constant 0 : index
    %0 = vector.load %arg2[%c0, %c0_0] : memref<512x16xbf16, #tpu.memory_space<vmem>>, vector<512x16xbf16>
    %1 = arith.extf %0 : vector<512x16xbf16> to vector<512x16xf32>
    %c0_1 = arith.constant 0 : index
    %c0_2 = arith.constant 0 : index
    %2 = vector.load %arg3[%c0_1, %c0_2] : memref<1x16xf32, #tpu.memory_space<vmem>>, vector<1x16xf32>
    %3 = vector.broadcast %2 : vector<1x16xf32> to vector<512x16xf32>
    %4 = arith.mulf %1, %3 : vector<512x16xf32>
    %c0_3 = arith.constant 0 : index
    %c0_4 = arith.constant 0 : index
    %5 = vector.load %arg4[%c0_3, %c0_4] : memref<1x16xf32, #tpu.memory_space<vmem>>, vector<1x16xf32>
    %6 = vector.broadcast %5 : vector<1x16xf32> to vector<512x16xf32>
    %7 = arith.addf %4, %6 : vector<512x16xf32>
    %cst = arith.constant 0.000000e+00 : f32
    %8 = vector.broadcast %cst : f32 to vector<512x16xf32>
    %9 = arith.maximumf %7, %8 : vector<512x16xf32>
    %10 = arith.truncf %9 : vector<512x16xf32> to vector<512x16xbf16>
    %c0_5 = arith.constant 0 : index
    %c0_6 = arith.constant 0 : index
    %11 = vector.load %arg5[%c0_5, %c0_6] : memref<16x8xbf16, #tpu.memory_space<vmem>>, vector<16x8xbf16>
    %cst_7 = arith.constant dense<0.000000e+00> : vector<512x8xf32>
    %12 = tpu.matmul %10, %11, %cst_7 {dimension_numbers = #tpu.dot_dimension_numbers<[1], [0], [0], [1], [0, 0, 1, 1], [], []>} : vector<512x16xbf16>, vector<16x8xbf16>, vector<512x8xf32> -> vector<512x8xf32>
    %cst_8 = arith.constant dense<0.000000e+00> : vector<8xf32>
    %13 = vector.multi_reduction <add>, %12, %cst_8 [0] : vector<512x8xf32> to vector<8xf32>
    %14 = vector.shape_cast %13 : vector<8xf32> to vector<1x8xf32>
    %c0_9 = arith.constant 0 : index
    %c0_10 = arith.constant 0 : index
    %c0_11 = arith.constant 0 : index
    %15 = vector.load %arg7[%c0_9, %c0_10, %c0_11] : memref<1x1x8xf32, #tpu.memory_space<vmem>>, vector<1x1x8xf32>
    %16 = vector.shape_cast %15 : vector<1x1x8xf32> to vector<1x8xf32>
    %17 = vector.shape_cast %14 : vector<1x8xf32> to vector<1x1x8xf32>
    tpu.vector_store %arg7[%c0_9, %c0_10, %c0_11], %17 {strides = array<i32>} : memref<1x1x8xf32, #tpu.memory_space<vmem>>, vector<1x1x8xf32>,
    %18 = arith.mulf %12, %12 : vector<512x8xf32>
    %cst_12 = arith.constant dense<0.000000e+00> : vector<8xf32>
    %19 = vector.multi_reduction <add>, %18, %cst_12 [0] : vector<512x8xf32> to vector<8xf32>
    %20 = vector.shape_cast %19 : vector<8xf32> to vector<1x8xf32>
    %c0_13 = arith.constant 0 : index
    %c0_14 = arith.constant 0 : index
    %c0_15 = arith.constant 0 : index
    %21 = vector.load %arg8[%c0_13, %c0_14, %c0_15] : memref<1x1x8xf32, #tpu.memory_space<vmem>>, vector<1x1x8xf32>
    %22 = vector.shape_cast %21 : vector<1x1x8xf32> to vector<1x8xf32>
    %23 = vector.shape_cast %20 : vector<1x8xf32> to vector<1x1x8xf32>
    tpu.vector_store %arg8[%c0_13, %c0_14, %c0_15], %23 {strides = array<i32>} : memref<1x1x8xf32, #tpu.memory_space<vmem>>, vector<1x1x8xf32>,
    %24 = arith.truncf %12 : vector<512x8xf32> to vector<512x8xbf16>
    %c0_16 = arith.constant 0 : index
    %c0_17 = arith.constant 0 : index
    %25 = vector.load %arg6[%c0_16, %c0_17] : memref<512x8xbf16, #tpu.memory_space<vmem>>, vector<512x8xbf16>
    tpu.vector_store %arg6[%c0_16, %c0_17], %24 {strides = array<i32>} : memref<512x8xbf16, #tpu.memory_space<vmem>>, vector<512x8xbf16>,
    return
  }
  func.func @transform_0(%arg0: i32, %arg1: i32) -> (i32, i32) {
    %c0_i32 = arith.constant 0 : i32
    %c0_i32_0 = arith.constant 0 : i32
    return %arg1, %c0_i32 : i32, i32
  }
  func.func @transform_1(%arg0: i32, %arg1: i32) -> (i32, i32) {
    %c0_i32 = arith.constant 0 : i32
    %c0_i32_0 = arith.constant 0 : i32
    %c0_i32_1 = arith.constant 0 : i32
    return %c0_i32, %c0_i32_0 : i32, i32
  }
  func.func @transform_2(%arg0: i32, %arg1: i32) -> (i32, i32) {
    %c0_i32 = arith.constant 0 : i32
    %c0_i32_0 = arith.constant 0 : i32
    %c0_i32_1 = arith.constant 0 : i32
    return %c0_i32, %c0_i32_0 : i32, i32
  }
  func.func @transform_3(%arg0: i32, %arg1: i32) -> (i32, i32) {
    %c0_i32 = arith.constant 0 : i32
    %c0_i32_0 = arith.constant 0 : i32
    return %c0_i32, %arg0 : i32, i32
  }
  func.func @transform_4(%arg0: i32, %arg1: i32) -> (i32, i32) {
    %c0_i32 = arith.constant 0 : i32
    return %arg1, %arg0 : i32, i32
  }
  func.func @transform_5(%arg0: i32, %arg1: i32) -> (i32, i32, i32) {
    %c0_i32 = arith.constant 0 : i32
    %c0_i32_0 = arith.constant 0 : i32
    return %arg1, %c0_i32, %arg0 : i32, i32, i32
  }
  func.func @transform_6(%arg0: i32, %arg1: i32) -> (i32, i32, i32) {
    %c0_i32 = arith.constant 0 : i32
    %c0_i32_0 = arith.constant 0 : i32
    return %arg1, %c0_i32, %arg0 : i32, i32, i32
  }
}

module attributes {stable_mosaic.version = 11 : i64} {
  func.func @kernel(%arg0: i32, %arg1: memref<1x256x8xbf16, #tpu.memory_space<vmem>>, %arg2: memref<1x8xf32, #tpu.memory_space<vmem>>, %arg3: memref<1x8xf32, #tpu.memory_space<vmem>>, %arg4: memref<3x24x8xbf16, #tpu.memory_space<vmem>>, %arg5: memref<1x256x8xbf16, #tpu.memory_space<vmem>>, %arg6: memref<1x1x8xf32, #tpu.memory_space<vmem>>, %arg7: memref<1x1x8xf32, #tpu.memory_space<vmem>>, %arg8: memref<288x24xbf16, #tpu.memory_space<vmem>>) attributes {dimension_semantics = [#tpu.dimension_semantics<parallel>], iteration_bounds = array<i64: 2>, scalar_prefetch = 0 : i64, scratch_operands = 1 : i64, tpu.core_type = #tpu.core_type<tc>, window_params = [{transform_indices = @transform_0, window_bounds = array<i64: 1, 256, 8>}, {pipeline_mode = #tpu.pipeline_mode<synchronous>, transform_indices = @transform_1, window_bounds = array<i64: 1, 8>}, {pipeline_mode = #tpu.pipeline_mode<synchronous>, transform_indices = @transform_2, window_bounds = array<i64: 1, 8>}, {pipeline_mode = #tpu.pipeline_mode<synchronous>, transform_indices = @transform_3, window_bounds = array<i64: 3, 24, 8>}, {transform_indices = @transform_4, window_bounds = array<i64: 1, 256, 8>}, {transform_indices = @transform_5, window_bounds = array<i64: 1, 1, 8>}, {transform_indices = @transform_6, window_bounds = array<i64: 1, 1, 8>}]} {
    %cst = arith.constant 0.000000e+00 : bf16
    %0 = vector.broadcast %cst : bf16 to vector<16x24xbf16>
    %c0 = arith.constant 0 : index
    %c0_0 = arith.constant 0 : index
    %1 = vector.load %arg8[%c0, %c0_0] : memref<288x24xbf16, #tpu.memory_space<vmem>>, vector<16x24xbf16>
    tpu.vector_store %arg8[%c0, %c0_0], %0 {strides = array<i32>} : memref<288x24xbf16, #tpu.memory_space<vmem>>, vector<16x24xbf16>,
    %c272 = arith.constant 272 : index
    %c0_1 = arith.constant 0 : index
    %2 = vector.load %arg8[%c272, %c0_1] : memref<288x24xbf16, #tpu.memory_space<vmem>>, vector<16x24xbf16>
    tpu.vector_store %arg8[%c272, %c0_1], %0 {strides = array<i32>} : memref<288x24xbf16, #tpu.memory_space<vmem>>, vector<16x24xbf16>,
    %c0_2 = arith.constant 0 : index
    %c0_3 = arith.constant 0 : index
    %c0_4 = arith.constant 0 : index
    %3 = vector.load %arg1[%c0_2, %c0_3, %c0_4] : memref<1x256x8xbf16, #tpu.memory_space<vmem>>, vector<1x256x8xbf16>
    %4 = vector.shape_cast %3 : vector<1x256x8xbf16> to vector<256x8xbf16>
    %5 = arith.extf %4 : vector<256x8xbf16> to vector<256x8xf32>
    %c0_5 = arith.constant 0 : index
    %c0_6 = arith.constant 0 : index
    %6 = vector.load %arg2[%c0_5, %c0_6] : memref<1x8xf32, #tpu.memory_space<vmem>>, vector<1x8xf32>
    %7 = vector.broadcast %6 : vector<1x8xf32> to vector<256x8xf32>
    %8 = arith.mulf %5, %7 : vector<256x8xf32>
    %c0_7 = arith.constant 0 : index
    %c0_8 = arith.constant 0 : index
    %9 = vector.load %arg3[%c0_7, %c0_8] : memref<1x8xf32, #tpu.memory_space<vmem>>, vector<1x8xf32>
    %10 = vector.broadcast %9 : vector<1x8xf32> to vector<256x8xf32>
    %11 = arith.addf %8, %10 : vector<256x8xf32>
    %cst_9 = arith.constant 0.000000e+00 : f32
    %12 = vector.broadcast %cst_9 : f32 to vector<256x8xf32>
    %13 = arith.maximumf %11, %12 : vector<256x8xf32>
    %cst_10 = arith.constant 0.000000e+00 : f32
    %14 = vector.broadcast %cst_10 : f32 to vector<1x8xf32>
    %15 = tpu.iota {dimensions = array<i32: 0>} : vector<256x1xi32>
    %c16_i32 = arith.constant 16 : i32
    %c0_i32 = arith.constant 0 : i32
    %16 = arith.cmpi eq, %c16_i32, %c0_i32 : i32
    %c1_i32 = arith.constant 1 : i32
    %17 = arith.select %16, %c1_i32, %c16_i32 : i32
    %18 = vector.broadcast %17 : i32 to vector<256x1xi32>
    %19 = arith.remsi %15, %18 : vector<256x1xi32>
    %c0_i32_11 = arith.constant 0 : i32
    %20 = vector.broadcast %c0_i32_11 : i32 to vector<256x1xi32>
    %21 = arith.cmpi ne, %19, %20 : vector<256x1xi32>
    %c0_i32_12 = arith.constant 0 : i32
    %22 = vector.broadcast %c0_i32_12 : i32 to vector<256x1xi32>
    %23 = arith.cmpi slt, %19, %22 : vector<256x1xi32>
    %c0_i32_13 = arith.constant 0 : i32
    %24 = arith.cmpi slt, %17, %c0_i32_13 : i32
    %25 = vector.broadcast %24 : i1 to vector<256x1xi1>
    %26 = vector.broadcast %25 : vector<256x1xi1> to vector<256x1xi1>
    %27 = arith.xori %23, %26 : vector<256x1xi1>
    %28 = arith.andi %27, %21 : vector<256x1xi1>
    %29 = vector.broadcast %17 : i32 to vector<256x1xi32>
    %30 = arith.addi %19, %29 : vector<256x1xi32>
    %31 = arith.select %28, %30, %19 : vector<256x1xi1>, vector<256x1xi32>
    %c0_i32_14 = arith.constant 0 : i32
    %32 = vector.broadcast %c0_i32_14 : i32 to vector<256x1xi32>
    %33 = arith.cmpi ne, %31, %32 : vector<256x1xi32>
    %34 = vector.extract_strided_slice %13 {offsets = [0, 0], sizes = [255, 8], strides = [1, 1]} : vector<256x8xf32> to vector<255x8xf32>
    %35 = tpu.concatenate %14, %34 in 0 : vector<1x8xf32>, vector<255x8xf32> -> vector<256x8xf32>
    %cst_15 = arith.constant 0.000000e+00 : f32
    %36 = vector.shape_cast %33 : vector<256x1xi1> to vector<256x1xi1>
    %37 = vector.broadcast %36 : vector<256x1xi1> to vector<256x8xi1>
    %38 = vector.broadcast %cst_15 : f32 to vector<256x8xf32>
    %39 = arith.select %37, %35, %38 : vector<256x8xi1>, vector<256x8xf32>
    %c16_i32_16 = arith.constant 16 : i32
    %c0_i32_17 = arith.constant 0 : i32
    %40 = arith.cmpi eq, %c16_i32_16, %c0_i32_17 : i32
    %c1_i32_18 = arith.constant 1 : i32
    %41 = arith.select %40, %c1_i32_18, %c16_i32_16 : i32
    %42 = vector.broadcast %41 : i32 to vector<256x1xi32>
    %43 = arith.remsi %15, %42 : vector<256x1xi32>
    %c0_i32_19 = arith.constant 0 : i32
    %44 = vector.broadcast %c0_i32_19 : i32 to vector<256x1xi32>
    %45 = arith.cmpi ne, %43, %44 : vector<256x1xi32>
    %c0_i32_20 = arith.constant 0 : i32
    %46 = vector.broadcast %c0_i32_20 : i32 to vector<256x1xi32>
    %47 = arith.cmpi slt, %43, %46 : vector<256x1xi32>
    %c0_i32_21 = arith.constant 0 : i32
    %48 = arith.cmpi slt, %41, %c0_i32_21 : i32
    %49 = vector.broadcast %48 : i1 to vector<256x1xi1>
    %50 = vector.broadcast %49 : vector<256x1xi1> to vector<256x1xi1>
    %51 = arith.xori %47, %50 : vector<256x1xi1>
    %52 = arith.andi %51, %45 : vector<256x1xi1>
    %53 = vector.broadcast %41 : i32 to vector<256x1xi32>
    %54 = arith.addi %43, %53 : vector<256x1xi32>
    %55 = arith.select %52, %54, %43 : vector<256x1xi1>, vector<256x1xi32>
    %c15_i32 = arith.constant 15 : i32
    %56 = vector.broadcast %c15_i32 : i32 to vector<256x1xi32>
    %57 = arith.cmpi ne, %55, %56 : vector<256x1xi32>
    %58 = vector.extract_strided_slice %13 {offsets = [1, 0], sizes = [255, 8], strides = [1, 1]} : vector<256x8xf32> to vector<255x8xf32>
    %59 = tpu.concatenate %58, %14 in 0 : vector<255x8xf32>, vector<1x8xf32> -> vector<256x8xf32>
    %cst_22 = arith.constant 0.000000e+00 : f32
    %60 = vector.shape_cast %57 : vector<256x1xi1> to vector<256x1xi1>
    %61 = vector.broadcast %60 : vector<256x1xi1> to vector<256x8xi1>
    %62 = vector.broadcast %cst_22 : f32 to vector<256x8xf32>
    %63 = arith.select %61, %59, %62 : vector<256x8xi1>, vector<256x8xf32>
    %64 = tpu.concatenate %39, %13, %63 in 1 : vector<256x8xf32>, vector<256x8xf32>, vector<256x8xf32> -> vector<256x24xf32>
    %65 = arith.truncf %64 : vector<256x24xf32> to vector<256x24xbf16>
    %c16 = arith.constant 16 : index
    %c0_23 = arith.constant 0 : index
    %66 = vector.load %arg8[%c16, %c0_23] : memref<288x24xbf16, #tpu.memory_space<vmem>>, vector<256x24xbf16>
    tpu.vector_store %arg8[%c16, %c0_23], %65 {strides = array<i32>} : memref<288x24xbf16, #tpu.memory_space<vmem>>, vector<256x24xbf16>,
    %c0_24 = arith.constant 0 : index
    %c0_25 = arith.constant 0 : index
    %67 = vector.load %arg8[%c0_24, %c0_25] : memref<288x24xbf16, #tpu.memory_space<vmem>>, vector<256x24xbf16>
    %c0_26 = arith.constant 0 : index
    %c0_27 = arith.constant 0 : index
    %c0_28 = arith.constant 0 : index
    %68 = vector.load %arg4[%c0_26, %c0_27, %c0_28] : memref<3x24x8xbf16, #tpu.memory_space<vmem>>, vector<1x24x8xbf16>
    %69 = vector.shape_cast %68 : vector<1x24x8xbf16> to vector<24x8xbf16>
    %cst_29 = arith.constant dense<0.000000e+00> : vector<256x8xf32>
    %70 = tpu.matmul %67, %69, %cst_29 {dimension_numbers = #tpu.dot_dimension_numbers<[1], [0], [0], [1], [0, 0, 1, 1], [], []>} : vector<256x24xbf16>, vector<24x8xbf16>, vector<256x8xf32> -> vector<256x8xf32>
    %c16_30 = arith.constant 16 : index
    %c0_31 = arith.constant 0 : index
    %71 = vector.load %arg8[%c16_30, %c0_31] : memref<288x24xbf16, #tpu.memory_space<vmem>>, vector<256x24xbf16>
    %c1 = arith.constant 1 : index
    %c0_32 = arith.constant 0 : index
    %c0_33 = arith.constant 0 : index
    %72 = vector.load %arg4[%c1, %c0_32, %c0_33] : memref<3x24x8xbf16, #tpu.memory_space<vmem>>, vector<1x24x8xbf16>
    %73 = vector.shape_cast %72 : vector<1x24x8xbf16> to vector<24x8xbf16>
    %cst_34 = arith.constant dense<0.000000e+00> : vector<256x8xf32>
    %74 = tpu.matmul %71, %73, %cst_34 {dimension_numbers = #tpu.dot_dimension_numbers<[1], [0], [0], [1], [0, 0, 1, 1], [], []>} : vector<256x24xbf16>, vector<24x8xbf16>, vector<256x8xf32> -> vector<256x8xf32>
    %75 = arith.addf %70, %74 : vector<256x8xf32>
    %c32 = arith.constant 32 : index
    %c0_35 = arith.constant 0 : index
    %76 = vector.load %arg8[%c32, %c0_35] : memref<288x24xbf16, #tpu.memory_space<vmem>>, vector<256x24xbf16>
    %c2 = arith.constant 2 : index
    %c0_36 = arith.constant 0 : index
    %c0_37 = arith.constant 0 : index
    %77 = vector.load %arg4[%c2, %c0_36, %c0_37] : memref<3x24x8xbf16, #tpu.memory_space<vmem>>, vector<1x24x8xbf16>
    %78 = vector.shape_cast %77 : vector<1x24x8xbf16> to vector<24x8xbf16>
    %cst_38 = arith.constant dense<0.000000e+00> : vector<256x8xf32>
    %79 = tpu.matmul %76, %78, %cst_38 {dimension_numbers = #tpu.dot_dimension_numbers<[1], [0], [0], [1], [0, 0, 1, 1], [], []>} : vector<256x24xbf16>, vector<24x8xbf16>, vector<256x8xf32> -> vector<256x8xf32>
    %80 = arith.addf %75, %79 : vector<256x8xf32>
    %81 = arith.truncf %80 : vector<256x8xf32> to vector<256x8xbf16>
    %c0_39 = arith.constant 0 : index
    %c0_40 = arith.constant 0 : index
    %c0_41 = arith.constant 0 : index
    %82 = vector.load %arg5[%c0_39, %c0_40, %c0_41] : memref<1x256x8xbf16, #tpu.memory_space<vmem>>, vector<1x256x8xbf16>
    %83 = vector.shape_cast %82 : vector<1x256x8xbf16> to vector<256x8xbf16>
    %84 = vector.shape_cast %81 : vector<256x8xbf16> to vector<1x256x8xbf16>
    tpu.vector_store %arg5[%c0_39, %c0_40, %c0_41], %84 {strides = array<i32>} : memref<1x256x8xbf16, #tpu.memory_space<vmem>>, vector<1x256x8xbf16>,
    %cst_42 = arith.constant dense<0.000000e+00> : vector<8xf32>
    %85 = vector.multi_reduction <add>, %80, %cst_42 [0] : vector<256x8xf32> to vector<8xf32>
    %86 = vector.shape_cast %85 : vector<8xf32> to vector<1x8xf32>
    %c0_43 = arith.constant 0 : index
    %c0_44 = arith.constant 0 : index
    %c0_45 = arith.constant 0 : index
    %87 = vector.load %arg6[%c0_43, %c0_44, %c0_45] : memref<1x1x8xf32, #tpu.memory_space<vmem>>, vector<1x1x8xf32>
    %88 = vector.shape_cast %87 : vector<1x1x8xf32> to vector<1x8xf32>
    %89 = vector.shape_cast %86 : vector<1x8xf32> to vector<1x1x8xf32>
    tpu.vector_store %arg6[%c0_43, %c0_44, %c0_45], %89 {strides = array<i32>} : memref<1x1x8xf32, #tpu.memory_space<vmem>>, vector<1x1x8xf32>,
    %90 = arith.mulf %80, %80 : vector<256x8xf32>
    %cst_46 = arith.constant dense<0.000000e+00> : vector<8xf32>
    %91 = vector.multi_reduction <add>, %90, %cst_46 [0] : vector<256x8xf32> to vector<8xf32>
    %92 = vector.shape_cast %91 : vector<8xf32> to vector<1x8xf32>
    %c0_47 = arith.constant 0 : index
    %c0_48 = arith.constant 0 : index
    %c0_49 = arith.constant 0 : index
    %93 = vector.load %arg7[%c0_47, %c0_48, %c0_49] : memref<1x1x8xf32, #tpu.memory_space<vmem>>, vector<1x1x8xf32>
    %94 = vector.shape_cast %93 : vector<1x1x8xf32> to vector<1x8xf32>
    %95 = vector.shape_cast %92 : vector<1x8xf32> to vector<1x1x8xf32>
    tpu.vector_store %arg7[%c0_47, %c0_48, %c0_49], %95 {strides = array<i32>} : memref<1x1x8xf32, #tpu.memory_space<vmem>>, vector<1x1x8xf32>,
    return
  }
  func.func @transform_0(%arg0: i32) -> (i32, i32, i32) {
    %c0_i32 = arith.constant 0 : i32
    %c0_i32_0 = arith.constant 0 : i32
    %c0_i32_1 = arith.constant 0 : i32
    return %arg0, %c0_i32, %c0_i32_0 : i32, i32, i32
  }
  func.func @transform_1(%arg0: i32) -> (i32, i32) {
    %c0_i32 = arith.constant 0 : i32
    %c0_i32_0 = arith.constant 0 : i32
    %c0_i32_1 = arith.constant 0 : i32
    return %c0_i32, %c0_i32_0 : i32, i32
  }
  func.func @transform_2(%arg0: i32) -> (i32, i32) {
    %c0_i32 = arith.constant 0 : i32
    %c0_i32_0 = arith.constant 0 : i32
    %c0_i32_1 = arith.constant 0 : i32
    return %c0_i32, %c0_i32_0 : i32, i32
  }
  func.func @transform_3(%arg0: i32) -> (i32, i32, i32) {
    %c0_i32 = arith.constant 0 : i32
    %c0_i32_0 = arith.constant 0 : i32
    %c0_i32_1 = arith.constant 0 : i32
    %c0_i32_2 = arith.constant 0 : i32
    return %c0_i32, %c0_i32_0, %c0_i32_1 : i32, i32, i32
  }
  func.func @transform_4(%arg0: i32) -> (i32, i32, i32) {
    %c0_i32 = arith.constant 0 : i32
    %c0_i32_0 = arith.constant 0 : i32
    %c0_i32_1 = arith.constant 0 : i32
    return %arg0, %c0_i32, %c0_i32_0 : i32, i32, i32
  }
  func.func @transform_5(%arg0: i32) -> (i32, i32, i32) {
    %c0_i32 = arith.constant 0 : i32
    %c0_i32_0 = arith.constant 0 : i32
    %c0_i32_1 = arith.constant 0 : i32
    return %arg0, %c0_i32, %c0_i32_0 : i32, i32, i32
  }
  func.func @transform_6(%arg0: i32) -> (i32, i32, i32) {
    %c0_i32 = arith.constant 0 : i32
    %c0_i32_0 = arith.constant 0 : i32
    %c0_i32_1 = arith.constant 0 : i32
    return %arg0, %c0_i32, %c0_i32_0 : i32, i32, i32
  }
}

module attributes {stable_mosaic.version = 11 : i64} {
  func.func @kernel(%arg0: i32, %arg1: i32, %arg2: memref<512x8xbf16, #tpu.memory_space<vmem>>, %arg3: memref<1x8xf32, #tpu.memory_space<vmem>>, %arg4: memref<1x8xf32, #tpu.memory_space<vmem>>, %arg5: memref<8x32xbf16, #tpu.memory_space<vmem>>, %arg6: memref<512x32xbf16, #tpu.memory_space<vmem>>, %arg7: memref<512x32xf32, #tpu.memory_space<vmem>>) attributes {dimension_semantics = [#tpu.dimension_semantics<parallel>, #tpu.dimension_semantics<parallel>], iteration_bounds = array<i64: 1, 1>, scalar_prefetch = 0 : i64, scratch_operands = 0 : i64, tpu.core_type = #tpu.core_type<tc>, window_params = [{transform_indices = @transform_0, window_bounds = array<i64: 512, 8>}, {pipeline_mode = #tpu.pipeline_mode<synchronous>, transform_indices = @transform_1, window_bounds = array<i64: 1, 8>}, {pipeline_mode = #tpu.pipeline_mode<synchronous>, transform_indices = @transform_2, window_bounds = array<i64: 1, 8>}, {transform_indices = @transform_3, window_bounds = array<i64: 8, 32>}, {transform_indices = @transform_4, window_bounds = array<i64: 512, 32>}, {transform_indices = @transform_5, window_bounds = array<i64: 512, 32>}]} {
    %c0 = arith.constant 0 : index
    %c0_0 = arith.constant 0 : index
    %0 = vector.load %arg2[%c0, %c0_0] : memref<512x8xbf16, #tpu.memory_space<vmem>>, vector<512x8xbf16>
    %1 = arith.extf %0 : vector<512x8xbf16> to vector<512x8xf32>
    %c0_1 = arith.constant 0 : index
    %c0_2 = arith.constant 0 : index
    %2 = vector.load %arg3[%c0_1, %c0_2] : memref<1x8xf32, #tpu.memory_space<vmem>>, vector<1x8xf32>
    %3 = vector.broadcast %2 : vector<1x8xf32> to vector<512x8xf32>
    %4 = arith.mulf %1, %3 : vector<512x8xf32>
    %c0_3 = arith.constant 0 : index
    %c0_4 = arith.constant 0 : index
    %5 = vector.load %arg4[%c0_3, %c0_4] : memref<1x8xf32, #tpu.memory_space<vmem>>, vector<1x8xf32>
    %6 = vector.broadcast %5 : vector<1x8xf32> to vector<512x8xf32>
    %7 = arith.addf %4, %6 : vector<512x8xf32>
    %cst = arith.constant 0.000000e+00 : f32
    %8 = vector.broadcast %cst : f32 to vector<512x8xf32>
    %9 = arith.maximumf %7, %8 : vector<512x8xf32>
    %10 = arith.truncf %9 : vector<512x8xf32> to vector<512x8xbf16>
    %c0_5 = arith.constant 0 : index
    %c0_6 = arith.constant 0 : index
    %11 = vector.load %arg5[%c0_5, %c0_6] : memref<8x32xbf16, #tpu.memory_space<vmem>>, vector<8x32xbf16>
    %cst_7 = arith.constant dense<0.000000e+00> : vector<512x32xf32>
    %12 = tpu.matmul %10, %11, %cst_7 {dimension_numbers = #tpu.dot_dimension_numbers<[1], [0], [0], [1], [0, 0, 1, 1], [], []>} : vector<512x8xbf16>, vector<8x32xbf16>, vector<512x32xf32> -> vector<512x32xf32>
    %c0_8 = arith.constant 0 : index
    %c0_9 = arith.constant 0 : index
    %13 = vector.load %arg6[%c0_8, %c0_9] : memref<512x32xbf16, #tpu.memory_space<vmem>>, vector<512x32xbf16>
    %14 = arith.extf %13 : vector<512x32xbf16> to vector<512x32xf32>
    %15 = arith.addf %12, %14 : vector<512x32xf32>
    %c0_10 = arith.constant 0 : index
    %c0_11 = arith.constant 0 : index
    %16 = vector.load %arg7[%c0_10, %c0_11] : memref<512x32xf32, #tpu.memory_space<vmem>>, vector<512x32xf32>
    tpu.vector_store %arg7[%c0_10, %c0_11], %15 {strides = array<i32>} : memref<512x32xf32, #tpu.memory_space<vmem>>, vector<512x32xf32>,
    return
  }
  func.func @transform_0(%arg0: i32, %arg1: i32) -> (i32, i32) {
    %c0_i32 = arith.constant 0 : i32
    %c0_i32_0 = arith.constant 0 : i32
    return %arg1, %c0_i32 : i32, i32
  }
  func.func @transform_1(%arg0: i32, %arg1: i32) -> (i32, i32) {
    %c0_i32 = arith.constant 0 : i32
    %c0_i32_0 = arith.constant 0 : i32
    %c0_i32_1 = arith.constant 0 : i32
    return %c0_i32, %c0_i32_0 : i32, i32
  }
  func.func @transform_2(%arg0: i32, %arg1: i32) -> (i32, i32) {
    %c0_i32 = arith.constant 0 : i32
    %c0_i32_0 = arith.constant 0 : i32
    %c0_i32_1 = arith.constant 0 : i32
    return %c0_i32, %c0_i32_0 : i32, i32
  }
  func.func @transform_3(%arg0: i32, %arg1: i32) -> (i32, i32) {
    %c0_i32 = arith.constant 0 : i32
    %c0_i32_0 = arith.constant 0 : i32
    return %c0_i32, %arg0 : i32, i32
  }
  func.func @transform_4(%arg0: i32, %arg1: i32) -> (i32, i32) {
    %c0_i32 = arith.constant 0 : i32
    return %arg1, %arg0 : i32, i32
  }
  func.func @transform_5(%arg0: i32, %arg1: i32) -> (i32, i32) {
    %c0_i32 = arith.constant 0 : i32
    return %arg1, %arg0 : i32, i32
  }
}

</mosaic_0001>

<bundles_post_ra>
// kernel: _forward.5
= control target key start
LH: loop header
LB: loop body
LE: loop exit
PB: predicated region body
PF: predicated region fallthrough
CT: control target
= control target key end

     0   :  { %vm392_vm0 = vcmask 130048   ;;  %vm1034_vm1 = vcmask 257024   ;;  %s2077_s3 = inlined_call_operand.vmem [shape: bf16[16,32], index: 3, kind: input, shape index: {}]   ;;  %s2078_s0 = inlined_call_operand.vmem [shape: bf16[512,16], index: 0, kind: input, shape index: {}]   ;;  %s2079_s1 = inlined_call_operand.vmem [shape: f32[1,16], index: 1, kind: input, shape index: {}]   ;;  %s2080_s2 = inlined_call_operand.vmem [shape: f32[1,16], index: 2, kind: input, shape index: {}]   ;;  %s2081_s4 = inlined_call_operand.vmem [shape: bf16[512,32], index: 4, kind: output, shape index: {}]  }
   0x1   :  { %v1526_v0 = vld [vmem:[%s2077_s3] sm:$0xff]   ;;  %v1394_v6 = vld [vmem:[%s2078_s0 + $0x8] sm:$0xff]   ;;  %v1395_v29 = vld [vmem:[%s2078_s0 + $0x10] sm:$0xff]  }
   0x2   :  { %v1267_v1 = vld [vmem:[%s2078_s0] sm:$0xff]   ;;  %1458 = vmatprep.subr.bf16.mxu0 %v1526_v0  ;;  %1524 = vmatprep.subr.bf16.mxu1 %v1526_v0  ;;  %v1410_v7 = vld [vmem:[%s2078_s0 + $0x88] sm:$0xff]   ;;  %v1272_v11 = vunpack.c.l.bf16 %v1394_v6  ;;  %v1273_v12 = vunpack.c.h.bf16 %v1394_v6  ;;  %v1411_v34 = vld [vmem:[%s2078_s0 + $0x90] sm:$0xff]   ;;  %v1276_v43 = vunpack.c.l.bf16 %v1395_v29  ;;  %v1277_v47 = vunpack.c.h.bf16 %v1395_v29 }
   0x3   :  { %v1561_v2 = vld [vmem:[%s2079_s1] ss:$0 sm:$0xff]  ;;  %v1268_v3 = vunpack.c.l.bf16 %v1267_v1  ;;  %v1269_v4 = vunpack.c.h.bf16 %v1267_v1  ;;  %1459 = vmatpush3.bf16.msra.mxu0 %v1526_v0  ;;  %1525 = vmatpush3.bf16.msra.mxu1 %v1526_v0  ;;  %v1336_v15 = vunpack.c.l.bf16 %v1410_v7  ;;  %v1337_v16 = vunpack.c.h.bf16 %v1410_v7  ;;  %v1396_v39 = vld [vmem:[%s2078_s0 + $0x18] sm:$0xff]  }
   0x4   :  { %v1409_v5 = vld [vmem:[%s2078_s0 + $0x80] sm:$0xff]   ;;  %v155_v19 = vmul.f32 %v1272_v11, %v1561_v2  ;;  %v156_v20 = vmul.f32 %v1273_v12, %v1561_v2  ;;  %v1412_v44 = vld [vmem:[%s2078_s0 + $0x98] sm:$0xff]   ;;  %v1340_v48 = vunpack.c.l.bf16 %v1411_v34  ;;  %v157_v50 = vmul.f32 %v1276_v43, %v1561_v2 }
   0x5   :  { %v1575_v8 = vld [vmem:[%s2080_s2] ss:$0 sm:$0xff]  ;;  %v1332_v9 = vunpack.c.l.bf16 %v1409_v5  ;;  %v1333_v10 = vunpack.c.h.bf16 %v1409_v5  ;;  %v153_v13 = vmul.f32 %v1268_v3, %v1561_v2  ;;  %v154_v14 = vmul.f32 %v1269_v4, %v1561_v2 }
   0x6   :  { %v187_v23 = vmul.f32 %v1336_v15, %v1561_v2  ;;  %v188_v24 = vmul.f32 %v1337_v16, %v1561_v2  ;;  %v226_v27 = vadd.f32 %v1575_v8, %v155_v19  ;;  %v227_v28 = vadd.f32 %v1575_v8, %v156_v20  ;;  %v1397_v1 = vld [vmem:[%s2078_s0 + $0x20] sm:$0xff]  }
   0x7   :  { %v185_v17 = vmul.f32 %v1332_v9, %v1561_v2  ;;  %v186_v18 = vmul.f32 %v1333_v10, %v1561_v2  ;;  %v224_v21 = vadd.f32 %v1575_v8, %v153_v13  ;;  %v225_v22 = vadd.f32 %v1575_v8, %v154_v14  ;;  %v1413_v12 = vld [vmem:[%s2078_s0 + $0xa0] sm:$0xff]  }
   0x8   :  { %v258_v32 = vadd.f32 %v1575_v8, %v187_v23  ;;  %v259_v33 = vadd.f32 %v1575_v8, %v188_v24  ;;  %v290_v37 = vmax.f32 %v226_v27, 0.0  ;;  %v291_v38 = vmax.f32 %v227_v28, 0.0 }
   0x9   :  { %v256_v25 = vadd.f32 %v1575_v8, %v185_v17  ;;  %v257_v26 = vadd.f32 %v1575_v8, %v186_v18  ;;  %v288_v30 = vmax.f32 %v224_v21, 0.0  ;;  %v289_v31 = vmax.f32 %v225_v22, 0.0  ;;  %v1398_v17 = vld [vmem:[%s2078_s0 + $0x28] sm:$0xff]  }
   0xa   :  { %v322_v41 = vmax.f32 %v258_v32, 0.0  ;;  %v323_v42 = vmax.f32 %v259_v33, 0.0  ;;  %v353_v46 = vpack.c.bf16 %v291_v38, %v290_v37  ;;  %v1341_v51 = vunpack.c.h.bf16 %v1411_v34 }
   0xb   :  { %v320_v35 = vmax.f32 %v256_v25, 0.0  ;;  %v321_v36 = vmax.f32 %v257_v26, 0.0  ;;  %v352_v40 = vpack.c.bf16 %v289_v31, %v288_v30  ;;  %v1280_v52 = vunpack.c.l.bf16 %v1396_v39  ;;  %v1414_v26 = vld [vmem:[%s2078_s0 + $0xa8] sm:$0xff]  }
   0xc   :  { %v369_v49 = vpack.c.bf16 %v323_v42, %v322_v41  ;;  %v158_v53 = vmul.f32 %v1277_v47, %v1561_v2  ;;  %v189_v54 = vmul.f32 %v1340_v48, %v1561_v2  ;;  %v1281_v55 = vunpack.c.h.bf16 %v1396_v39  ;;  %v1399_v39 = vld [vmem:[%s2078_s0 + $0x30] sm:$0xff]  }
   0xd   :  { %v368_v45 = vpack.c.bf16 %v321_v36, %v320_v35  ;;  %1460 = vmatprep.mubr.msk.bf16.mxu0 %vm392_vm0, %v352_v40  ;;  %v1344_v56 = vunpack.c.l.bf16 %v1412_v44  ;;  %v228_v57 = vadd.f32 %v1575_v8, %v157_v50  ;;  %v190_v58 = vmul.f32 %v1341_v51, %v1561_v2 }
   0xe   :  { %1461 = vmatmul.mubr.msk.bf16.vlgmr.msra.gmra.mrb[0].mxu0 %vm392_vm0, %v353_v46  ;;  %v159_v59 = vmul.f32 %v1280_v52, %v1561_v2  ;;  %v1345_v60 = vunpack.c.h.bf16 %v1412_v44  ;;  %v229_v61 = vadd.f32 %v1575_v8, %v158_v53  ;;  %v260_v62 = vadd.f32 %v1575_v8, %v189_v54  ;;  %v1415_v52 = vld [vmem:[%s2078_s0 + $0xb0] sm:$0xff]  }
   0xf   :  { %1492 = vmatprep.mubr.msk.bf16.mxu1 %vm392_vm0, %v368_v45  ;;  %v160_v63 = vmul.f32 %v1281_v55, %v1561_v2  ;;  %v191_v0 = vmul.f32 %v1344_v56, %v1561_v2  ;;  %v292_v3 = vmax.f32 %v228_v57, 0.0  ;;  %v261_v4 = vadd.f32 %v1575_v8, %v190_v58 }
  0x10   :  { %1493 = vmatmul.mubr.msk.bf16.vlgmr.msra.gmra.mrb[0].mxu1 %vm392_vm0, %v369_v49  ;;  %v230_v5 = vadd.f32 %v1575_v8, %v159_v59  ;;  %v192_v6 = vmul.f32 %v1345_v60, %v1561_v2  ;;  %v293_v7 = vmax.f32 %v229_v61, 0.0  ;;  %v324_v9 = vmax.f32 %v260_v62, 0.0  ;;  %v1400_v61 = vld [vmem:[%s2078_s0 + $0x38] sm:$0xff]  }
  0x11   :  { %v231_v10 = vadd.f32 %v1575_v8, %v160_v63  ;;  %v262_v11 = vadd.f32 %v1575_v8, %v191_v0  ;;  %v325_v13 = vmax.f32 %v261_v4, 0.0  ;;  %v1284_v16 = vunpack.c.l.bf16 %v1397_v1 }
  0x12   :  { %v294_v14 = vmax.f32 %v230_v5, 0.0  ;;  %v263_v15 = vadd.f32 %v1575_v8, %v192_v6  ;;  %v354_v18 = vpack.c.bf16 %v293_v7, %v292_v3  ;;  %v1285_v21 = vunpack.c.h.bf16 %v1397_v1  ;;  %v1416_v3 = vld [vmem:[%s2078_s0 + $0xb8] sm:$0xff]  }
  0x13   :  { %v295_v19 = vmax.f32 %v231_v10, 0.0  ;;  %v326_v20 = vmax.f32 %v262_v11, 0.0  ;;  %v370_v22 = vpack.c.bf16 %v325_v13, %v324_v9  ;;  %v161_v24 = vmul.f32 %v1284_v16, %v1561_v2  ;;  %v1401_v13 = vld [vmem:[%s2078_s0 + $0x40] sm:$0xff]  }
  0x14   :  { %v327_v23 = vmax.f32 %v263_v15, 0.0  ;;  %v1348_v25 = vunpack.c.l.bf16 %v1413_v12  ;;  %1464 = vmatprep.mubr.msk.bf16.mxu0 %vm392_vm0, %v354_v18  ;;  %v162_v28 = vmul.f32 %v1285_v21, %v1561_v2  ;;  %v1349_v29 = vunpack.c.h.bf16 %v1413_v12 }
  0x15   :  { %v355_v27 = vpack.c.bf16 %v295_v19, %v294_v14  ;;  %v1288_v30 = vunpack.c.l.bf16 %v1398_v17  ;;  %1496 = vmatprep.mubr.msk.bf16.mxu1 %vm392_vm0, %v370_v22  ;;  %v232_v32 = vadd.f32 %v1575_v8, %v161_v24  ;;  %v1289_v34 = vunpack.c.h.bf16 %v1398_v17 }
  0x16   :  { %v371_v31 = vpack.c.bf16 %v327_v23, %v326_v20  ;;  %v193_v33 = vmul.f32 %v1348_v25, %v1561_v2  ;;  %v233_v35 = vadd.f32 %v1575_v8, %v162_v28  ;;  %v194_v36 = vmul.f32 %v1349_v29, %v1561_v2 }
  0x17   :  { %1465 = vmatmul.mubr.msk.bf16.gmra.mrb[4].mxu0 %vm392_vm0, %v355_v27  ;;  %v163_v37 = vmul.f32 %v1288_v30, %v1561_v2  ;;  %v1352_v38 = vunpack.c.l.bf16 %v1414_v26  ;;  %v296_v40 = vmax.f32 %v232_v32, 0.0  ;;  %v164_v42 = vmul.f32 %v1289_v34, %v1561_v2  ;;  %v1417_v30 = vld [vmem:[%s2078_s0 + $0xc0] sm:$0xff]  }
  0x18   :  { %1497 = vmatmul.mubr.msk.bf16.gmra.mrb[4].mxu1 %vm392_vm0, %v371_v31  ;;  %v264_v41 = vadd.f32 %v1575_v8, %v193_v33  ;;  %v1353_v43 = vunpack.c.h.bf16 %v1414_v26  ;;  %v297_v44 = vmax.f32 %v233_v35, 0.0  ;;  %v265_v45 = vadd.f32 %v1575_v8, %v194_v36  ;;  %v1402_v35 = vld [vmem:[%s2078_s0 + $0x48] sm:$0xff]  }
  0x19   :  { %v234_v46 = vadd.f32 %v1575_v8, %v163_v37  ;;  %v195_v47 = vmul.f32 %v1352_v38, %v1561_v2  ;;  %v235_v49 = vadd.f32 %v1575_v8, %v164_v42  ;;  %v1292_v51 = vunpack.c.l.bf16 %v1399_v39 }
  0x1a   :  { %v328_v48 = vmax.f32 %v264_v41, 0.0  ;;  %v196_v50 = vmul.f32 %v1353_v43, %v1561_v2  ;;  %v356_v53 = vpack.c.bf16 %v297_v44, %v296_v40  ;;  %v329_v54 = vmax.f32 %v265_v45, 0.0  ;;  %v1418_v44 = vld [vmem:[%s2078_s0 + $0xc8] sm:$0xff]  }
  0x1b   :  { %v298_v55 = vmax.f32 %v234_v46, 0.0  ;;  %v266_v56 = vadd.f32 %v1575_v8, %v195_v47  ;;  %v299_v57 = vmax.f32 %v235_v49, 0.0  ;;  %v1293_v59 = vunpack.c.h.bf16 %v1399_v39 }
  0x1c   :  { %v267_v58 = vadd.f32 %v1575_v8, %v196_v50  ;;  %v165_v60 = vmul.f32 %v1292_v51, %v1561_v2  ;;  %1468 = vmatprep.mubr.msk.bf16.mxu0 %vm392_vm0, %v356_v53  ;;  %v372_v62 = vpack.c.bf16 %v329_v54, %v328_v48  ;;  %v1356_v0 = vunpack.c.l.bf16 %v1415_v52 }
  0x1d   :  { %v330_v63 = vmax.f32 %v266_v56, 0.0  ;;  %v1357_v1 = vunpack.c.h.bf16 %v1415_v52  ;;  %v357_v4 = vpack.c.bf16 %v299_v57, %v298_v55  ;;  %v166_v6 = vmul.f32 %v1293_v59, %v1561_v2  ;;  %v1403_v57 = vld [vmem:[%s2078_s0 + $0x50] sm:$0xff]  }
  0x1e   :  { %v331_v5 = vmax.f32 %v267_v58, 0.0  ;;  %v236_v7 = vadd.f32 %v1575_v8, %v165_v60  ;;  %1500 = vmatprep.mubr.msk.bf16.mxu1 %vm392_vm0, %v372_v62  ;;  %v197_v9 = vmul.f32 %v1356_v0, %v1561_v2  ;;  %v1296_v11 = vunpack.c.l.bf16 %v1400_v61 }
  0x1f   :  { %v198_v10 = vmul.f32 %v1357_v1, %v1561_v2  ;;  %v1297_v12 = vunpack.c.h.bf16 %v1400_v61  ;;  %1469 = vmatmul.mubr.msk.bf16.gmra.mrb[8].mxu0 %vm392_vm0, %v357_v4  ;;  %v237_v15 = vadd.f32 %v1575_v8, %v166_v6  ;;  %v1360_v17 = vunpack.c.l.bf16 %v1416_v3 }
  0x20   :  { %v373_v14 = vpack.c.bf16 %v331_v5, %v330_v63  ;;  %v300_v16 = vmax.f32 %v236_v7, 0.0  ;;  %v268_v18 = vadd.f32 %v1575_v8, %v197_v9  ;;  %v167_v20 = vmul.f32 %v1296_v11, %v1561_v2 }
  0x21   :  { %v269_v19 = vadd.f32 %v1575_v8, %v198_v10  ;;  %v168_v21 = vmul.f32 %v1297_v12, %v1561_v2  ;;  %v301_v22 = vmax.f32 %v237_v15, 0.0  ;;  %v1361_v23 = vunpack.c.h.bf16 %v1416_v3  ;;  %v1419_v3 = vld [vmem:[%s2078_s0 + $0xd0] sm:$0xff]  }
  0x22   :  { %1501 = vmatmul.mubr.msk.bf16.gmra.mrb[8].mxu1 %vm392_vm0, %v373_v14  ;;  %v199_v24 = vmul.f32 %v1360_v17, %v1561_v2  ;;  %v1300_v25 = vunpack.c.l.bf16 %v1401_v13  ;;  %v332_v26 = vmax.f32 %v268_v18, 0.0  ;;  %v238_v28 = vadd.f32 %v1575_v8, %v167_v20  ;;  %v1404_v17 = vld [vmem:[%s2078_s0 + $0x58] sm:$0xff]  }
  0x23   :  { %v333_v27 = vmax.f32 %v269_v19, 0.0  ;;  %v239_v29 = vadd.f32 %v1575_v8, %v168_v21  ;;  %v358_v31 = vpack.c.bf16 %v301_v22, %v300_v16  ;;  %v200_v32 = vmul.f32 %v1361_v23, %v1561_v2  ;;  %v1420_v22 = vld [vmem:[%s2078_s0 + $0xd8] sm:$0xff]  }
  0x24   :  { %v270_v33 = vadd.f32 %v1575_v8, %v199_v24  ;;  %v1301_v34 = vunpack.c.h.bf16 %v1401_v13  ;;  %v302_v37 = vmax.f32 %v238_v28, 0.0  ;;  %v169_v39 = vmul.f32 %v1300_v25, %v1561_v2 }
  0x25   :  { %v374_v36 = vpack.c.bf16 %v333_v27, %v332_v26  ;;  %v303_v38 = vmax.f32 %v239_v29, 0.0  ;;  %1472 = vmatprep.mubr.msk.bf16.mxu0 %vm392_vm0, %v358_v31  ;;  %v271_v40 = vadd.f32 %v1575_v8, %v200_v32  ;;  %v1364_v43 = vunpack.c.l.bf16 %v1417_v30 }
  0x26   :  { %v334_v41 = vmax.f32 %v270_v33, 0.0  ;;  %v170_v42 = vmul.f32 %v1301_v34, %v1561_v2  ;;  %v240_v46 = vadd.f32 %v1575_v8, %v169_v39  ;;  %v1365_v47 = vunpack.c.h.bf16 %v1417_v30 }
  0x27   :  { %1504 = vmatprep.mubr.msk.bf16.mxu1 %vm392_vm0, %v374_v36  ;;  %v359_v45 = vpack.c.bf16 %v303_v38, %v302_v37  ;;  %v1304_v48 = vunpack.c.l.bf16 %v1402_v35  ;;  %v335_v49 = vmax.f32 %v271_v40, 0.0  ;;  %v201_v51 = vmul.f32 %v1364_v43, %v1561_v2 }
  0x28   :  { %v241_v50 = vadd.f32 %v1575_v8, %v170_v42  ;;  %v1305_v52 = vunpack.c.h.bf16 %v1402_v35  ;;  %v304_v53 = vmax.f32 %v240_v46, 0.0  ;;  %v202_v54 = vmul.f32 %v1365_v47, %v1561_v2  ;;  %v1405_v35 = vld [vmem:[%s2078_s0 + $0x60] sm:$0xff]  }
  0x29   :  { %1473 = vmatmul.mubr.msk.bf16.gmra.mrb[12].mxu0 %vm392_vm0, %v359_v45  ;;  %v171_v55 = vmul.f32 %v1304_v48, %v1561_v2  ;;  %v1368_v56 = vunpack.c.l.bf16 %v1418_v44  ;;  %v375_v58 = vpack.c.bf16 %v335_v49, %v334_v41  ;;  %v272_v60 = vadd.f32 %v1575_v8, %v201_v51  ;;  %v1421_v48 = vld [vmem:[%s2078_s0 + $0xe0] sm:$0xff]  }
  0x2a   :  { %v305_v59 = vmax.f32 %v241_v50, 0.0  ;;  %v172_v61 = vmul.f32 %v1305_v52, %v1561_v2  ;;  %v273_v62 = vadd.f32 %v1575_v8, %v202_v54  ;;  %v1369_v0 = vunpack.c.h.bf16 %v1418_v44 }
  0x2b   :  { %v242_v63 = vadd.f32 %v1575_v8, %v171_v55  ;;  %v203_v1 = vmul.f32 %v1368_v56, %v1561_v2  ;;  %1505 = vmatmul.mubr.msk.bf16.gmra.mrb[12].mxu1 %vm392_vm0, %v375_v58  ;;  %v336_v5 = vmax.f32 %v272_v60, 0.0  ;;  %v1308_v7 = vunpack.c.l.bf16 %v1403_v57 }
  0x2c   :  { %v360_v4 = vpack.c.bf16 %v305_v59, %v304_v53  ;;  %v243_v6 = vadd.f32 %v1575_v8, %v172_v61  ;;  %v337_v9 = vmax.f32 %v273_v62, 0.0  ;;  %v204_v11 = vmul.f32 %v1369_v0, %v1561_v2  ;;  %v1406_v53 = vld [vmem:[%s2078_s0 + $0x68] sm:$0xff]  }
  0x2d   :  { %v306_v10 = vmax.f32 %v242_v63, 0.0  ;;  %v274_v12 = vadd.f32 %v1575_v8, %v203_v1  ;;  %v1309_v14 = vunpack.c.h.bf16 %v1403_v57  ;;  %v173_v15 = vmul.f32 %v1308_v7, %v1561_v2  ;;  %v1422_v62 = vld [vmem:[%s2078_s0 + $0xe8] sm:$0xff]  }
  0x2e   :  { %1476 = vmatprep.mubr.msk.bf16.mxu0 %vm392_vm0, %v360_v4  ;;  %v307_v13 = vmax.f32 %v243_v6, 0.0  ;;  %v1372_v16 = vunpack.c.l.bf16 %v1419_v3  ;;  %v376_v18 = vpack.c.bf16 %v337_v9, %v336_v5  ;;  %v275_v19 = vadd.f32 %v1575_v8, %v204_v11 }
  0x2f   :  { %v338_v20 = vmax.f32 %v274_v12, 0.0  ;;  %v1373_v21 = vunpack.c.h.bf16 %v1419_v3  ;;  %v174_v24 = vmul.f32 %v1309_v14, %v1561_v2  ;;  %v244_v25 = vadd.f32 %v1575_v8, %v173_v15 }
  0x30   :  { %v361_v23 = vpack.c.bf16 %v307_v13, %v306_v10  ;;  %v205_v26 = vmul.f32 %v1372_v16, %v1561_v2  ;;  %1508 = vmatprep.mubr.msk.bf16.mxu1 %vm392_vm0, %v376_v18  ;;  %v339_v27 = vmax.f32 %v275_v19, 0.0  ;;  %v1312_v29 = vunpack.c.l.bf16 %v1404_v17  ;;  %v1407_v13 = vld [vmem:[%s2078_s0 + $0x70] sm:$0xff]  }
  0x31   :  { %v206_v28 = vmul.f32 %v1373_v21, %v1561_v2  ;;  %v1313_v30 = vunpack.c.h.bf16 %v1404_v17  ;;  %v245_v31 = vadd.f32 %v1575_v8, %v174_v24  ;;  %v308_v32 = vmax.f32 %v244_v25, 0.0 }
  0x32   :  { %1477 = vmatmul.mubr.msk.bf16.gmra.mrb[16].mxu0 %vm392_vm0, %v361_v23  ;;  %v276_v33 = vadd.f32 %v1575_v8, %v205_v26  ;;  %v1376_v34 = vunpack.c.l.bf16 %v1420_v22  ;;  %v377_v36 = vpack.c.bf16 %v339_v27, %v338_v20  ;;  %v175_v38 = vmul.f32 %v1312_v29, %v1561_v2 }
  0x33   :  { %v277_v37 = vadd.f32 %v1575_v8, %v206_v28  ;;  %v176_v39 = vmul.f32 %v1313_v30, %v1561_v2  ;;  %v309_v40 = vmax.f32 %v245_v31, 0.0  ;;  %v1377_v42 = vunpack.c.h.bf16 %v1420_v22  ;;  %v1423_v22 = vld [vmem:[%s2078_s0 + $0xf0] sm:$0xff]  }
  0x34   :  { %v340_v41 = vmax.f32 %v276_v33, 0.0  ;;  %v207_v43 = vmul.f32 %v1376_v34, %v1561_v2  ;;  %1509 = vmatmul.mubr.msk.bf16.gmra.mrb[16].mxu1 %vm392_vm0, %v377_v36  ;;  %v246_v45 = vadd.f32 %v1575_v8, %v175_v38  ;;  %v1316_v47 = vunpack.c.l.bf16 %v1405_v35 }
  0x35   :  { %v341_v44 = vmax.f32 %v277_v37, 0.0  ;;  %v247_v46 = vadd.f32 %v1575_v8, %v176_v39  ;;  %v362_v49 = vpack.c.bf16 %v309_v40, %v308_v32  ;;  %v208_v50 = vmul.f32 %v1377_v42, %v1561_v2  ;;  %v1424_v40 = vld [vmem:[%s2078_s0 + $0xf8] sm:$0xff]  }
  0x36   :  { %v278_v51 = vadd.f32 %v1575_v8, %v207_v43  ;;  %v1317_v52 = vunpack.c.h.bf16 %v1405_v35  ;;  %v310_v55 = vmax.f32 %v246_v45, 0.0  ;;  %v177_v57 = vmul.f32 %v1316_v47, %v1561_v2  ;;  %v1408_v35 = vld [vmem:[%s2078_s0 + $0x78] sm:$0xff]  }
  0x37   :  { %v378_v54 = vpack.c.bf16 %v341_v44, %v340_v41  ;;  %v311_v56 = vmax.f32 %v247_v46, 0.0  ;;  %1480 = vmatprep.mubr.msk.bf16.mxu0 %vm392_vm0, %v362_v49  ;;  %v279_v58 = vadd.f32 %v1575_v8, %v208_v50  ;;  %v1380_v61 = vunpack.c.l.bf16 %v1421_v48 }
  0x38   :  { %v342_v59 = vmax.f32 %v278_v51, 0.0  ;;  %v178_v60 = vmul.f32 %v1317_v52, %v1561_v2  ;;  %v248_v0 = vadd.f32 %v1575_v8, %v177_v57  ;;  %v1381_v1 = vunpack.c.h.bf16 %v1421_v48 }
  0x39   :  { %1512 = vmatprep.mubr.msk.bf16.mxu1 %vm392_vm0, %v378_v54  ;;  %v363_v63 = vpack.c.bf16 %v311_v56, %v310_v55  ;;  %v1320_v3 = vunpack.c.l.bf16 %v1406_v53  ;;  %v343_v4 = vmax.f32 %v279_v58, 0.0  ;;  %v209_v6 = vmul.f32 %v1380_v61, %v1561_v2 }
  0x3a   :  { %v249_v5 = vadd.f32 %v1575_v8, %v178_v60  ;;  %v1321_v7 = vunpack.c.h.bf16 %v1406_v53  ;;  %v312_v9 = vmax.f32 %v248_v0, 0.0  ;;  %v210_v10 = vmul.f32 %v1381_v1, %v1561_v2 }
  0x3b   :  { %1481 = vmatmul.mubr.msk.bf16.gmra.mrb[20].mxu0 %vm392_vm0, %v363_v63  ;;  %v179_v11 = vmul.f32 %v1320_v3, %v1561_v2  ;;  %v1384_v12 = vunpack.c.l.bf16 %v1422_v62  ;;  %v379_v14 = vpack.c.bf16 %v343_v4, %v342_v59  ;;  %v280_v16 = vadd.f32 %v1575_v8, %v209_v6 }
  0x3c   :  { %v313_v15 = vmax.f32 %v249_v5, 0.0  ;;  %v180_v17 = vmul.f32 %v1321_v7, %v1561_v2  ;;  %v281_v18 = vadd.f32 %v1575_v8, %v210_v10  ;;  %v1385_v20 = vunpack.c.h.bf16 %v1422_v62 }
  0x3d   :  { %v250_v19 = vadd.f32 %v1575_v8, %v179_v11  ;;  %v211_v21 = vmul.f32 %v1384_v12, %v1561_v2  ;;  %1513 = vmatmul.mubr.msk.bf16.gmra.mrb[20].mxu1 %vm392_vm0, %v379_v14  ;;  %v344_v24 = vmax.f32 %v280_v16, 0.0  ;;  %v1324_v26 = vunpack.c.l.bf16 %v1407_v13 }
  0x3e   :  { %v364_v23 = vpack.c.bf16 %v313_v15, %v312_v9  ;;  %v251_v25 = vadd.f32 %v1575_v8, %v180_v17  ;;  %v345_v27 = vmax.f32 %v281_v18, 0.0  ;;  %v212_v29 = vmul.f32 %v1385_v20, %v1561_v2 }
  0x3f   :  { %v314_v28 = vmax.f32 %v250_v19, 0.0  ;;  %v282_v30 = vadd.f32 %v1575_v8, %v211_v21  ;;  %v1325_v32 = vunpack.c.h.bf16 %v1407_v13  ;;  %v181_v33 = vmul.f32 %v1324_v26, %v1561_v2 }
  0x40   :  { %1484 = vmatprep.mubr.msk.bf16.mxu0 %vm392_vm0, %v364_v23  ;;  %v315_v31 = vmax.f32 %v251_v25, 0.0  ;;  %v1388_v34 = vunpack.c.l.bf16 %v1423_v22  ;;  %v380_v36 = vpack.c.bf16 %v345_v27, %v344_v24  ;;  %v283_v37 = vadd.f32 %v1575_v8, %v212_v29 }
  0x41   :  { %v346_v38 = vmax.f32 %v282_v30, 0.0  ;;  %v1389_v39 = vunpack.c.h.bf16 %v1423_v22  ;;  %v182_v42 = vmul.f32 %v1325_v32, %v1561_v2  ;;  %v252_v43 = vadd.f32 %v1575_v8, %v181_v33 }
  0x42   :  { %v365_v41 = vpack.c.bf16 %v315_v31, %v314_v28  ;;  %v213_v44 = vmul.f32 %v1388_v34, %v1561_v2  ;;  %1516 = vmatprep.mubr.msk.bf16.mxu1 %vm392_vm0, %v380_v36  ;;  %v347_v45 = vmax.f32 %v283_v37, 0.0  ;;  %v1328_v47 = vunpack.c.l.bf16 %v1408_v35 }
  0x43   :  { %v214_v46 = vmul.f32 %v1389_v39, %v1561_v2  ;;  %v1329_v48 = vunpack.c.h.bf16 %v1408_v35  ;;  %v253_v49 = vadd.f32 %v1575_v8, %v182_v42  ;;  %v316_v50 = vmax.f32 %v252_v43, 0.0 }
  0x44   :  { %1485 = vmatmul.mubr.msk.bf16.gmra.mrb[24].mxu0 %vm392_vm0, %v365_v41  ;;  %v284_v51 = vadd.f32 %v1575_v8, %v213_v44  ;;  %v1392_v52 = vunpack.c.l.bf16 %v1424_v40  ;;  %v381_v53 = vpack.c.bf16 %v347_v45, %v346_v38  ;;  %v183_v55 = vmul.f32 %v1328_v47, %v1561_v2 }
  0x45   :  { %v285_v54 = vadd.f32 %v1575_v8, %v214_v46  ;;  %v184_v56 = vmul.f32 %v1329_v48, %v1561_v2  ;;  %v317_v57 = vmax.f32 %v253_v49, 0.0  ;;  %v1393_v59 = vunpack.c.h.bf16 %v1424_v40 }
  0x46   :  { %v348_v58 = vmax.f32 %v284_v51, 0.0  ;;  %v215_v60 = vmul.f32 %v1392_v52, %v1561_v2  ;;  %1517 = vmatmul.mubr.msk.bf16.gmra.mrb[24].mxu1 %vm392_vm0, %v381_v53  ;;  %v254_v62 = vadd.f32 %v1575_v8, %v183_v55 }
  0x47   :  { %v349_v61 = vmax.f32 %v285_v54, 0.0  ;;  %v255_v63 = vadd.f32 %v1575_v8, %v184_v56  ;;  %v366_v0 = vpack.c.bf16 %v317_v57, %v316_v50  ;;  %v216_v1 = vmul.f32 %v1393_v59, %v1561_v2 }
  0x48   :  { %v286_v3 = vadd.f32 %v1575_v8, %v215_v60  ;;  %v318_v5 = vmax.f32 %v254_v62, 0.0 }
  0x49   :  { %v382_v4 = vpack.c.bf16 %v349_v61, %v348_v58  ;;  %v319_v6 = vmax.f32 %v255_v63, 0.0  ;;  %1488 = vmatprep.mubr.msk.bf16.mxu0 %vm392_vm0, %v366_v0  ;;  %v287_v7 = vadd.f32 %v1575_v8, %v216_v1 }
  0x4a   :  { %v350_v9 = vmax.f32 %v286_v3, 0.0 }
  0x4b   :  { %1520 = vmatprep.mubr.msk.bf16.mxu1 %vm392_vm0, %v382_v4  ;;  %v367_v10 = vpack.c.bf16 %v319_v6, %v318_v5  ;;  %v351_v11 = vmax.f32 %v287_v7, 0.0 }
  0x4d   :  { %1489 = vmatmul.mubr.msk.bf16.gmra.mrb[28].mxu0 %vm392_vm0, %v367_v10  ;;  %v383_v12 = vpack.c.bf16 %v351_v11, %v350_v9 }
  0x4f   :  { %1521 = vmatmul.mubr.msk.bf16.gmra.mrb[28].mxu1 %vm392_vm0, %v383_v12 }
  0xe1   :  { %v1462_v2 = vpop.f32.mrb[0].mxu0 }
  0xe2   :  { %v1204_v13 = vpack.c.bf16 %v1462_v2, %v1462_v2  ;;  %v523_v15 = vpop.f32.mrb[1].mxu0 }
  0xe3   :  { %v1494_v14 = vpop.f32.mrb[0].mxu1  ;;  %v1202_v17 = vpack.c.bf16 %v523_v15, %v523_v15  ;;  %v1463_v19 = vpop.f32.mrb[2].mxu0 }
  0xe4   :  { %v1236_v16 = vpack.c.bf16 %v1494_v14, %v1494_v14  ;;  %v651_v18 = vpop.f32.mrb[1].mxu1  ;;  %1037 = vst.msk [vmem:[%s2081_s4 + $0x8] sm:$0xf] %vm1034_vm1, %v1204_v13  ;;  %v1205_v20 = vpack.c.bf16 %v1463_v19, %v1463_v19  ;;  %v526_v22 = vpop.f32.mrb[3].mxu0 }
  0xe5   :  { %v1234_v8 = vpack.c.bf16 %v651_v18, %v651_v18  ;;  %v1495_v21 = vpop.f32.mrb[2].mxu1  ;;  %1035 = vst.msk [vmem:[%s2081_s4] sm:$0xf] %vm1034_vm1, %v1202_v17  ;;  %v1203_v24 = vpack.c.bf16 %v526_v22, %v526_v22 }
  0xe6   :  { %1069 = vst.msk [vmem:[%s2081_s4 + $0x88] sm:$0xf] %vm1034_vm1, %v1236_v16  ;;  %v1237_v23 = vpack.c.bf16 %v1495_v21, %v1495_v21  ;;  %v654_v25 = vpop.f32.mrb[3].mxu1  ;;  %1038 = vst.msk [vmem:[%s2081_s4 + $0xc] sm:$0xf] %vm1034_vm1, %v1205_v20 }
  0xe7   :  { %1067 = vst.msk [vmem:[%s2081_s4 + $0x80] sm:$0xf] %vm1034_vm1, %v1234_v8  ;;  %v1235_v26 = vpack.c.bf16 %v654_v25, %v654_v25  ;;  %1036 = vst.msk [vmem:[%s2081_s4 + $0x4] sm:$0xf] %vm1034_vm1, %v1203_v24 }
  0xe8   :  { %1070 = vst.msk [vmem:[%s2081_s4 + $0x8c] sm:$0xf] %vm1034_vm1, %v1237_v23 }
  0xe9   :  { %1068 = vst.msk [vmem:[%s2081_s4 + $0x84] sm:$0xf] %vm1034_vm1, %v1235_v26 }
  0xea   :  { %v1466_v27 = vpop.f32.mrb[4].mxu0 }
  0xeb   :  { %v1208_v28 = vpack.c.bf16 %v1466_v27, %v1466_v27  ;;  %v1498_v29 = vpop.f32.mrb[4].mxu1  ;;  %v539_v30 = vpop.f32.mrb[5].mxu0 }
  0xec   :  { %v1240_v31 = vpack.c.bf16 %v1498_v29, %v1498_v29  ;;  %v1206_v32 = vpack.c.bf16 %v539_v30, %v539_v30  ;;  %v667_v33 = vpop.f32.mrb[5].mxu1  ;;  %v1467_v34 = vpop.f32.mrb[6].mxu0 }
  0xed   :  { %1041 = vst.msk [vmem:[%s2081_s4 + $0x18] sm:$0xf] %vm1034_vm1, %v1208_v28  ;;  %v1238_v35 = vpack.c.bf16 %v667_v33, %v667_v33  ;;  %v1209_v36 = vpack.c.bf16 %v1467_v34, %v1467_v34  ;;  %v1499_v37 = vpop.f32.mrb[6].mxu1  ;;  %v542_v38 = vpop.f32.mrb[7].mxu0 }
  0xee   :  { %1073 = vst.msk [vmem:[%s2081_s4 + $0x98] sm:$0xf] %vm1034_vm1, %v1240_v31  ;;  %1039 = vst.msk [vmem:[%s2081_s4 + $0x10] sm:$0xf] %vm1034_vm1, %v1206_v32  ;;  %v1241_v39 = vpack.c.bf16 %v1499_v37, %v1499_v37  ;;  %v1207_v40 = vpack.c.bf16 %v542_v38, %v542_v38  ;;  %v670_v41 = vpop.f32.mrb[7].mxu1 }
  0xef   :  { %1071 = vst.msk [vmem:[%s2081_s4 + $0x90] sm:$0xf] %vm1034_vm1, %v1238_v35  ;;  %1042 = vst.msk [vmem:[%s2081_s4 + $0x1c] sm:$0xf] %vm1034_vm1, %v1209_v36  ;;  %v1239_v42 = vpack.c.bf16 %v670_v41, %v670_v41 }
  0xf0   :  { %1074 = vst.msk [vmem:[%s2081_s4 + $0x9c] sm:$0xf] %vm1034_vm1, %v1241_v39  ;;  %1040 = vst.msk [vmem:[%s2081_s4 + $0x14] sm:$0xf] %vm1034_vm1, %v1207_v40 }
  0xf1   :  { %1072 = vst.msk [vmem:[%s2081_s4 + $0x94] sm:$0xf] %vm1034_vm1, %v1239_v42 }
  0xf2   :  { %v1470_v43 = vpop.f32.mrb[8].mxu0 }
  0xf3   :  { %v1212_v44 = vpack.c.bf16 %v1470_v43, %v1470_v43  ;;  %v555_v45 = vpop.f32.mrb[9].mxu0 }
  0xf4   :  { %v1210_v47 = vpack.c.bf16 %v555_v45, %v555_v45  ;;  %v1471_v48 = vpop.f32.mrb[10].mxu0 }
  0xf5   :  { %v1502_v46 = vpop.f32.mrb[8].mxu1  ;;  %1045 = vst.msk [vmem:[%s2081_s4 + $0x28] sm:$0xf] %vm1034_vm1, %v1212_v44  ;;  %v1213_v51 = vpack.c.bf16 %v1471_v48, %v1471_v48  ;;  %v558_v52 = vpop.f32.mrb[11].mxu0 }
  0xf6   :  { %v1244_v49 = vpack.c.bf16 %v1502_v46, %v1502_v46  ;;  %v683_v50 = vpop.f32.mrb[9].mxu1  ;;  %1043 = vst.msk [vmem:[%s2081_s4 + $0x20] sm:$0xf] %vm1034_vm1, %v1210_v47  ;;  %v1211_v55 = vpack.c.bf16 %v558_v52, %v558_v52 }
  0xf7   :  { %v1242_v53 = vpack.c.bf16 %v683_v50, %v683_v50  ;;  %v1503_v54 = vpop.f32.mrb[10].mxu1  ;;  %1046 = vst.msk [vmem:[%s2081_s4 + $0x2c] sm:$0xf] %vm1034_vm1, %v1213_v51 }
  0xf8   :  { %1077 = vst.msk [vmem:[%s2081_s4 + $0xa8] sm:$0xf] %vm1034_vm1, %v1244_v49  ;;  %v1245_v56 = vpack.c.bf16 %v1503_v54, %v1503_v54  ;;  %v686_v57 = vpop.f32.mrb[11].mxu1  ;;  %1044 = vst.msk [vmem:[%s2081_s4 + $0x24] sm:$0xf] %vm1034_vm1, %v1211_v55 }
  0xf9   :  { %1075 = vst.msk [vmem:[%s2081_s4 + $0xa0] sm:$0xf] %vm1034_vm1, %v1242_v53  ;;  %v1243_v58 = vpack.c.bf16 %v686_v57, %v686_v57 }
  0xfa   :  { %1078 = vst.msk [vmem:[%s2081_s4 + $0xac] sm:$0xf] %vm1034_vm1, %v1245_v56 }
  0xfb   :  { %1076 = vst.msk [vmem:[%s2081_s4 + $0xa4] sm:$0xf] %vm1034_vm1, %v1243_v58 }
  0xfc   :  { %v1474_v59 = vpop.f32.mrb[12].mxu0 }
  0xfd   :  { %v1216_v60 = vpack.c.bf16 %v1474_v59, %v1474_v59  ;;  %v571_v61 = vpop.f32.mrb[13].mxu0 }
  0xfe   :  { %v1214_v62 = vpack.c.bf16 %v571_v61, %v571_v61  ;;  %v1475_v63 = vpop.f32.mrb[14].mxu0  ;;  %v1506_v0 = vpop.f32.mrb[12].mxu1 }
  0xff   :  { %1049 = vst.msk [vmem:[%s2081_s4 + $0x38] sm:$0xf] %vm1034_vm1, %v1216_v60  ;;  %v1217_v1 = vpack.c.bf16 %v1475_v63, %v1475_v63  ;;  %v574_v3 = vpop.f32.mrb[15].mxu0  ;;  %v1248_v4 = vpack.c.bf16 %v1506_v0, %v1506_v0  ;;  %v699_v5 = vpop.f32.mrb[13].mxu1 }
 0x100   :  { %1047 = vst.msk [vmem:[%s2081_s4 + $0x30] sm:$0xf] %vm1034_vm1, %v1214_v62  ;;  %v1215_v6 = vpack.c.bf16 %v574_v3, %v574_v3  ;;  %v1246_v7 = vpack.c.bf16 %v699_v5, %v699_v5  ;;  %v1507_v9 = vpop.f32.mrb[14].mxu1 }
 0x101   :  { %1050 = vst.msk [vmem:[%s2081_s4 + $0x3c] sm:$0xf] %vm1034_vm1, %v1217_v1  ;;  %1081 = vst.msk [vmem:[%s2081_s4 + $0xb8] sm:$0xf] %vm1034_vm1, %v1248_v4  ;;  %v1249_v10 = vpack.c.bf16 %v1507_v9, %v1507_v9  ;;  %v702_v11 = vpop.f32.mrb[15].mxu1 }
 0x102   :  { %1048 = vst.msk [vmem:[%s2081_s4 + $0x34] sm:$0xf] %vm1034_vm1, %v1215_v6  ;;  %1079 = vst.msk [vmem:[%s2081_s4 + $0xb0] sm:$0xf] %vm1034_vm1, %v1246_v7  ;;  %v1247_v12 = vpack.c.bf16 %v702_v11, %v702_v11 }
 0x103   :  { %1082 = vst.msk [vmem:[%s2081_s4 + $0xbc] sm:$0xf] %vm1034_vm1, %v1249_v10 }
 0x104   :  { %1080 = vst.msk [vmem:[%s2081_s4 + $0xb4] sm:$0xf] %vm1034_vm1, %v1247_v12 }
 0x105   :  { %v1478_v2 = vpop.f32.mrb[16].mxu0 }
 0x106   :  { %v1220_v13 = vpack.c.bf16 %v1478_v2, %v1478_v2  ;;  %v587_v14 = vpop.f32.mrb[17].mxu0 }
 0x107   :  { %v1218_v15 = vpack.c.bf16 %v587_v14, %v587_v14  ;;  %v1479_v16 = vpop.f32.mrb[18].mxu0  ;;  %v1510_v17 = vpop.f32.mrb[16].mxu1 }
 0x108   :  { %1053 = vst.msk [vmem:[%s2081_s4 + $0x48] sm:$0xf] %vm1034_vm1, %v1220_v13  ;;  %v1221_v18 = vpack.c.bf16 %v1479_v16, %v1479_v16  ;;  %v590_v19 = vpop.f32.mrb[19].mxu0  ;;  %v1252_v8 = vpack.c.bf16 %v1510_v17, %v1510_v17  ;;  %v715_v20 = vpop.f32.mrb[17].mxu1 }
 0x109   :  { %1051 = vst.msk [vmem:[%s2081_s4 + $0x40] sm:$0xf] %vm1034_vm1, %v1218_v15  ;;  %v1219_v21 = vpack.c.bf16 %v590_v19, %v590_v19  ;;  %v1250_v22 = vpack.c.bf16 %v715_v20, %v715_v20  ;;  %v1511_v23 = vpop.f32.mrb[18].mxu1 }
 0x10a   :  { %1054 = vst.msk [vmem:[%s2081_s4 + $0x4c] sm:$0xf] %vm1034_vm1, %v1221_v18  ;;  %1085 = vst.msk [vmem:[%s2081_s4 + $0xc8] sm:$0xf] %vm1034_vm1, %v1252_v8  ;;  %v1253_v24 = vpack.c.bf16 %v1511_v23, %v1511_v23  ;;  %v718_v25 = vpop.f32.mrb[19].mxu1 }
 0x10b   :  { %1052 = vst.msk [vmem:[%s2081_s4 + $0x44] sm:$0xf] %vm1034_vm1, %v1219_v21  ;;  %1083 = vst.msk [vmem:[%s2081_s4 + $0xc0] sm:$0xf] %vm1034_vm1, %v1250_v22  ;;  %v1251_v26 = vpack.c.bf16 %v718_v25, %v718_v25 }
 0x10c   :  { %1086 = vst.msk [vmem:[%s2081_s4 + $0xcc] sm:$0xf] %vm1034_vm1, %v1253_v24 }
 0x10d   :  { %1084 = vst.msk [vmem:[%s2081_s4 + $0xc4] sm:$0xf] %vm1034_vm1, %v1251_v26 }
 0x10e   :  { %v1482_v27 = vpop.f32.mrb[20].mxu0 }
 0x10f   :  { %v1224_v28 = vpack.c.bf16 %v1482_v27, %v1482_v27  ;;  %v603_v29 = vpop.f32.mrb[21].mxu0 }
 0x110   :  { %v1222_v30 = vpack.c.bf16 %v603_v29, %v603_v29  ;;  %v1483_v31 = vpop.f32.mrb[22].mxu0  ;;  %v1514_v32 = vpop.f32.mrb[20].mxu1 }
 0x111   :  { %1057 = vst.msk [vmem:[%s2081_s4 + $0x58] sm:$0xf] %vm1034_vm1, %v1224_v28  ;;  %v1225_v33 = vpack.c.bf16 %v1483_v31, %v1483_v31  ;;  %v606_v34 = vpop.f32.mrb[23].mxu0  ;;  %v1256_v35 = vpack.c.bf16 %v1514_v32, %v1514_v32  ;;  %v731_v36 = vpop.f32.mrb[21].mxu1 }
 0x112   :  { %1055 = vst.msk [vmem:[%s2081_s4 + $0x50] sm:$0xf] %vm1034_vm1, %v1222_v30  ;;  %v1223_v37 = vpack.c.bf16 %v606_v34, %v606_v34  ;;  %v1254_v38 = vpack.c.bf16 %v731_v36, %v731_v36  ;;  %v1515_v39 = vpop.f32.mrb[22].mxu1 }
 0x113   :  { %1058 = vst.msk [vmem:[%s2081_s4 + $0x5c] sm:$0xf] %vm1034_vm1, %v1225_v33  ;;  %1089 = vst.msk [vmem:[%s2081_s4 + $0xd8] sm:$0xf] %vm1034_vm1, %v1256_v35  ;;  %v1257_v40 = vpack.c.bf16 %v1515_v39, %v1515_v39  ;;  %v734_v41 = vpop.f32.mrb[23].mxu1 }
 0x114   :  { %1056 = vst.msk [vmem:[%s2081_s4 + $0x54] sm:$0xf] %vm1034_vm1, %v1223_v37  ;;  %1087 = vst.msk [vmem:[%s2081_s4 + $0xd0] sm:$0xf] %vm1034_vm1, %v1254_v38  ;;  %v1255_v42 = vpack.c.bf16 %v734_v41, %v734_v41 }
 0x115   :  { %1090 = vst.msk [vmem:[%s2081_s4 + $0xdc] sm:$0xf] %vm1034_vm1, %v1257_v40 }
 0x116   :  { %1088 = vst.msk [vmem:[%s2081_s4 + $0xd4] sm:$0xf] %vm1034_vm1, %v1255_v42 }
 0x117   :  { %v1486_v43 = vpop.f32.mrb[24].mxu0 }
 0x118   :  { %v1228_v44 = vpack.c.bf16 %v1486_v43, %v1486_v43  ;;  %v619_v45 = vpop.f32.mrb[25].mxu0 }
 0x119   :  { %v1226_v46 = vpack.c.bf16 %v619_v45, %v619_v45  ;;  %v1487_v47 = vpop.f32.mrb[26].mxu0  ;;  %v1518_v48 = vpop.f32.mrb[24].mxu1 }
 0x11a   :  { %1061 = vst.msk [vmem:[%s2081_s4 + $0x68] sm:$0xf] %vm1034_vm1, %v1228_v44  ;;  %v1229_v49 = vpack.c.bf16 %v1487_v47, %v1487_v47  ;;  %v622_v50 = vpop.f32.mrb[27].mxu0  ;;  %v1260_v51 = vpack.c.bf16 %v1518_v48, %v1518_v48  ;;  %v747_v52 = vpop.f32.mrb[25].mxu1 }
 0x11b   :  { %1059 = vst.msk [vmem:[%s2081_s4 + $0x60] sm:$0xf] %vm1034_vm1, %v1226_v46  ;;  %v1227_v53 = vpack.c.bf16 %v622_v50, %v622_v50  ;;  %v1258_v54 = vpack.c.bf16 %v747_v52, %v747_v52  ;;  %v1519_v55 = vpop.f32.mrb[26].mxu1 }
 0x11c   :  { %1062 = vst.msk [vmem:[%s2081_s4 + $0x6c] sm:$0xf] %vm1034_vm1, %v1229_v49  ;;  %1093 = vst.msk [vmem:[%s2081_s4 + $0xe8] sm:$0xf] %vm1034_vm1, %v1260_v51  ;;  %v1261_v56 = vpack.c.bf16 %v1519_v55, %v1519_v55  ;;  %v750_v57 = vpop.f32.mrb[27].mxu1 }
 0x11d   :  { %1060 = vst.msk [vmem:[%s2081_s4 + $0x64] sm:$0xf] %vm1034_vm1, %v1227_v53  ;;  %1091 = vst.msk [vmem:[%s2081_s4 + $0xe0] sm:$0xf] %vm1034_vm1, %v1258_v54  ;;  %v1259_v58 = vpack.c.bf16 %v750_v57, %v750_v57 }
 0x11e   :  { %1094 = vst.msk [vmem:[%s2081_s4 + $0xec] sm:$0xf] %vm1034_vm1, %v1261_v56 }
 0x11f   :  { %1092 = vst.msk [vmem:[%s2081_s4 + $0xe4] sm:$0xf] %vm1034_vm1, %v1259_v58 }
 0x120   :  { %v1490_v59 = vpop.f32.mrb[28].mxu0 }
 0x121   :  { %v1232_v60 = vpack.c.bf16 %v1490_v59, %v1490_v59  ;;  %v635_v61 = vpop.f32.mrb[29].mxu0 }
 0x122   :  { %v1230_v62 = vpack.c.bf16 %v635_v61, %v635_v61  ;;  %v1491_v63 = vpop.f32.mrb[30].mxu0  ;;  %v1522_v0 = vpop.f32.mrb[28].mxu1 }
 0x123   :  { %1065 = vst.msk [vmem:[%s2081_s4 + $0x78] sm:$0xf] %vm1034_vm1, %v1232_v60  ;;  %v1233_v1 = vpack.c.bf16 %v1491_v63, %v1491_v63  ;;  %v638_v3 = vpop.f32.mrb[31].mxu0  ;;  %v1264_v4 = vpack.c.bf16 %v1522_v0, %v1522_v0  ;;  %v763_v5 = vpop.f32.mrb[29].mxu1 }
 0x124   :  { %1063 = vst.msk [vmem:[%s2081_s4 + $0x70] sm:$0xf] %vm1034_vm1, %v1230_v62  ;;  %v1231_v6 = vpack.c.bf16 %v638_v3, %v638_v3  ;;  %v1262_v7 = vpack.c.bf16 %v763_v5, %v763_v5  ;;  %v1523_v9 = vpop.f32.mrb[30].mxu1 }
 0x125   :  { %1066 = vst.msk [vmem:[%s2081_s4 + $0x7c] sm:$0xf] %vm1034_vm1, %v1233_v1  ;;  %1097 = vst.msk [vmem:[%s2081_s4 + $0xf8] sm:$0xf] %vm1034_vm1, %v1264_v4  ;;  %v1265_v10 = vpack.c.bf16 %v1523_v9, %v1523_v9  ;;  %v766_v11 = vpop.f32.mrb[31].mxu1 }
 0x126   :  { %1064 = vst.msk [vmem:[%s2081_s4 + $0x74] sm:$0xf] %vm1034_vm1, %v1231_v6  ;;  %1095 = vst.msk [vmem:[%s2081_s4 + $0xf0] sm:$0xf] %vm1034_vm1, %v1262_v7  ;;  %v1263_v12 = vpack.c.bf16 %v766_v11, %v766_v11 }
 0x127   :  { %1098 = vst.msk [vmem:[%s2081_s4 + $0xfc] sm:$0xf] %vm1034_vm1, %v1265_v10 }
 0x128   :  { %1096 = vst.msk [vmem:[%s2081_s4 + $0xf4] sm:$0xf] %vm1034_vm1, %v1263_v12 }

// kernel: _forward.4
= control target key start
LH: loop header
LB: loop body
LE: loop exit
PB: predicated region body
PF: predicated region fallthrough
CT: control target
= control target key end

     0   :  { %vm395_vm0 = vcmask 130048   ;;  %vm1371_vm1 = vcmask 60416   ;;  %vm781_vm2 = vcmask 64512   ;;  %vm915_vm3 = vcmask 57344   ;;  %s2824_s3 = inlined_call_operand.vmem [shape: bf16[16,8], index: 3, kind: input, shape index: {}]   ;;  %s2825_s0 = inlined_call_operand.vmem [shape: bf16[512,16], index: 0, kind: input, shape index: {}]   ;;  %s2826_s1 = inlined_call_operand.vmem [shape: f32[1,16], index: 1, kind: input, shape index: {}]   ;;  %s2827_s2 = inlined_call_operand.vmem [shape: f32[1,16], index: 2, kind: input, shape index: {}]   ;;  %s2828_s4 = inlined_call_operand.vmem [shape: bf16[512,8], index: 4, kind: output, shape index: {0}]   ;;  %s2829_s5 = inlined_call_operand.vmem [shape: f32[1,1,8], index: 5, kind: output, shape index: {1}]   ;;  %s2830_s6 = inlined_call_operand.vmem [shape: f32[1,1,8], index: 6, kind: output, shape index: {2}]  }
   0x1   :  { %v1871_v0 = vld [vmem:[%s2824_s3] sm:$0xff]   ;;  %v1739_v5 = vld [vmem:[%s2825_s0 + $0x8] sm:$0xff]   ;;  %v1740_v6 = vld [vmem:[%s2825_s0 + $0x10] sm:$0xff]  }
   0x2   :  { %v1612_v1 = vld [vmem:[%s2825_s0] sm:$0xff]   ;;  %1803 = vmatprep.subr.bf16.mxu0 %v1871_v0  ;;  %v1741_v7 = vld [vmem:[%s2825_s0 + $0x18] sm:$0xff]   ;;  %1869 = vmatprep.subr.bf16.mxu1 %v1871_v0  ;;  %v1617_v9 = vunpack.c.l.bf16 %v1739_v5  ;;  %v1618_v10 = vunpack.c.h.bf16 %v1739_v5  ;;  %v1621_v11 = vunpack.c.l.bf16 %v1740_v6  ;;  %v1622_v12 = vunpack.c.h.bf16 %v1740_v6  ;;  %v1743_v34 = vld [vmem:[%s2825_s0 + $0x28] sm:$0xff]  }
   0x3   :  { %v1916_v2 = vld [vmem:[%s2826_s1] ss:$0 sm:$0xff]  ;;  %v1613_v3 = vunpack.c.l.bf16 %v1612_v1  ;;  %v1614_v4 = vunpack.c.h.bf16 %v1612_v1  ;;  %1804 = vmatpush3.bf16.msra.mxu0 %v1871_v0  ;;  %1870 = vmatpush3.bf16.msra.mxu1 %v1871_v0  ;;  %v1625_v15 = vunpack.c.l.bf16 %v1741_v7  ;;  %v1626_v16 = vunpack.c.h.bf16 %v1741_v7  ;;  %v1744_v39 = vld [vmem:[%s2825_s0 + $0x30] sm:$0xff]   ;;  %v1745_v50 = vld [vmem:[%s2825_s0 + $0x38] sm:$0xff]  }
   0x4   :  { %v1930_v8 = vld [vmem:[%s2827_s2] ss:$0 sm:$0xff]  ;;  %v158_v17 = vmul.f32 %v1617_v9, %v1916_v2  ;;  %v159_v18 = vmul.f32 %v1618_v10, %v1916_v2  ;;  %v160_v19 = vmul.f32 %v1621_v11, %v1916_v2  ;;  %v161_v20 = vmul.f32 %v1622_v12, %v1916_v2  ;;  %v1747_v7 = vld [vmem:[%s2825_s0 + $0x48] sm:$0xff]   ;;  %v1748_v10 = vld [vmem:[%s2825_s0 + $0x50] sm:$0xff]  }
   0x5   :  { %v156_v13 = vmul.f32 %v1613_v3, %v1916_v2  ;;  %v157_v14 = vmul.f32 %v1614_v4, %v1916_v2  ;;  %v162_v23 = vmul.f32 %v1625_v15, %v1916_v2  ;;  %v163_v24 = vmul.f32 %v1626_v16, %v1916_v2  ;;  %v1742_v29 = vld [vmem:[%s2825_s0 + $0x20] sm:$0xff]  }
   0x6   :  { %v229_v25 = vadd.f32 %v1930_v8, %v158_v17  ;;  %v230_v26 = vadd.f32 %v1930_v8, %v159_v18  ;;  %v231_v27 = vadd.f32 %v1930_v8, %v160_v19  ;;  %v232_v28 = vadd.f32 %v1930_v8, %v161_v20  ;;  %v1746_v62 = vld [vmem:[%s2825_s0 + $0x40] sm:$0xff]   ;;  %v1749_v19 = vld [vmem:[%s2825_s0 + $0x58] sm:$0xff]  }
   0x7   :  { %v227_v21 = vadd.f32 %v1930_v8, %v156_v13  ;;  %v228_v22 = vadd.f32 %v1930_v8, %v157_v14  ;;  %v233_v32 = vadd.f32 %v1930_v8, %v162_v23  ;;  %v234_v33 = vadd.f32 %v1930_v8, %v163_v24 }
   0x8   :  { %v293_v35 = vmax.f32 %v229_v25, 0.0  ;;  %v294_v36 = vmax.f32 %v230_v26, 0.0  ;;  %v295_v37 = vmax.f32 %v231_v27, 0.0  ;;  %v296_v38 = vmax.f32 %v232_v28, 0.0 }
   0x9   :  { %v291_v30 = vmax.f32 %v227_v21, 0.0  ;;  %v292_v31 = vmax.f32 %v228_v22, 0.0  ;;  %v1629_v41 = vunpack.c.l.bf16 %v1742_v29  ;;  %v1630_v44 = vunpack.c.h.bf16 %v1742_v29 }
   0xa   :  { %v356_v42 = vpack.c.bf16 %v294_v36, %v293_v35  ;;  %v357_v43 = vpack.c.bf16 %v296_v38, %v295_v37  ;;  %v1633_v45 = vunpack.c.l.bf16 %v1743_v34  ;;  %v297_v46 = vmax.f32 %v233_v32, 0.0 }
   0xb   :  { %v355_v40 = vpack.c.bf16 %v292_v31, %v291_v30  ;;  %v164_v47 = vmul.f32 %v1629_v41, %v1916_v2  ;;  %v1634_v48 = vunpack.c.h.bf16 %v1743_v34  ;;  %v1637_v49 = vunpack.c.l.bf16 %v1744_v39  ;;  %v1750_v30 = vld [vmem:[%s2825_s0 + $0x60] sm:$0xff]  }
   0xc   :  { %v298_v51 = vmax.f32 %v234_v33, 0.0  ;;  %v165_v52 = vmul.f32 %v1630_v44, %v1916_v2  ;;  %v166_v53 = vmul.f32 %v1633_v45, %v1916_v2  ;;  %v1638_v54 = vunpack.c.h.bf16 %v1744_v39 }
   0xd   :  { %1805 = vmatprep.mubr.msk.bf16.mxu0 %vm395_vm0, %v355_v40  ;;  %v235_v55 = vadd.f32 %v1930_v8, %v164_v47  ;;  %v167_v56 = vmul.f32 %v1634_v48, %v1916_v2  ;;  %v168_v57 = vmul.f32 %v1637_v49, %v1916_v2  ;;  %v1641_v60 = vunpack.c.l.bf16 %v1745_v50 }
   0xe   :  { %1806 = vmatmul.mubr.msk.bf16.vlgmr.msra.gmra.mrb[0].mxu0 %vm395_vm0, %v356_v42  ;;  %v236_v58 = vadd.f32 %v1930_v8, %v165_v52  ;;  %v169_v59 = vmul.f32 %v1638_v54, %v1916_v2  ;;  %v1642_v61 = vunpack.c.h.bf16 %v1745_v50  ;;  %v237_v0 = vadd.f32 %v1930_v8, %v166_v53 }
   0xf   :  { %1809 = vmatprep.mubr.msk.bf16.mxu0 %vm395_vm0, %v357_v43  ;;  %v299_v63 = vmax.f32 %v235_v55, 0.0  ;;  %v238_v1 = vadd.f32 %v1930_v8, %v167_v56  ;;  %v239_v3 = vadd.f32 %v1930_v8, %v168_v57  ;;  %v358_v4 = vpack.c.bf16 %v298_v51, %v297_v46  ;;  %v1751_v43 = vld [vmem:[%s2825_s0 + $0x68] sm:$0xff]   ;;  %v1752_v55 = vld [vmem:[%s2825_s0 + $0x70] sm:$0xff]  }
  0x10   :  { %v300_v5 = vmax.f32 %v236_v58, 0.0  ;;  %v240_v6 = vadd.f32 %v1930_v8, %v169_v59  ;;  %v1645_v9 = vunpack.c.l.bf16 %v1746_v62  ;;  %v170_v12 = vmul.f32 %v1641_v60, %v1916_v2 }
  0x11   :  { %v171_v13 = vmul.f32 %v1642_v61, %v1916_v2  ;;  %v1646_v14 = vunpack.c.h.bf16 %v1746_v62  ;;  %v301_v15 = vmax.f32 %v237_v0, 0.0  ;;  %v302_v16 = vmax.f32 %v238_v1, 0.0  ;;  %v2026_v0 = vld [vmem:[%s2825_s0 + $0x78] sm:$0xff]   ;;  %v1754_v1 = vld [vmem:[%s2825_s0 + $0x80] sm:$0xff]  }
  0x12   :  { %v359_v11 = vpack.c.bf16 %v300_v5, %v299_v63  ;;  %v303_v17 = vmax.f32 %v239_v3, 0.0  ;;  %v1649_v18 = vunpack.c.l.bf16 %v1747_v7  ;;  %v304_v20 = vmax.f32 %v240_v6, 0.0 }
  0x13   :  { %v172_v21 = vmul.f32 %v1645_v9, %v1916_v2  ;;  %v1650_v22 = vunpack.c.h.bf16 %v1747_v7  ;;  %v1653_v23 = vunpack.c.l.bf16 %v1748_v10  ;;  %v173_v24 = vmul.f32 %v1646_v14, %v1916_v2 }
  0x14   :  { %v174_v25 = vmul.f32 %v1649_v18, %v1916_v2  ;;  %v1654_v26 = vunpack.c.h.bf16 %v1748_v10  ;;  %v1657_v29 = vunpack.c.l.bf16 %v1749_v19  ;;  %v241_v31 = vadd.f32 %v1930_v8, %v170_v12  ;;  %v1755_v18 = vld [vmem:[%s2825_s0 + $0x88] sm:$0xff]  }
  0x15   :  { %v175_v27 = vmul.f32 %v1650_v22, %v1916_v2  ;;  %v176_v28 = vmul.f32 %v1653_v23, %v1916_v2  ;;  %v242_v32 = vadd.f32 %v1930_v8, %v171_v13  ;;  %v1658_v34 = vunpack.c.h.bf16 %v1749_v19  ;;  %v1756_v23 = vld [vmem:[%s2825_s0 + $0x90] sm:$0xff]  }
  0x16   :  { %1810 = vmatmul.mubr.msk.bf16.gmra.mrb[4].mxu0 %vm395_vm0, %v358_v4  ;;  %v177_v33 = vmul.f32 %v1654_v26, %v1916_v2  ;;  %v360_v35 = vpack.c.bf16 %v302_v16, %v301_v15  ;;  %v361_v36 = vpack.c.bf16 %v304_v20, %v303_v17  ;;  %v243_v37 = vadd.f32 %v1930_v8, %v172_v21 }
  0x17   :  { %1813 = vmatprep.mubr.msk.bf16.mxu0 %vm395_vm0, %v359_v11  ;;  %v178_v38 = vmul.f32 %v1657_v29, %v1916_v2  ;;  %v244_v39 = vadd.f32 %v1930_v8, %v173_v24  ;;  %v245_v40 = vadd.f32 %v1930_v8, %v174_v25  ;;  %v179_v41 = vmul.f32 %v1658_v34, %v1916_v2 }
  0x18   :  { %v1661_v42 = vunpack.c.l.bf16 %v1750_v30  ;;  %v246_v44 = vadd.f32 %v1930_v8, %v175_v27  ;;  %v247_v45 = vadd.f32 %v1930_v8, %v176_v28  ;;  %v248_v46 = vadd.f32 %v1930_v8, %v177_v33 }
  0x19   :  { %v249_v47 = vadd.f32 %v1930_v8, %v178_v38  ;;  %v250_v48 = vadd.f32 %v1930_v8, %v179_v41  ;;  %v1662_v49 = vunpack.c.h.bf16 %v1750_v30  ;;  %v305_v51 = vmax.f32 %v241_v31, 0.0 }
  0x1a   :  { %v180_v50 = vmul.f32 %v1661_v42, %v1916_v2  ;;  %v306_v52 = vmax.f32 %v242_v32, 0.0  ;;  %v1665_v53 = vunpack.c.l.bf16 %v1751_v43  ;;  %v1666_v54 = vunpack.c.h.bf16 %v1751_v43  ;;  %v1757_v32 = vld [vmem:[%s2825_s0 + $0x98] sm:$0xff]  }
  0x1b   :  { %v307_v56 = vmax.f32 %v243_v37, 0.0  ;;  %v308_v57 = vmax.f32 %v244_v39, 0.0  ;;  %v309_v58 = vmax.f32 %v245_v40, 0.0  ;;  %v181_v59 = vmul.f32 %v1662_v49, %v1916_v2 }
  0x1c   :  { %v310_v60 = vmax.f32 %v246_v44, 0.0  ;;  %v311_v61 = vmax.f32 %v247_v45, 0.0  ;;  %v312_v62 = vmax.f32 %v248_v46, 0.0  ;;  %v182_v63 = vmul.f32 %v1665_v53, %v1916_v2  ;;  %v1758_v45 = vld [vmem:[%s2825_s0 + $0xa0] sm:$0xff]  }
  0x1d   :  { %v313_v3 = vmax.f32 %v249_v47, 0.0  ;;  %v314_v4 = vmax.f32 %v250_v48, 0.0  ;;  %v2032_v5 = vadd.f32 %v1930_v8, %v180_v50  ;;  %v1669_v6 = vunpack.c.l.bf16 %v1752_v55 }
  0x1e   :  { %1814 = vmatmul.mubr.msk.bf16.gmra.mrb[8].mxu0 %vm395_vm0, %v360_v35  ;;  %v362_v7 = vpack.c.bf16 %v306_v52, %v305_v51  ;;  %v2035_v9 = vadd.f32 %v1930_v8, %v181_v59  ;;  %v183_v10 = vmul.f32 %v1666_v54, %v1916_v2  ;;  %v1670_v11 = vunpack.c.h.bf16 %v1752_v55  ;;  %v1759_v54 = vld [vmem:[%s2825_s0 + $0xa8] sm:$0xff]  }
  0x1f   :  { %1817 = vmatprep.mubr.msk.bf16.mxu0 %vm395_vm0, %v361_v36  ;;  %v363_v12 = vpack.c.bf16 %v308_v57, %v307_v56  ;;  %v1673_v13 = vunpack.c.l.bf16 %v2026_v0  ;;  %v1677_v14 = vunpack.c.l.bf16 %v1754_v1  ;;  %v364_v15 = vpack.c.bf16 %v310_v60, %v309_v58 }
  0x20   :  { %v365_v16 = vpack.c.bf16 %v312_v62, %v311_v61  ;;  %v2040_v17 = vadd.f32 %v1930_v8, %v182_v63  ;;  %v2045_v19 = vpack.c.bf16 %v314_v4, %v313_v3  ;;  %v315_v20 = vmax.f32 %v2032_v5, 0.0  ;;  %v1762_v5 = vld [vmem:[%s2825_s0 + $0xc0] sm:$0xff]  }
  0x21   :  { %v184_v21 = vmul.f32 %v1669_v6, %v1916_v2  ;;  %v1678_v22 = vunpack.c.h.bf16 %v1754_v1  ;;  %v316_v24 = vmax.f32 %v2035_v9, 0.0  ;;  %v2055_v25 = vadd.f32 %v1930_v8, %v183_v10  ;;  %v1760_v6 = vld [vmem:[%s2825_s0 + $0xb0] sm:$0xff]  }
  0x22   :  { %v185_v26 = vmul.f32 %v1670_v11, %v1916_v2  ;;  %v188_v27 = vmul.f32 %v1677_v14, %v1916_v2  ;;  %v1674_v28 = vunpack.c.h.bf16 %v2026_v0  ;;  %v2062_v29 = vmul.f32 %v1673_v13, %v1916_v2 }
  0x23   :  { %v189_v30 = vmul.f32 %v1678_v22, %v1916_v2  ;;  %v1681_v31 = vunpack.c.l.bf16 %v1755_v18  ;;  %v317_v33 = vmax.f32 %v2040_v17, 0.0  ;;  %v1682_v35 = vunpack.c.h.bf16 %v1755_v18  ;;  %v1764_v17 = vld [vmem:[%s2825_s0 + $0xd0] sm:$0xff]  }
  0x24   :  { %v259_v34 = vadd.f32 %v1930_v8, %v188_v27  ;;  %v1685_v36 = vunpack.c.l.bf16 %v1756_v23  ;;  %v2071_v37 = vadd.f32 %v1930_v8, %v184_v21  ;;  %v1686_v40 = vunpack.c.h.bf16 %v1756_v23  ;;  %v1761_v23 = vld [vmem:[%s2825_s0 + $0xb8] sm:$0xff]  }
  0x25   :  { %v260_v38 = vadd.f32 %v1930_v8, %v189_v30  ;;  %v190_v39 = vmul.f32 %v1681_v31, %v1916_v2  ;;  %v191_v42 = vmul.f32 %v1682_v35, %v1916_v2  ;;  %v1689_v44 = vunpack.c.l.bf16 %v1757_v32 }
  0x26   :  { %1818 = vmatmul.mubr.msk.bf16.gmra.mrb[12].mxu0 %vm395_vm0, %v362_v7  ;;  %v323_v41 = vmax.f32 %v259_v34, 0.0  ;;  %v192_v43 = vmul.f32 %v1685_v36, %v1916_v2  ;;  %v2081_v46 = vadd.f32 %v1930_v8, %v185_v26  ;;  %v193_v49 = vmul.f32 %v1686_v40, %v1916_v2 }
  0x27   :  { %1821 = vmatprep.mubr.msk.bf16.mxu0 %vm395_vm0, %v363_v12  ;;  %v324_v47 = vmax.f32 %v260_v38, 0.0  ;;  %v261_v48 = vadd.f32 %v1930_v8, %v190_v39  ;;  %v262_v50 = vadd.f32 %v1930_v8, %v191_v42  ;;  %v1690_v52 = vunpack.c.h.bf16 %v1757_v32 }
  0x28   :  { %v263_v51 = vadd.f32 %v1930_v8, %v192_v43  ;;  %v194_v53 = vmul.f32 %v1689_v44, %v1916_v2  ;;  %v264_v57 = vadd.f32 %v1930_v8, %v193_v49  ;;  %v1693_v58 = vunpack.c.l.bf16 %v1758_v45 }
  0x29   :  { %v371_v55 = vpack.c.bf16 %v324_v47, %v323_v41  ;;  %v325_v56 = vmax.f32 %v261_v48, 0.0  ;;  %v326_v59 = vmax.f32 %v262_v50, 0.0  ;;  %v195_v61 = vmul.f32 %v1690_v52, %v1916_v2 }
  0x2a   :  { %v327_v60 = vmax.f32 %v263_v51, 0.0  ;;  %v265_v62 = vadd.f32 %v1930_v8, %v194_v53  ;;  %v328_v63 = vmax.f32 %v264_v57, 0.0  ;;  %v1694_v1 = vunpack.c.h.bf16 %v1758_v45  ;;  %v1763_v51 = vld [vmem:[%s2825_s0 + $0xc8] sm:$0xff]  }
  0x2b   :  { %1837 = vmatprep.mubr.msk.bf16.mxu1 %vm395_vm0, %v371_v55  ;;  %v196_v3 = vmul.f32 %v1693_v58, %v1916_v2  ;;  %v1697_v4 = vunpack.c.l.bf16 %v1759_v54  ;;  %v372_v7 = vpack.c.bf16 %v326_v59, %v325_v56  ;;  %v266_v9 = vadd.f32 %v1930_v8, %v195_v61 }
  0x2c   :  { %v329_v10 = vmax.f32 %v265_v62, 0.0  ;;  %v1698_v11 = vunpack.c.h.bf16 %v1759_v54  ;;  %v373_v12 = vpack.c.bf16 %v328_v63, %v327_v60  ;;  %v197_v13 = vmul.f32 %v1694_v1, %v1916_v2 }
  0x2d   :  { %v267_v14 = vadd.f32 %v1930_v8, %v196_v3  ;;  %1838 = vmatmul.mubr.msk.bf16.vlgmr.msra.gmra.mrb[0].mxu1 %vm395_vm0, %v372_v7  ;;  %v1701_v21 = vunpack.c.l.bf16 %v1760_v6  ;;  %v1702_v22 = vunpack.c.h.bf16 %v1760_v6  ;;  %v367_v26 = vpack.c.bf16 %v316_v24, %v315_v20 }
  0x2e   :  { %1822 = vmatmul.mubr.msk.bf16.gmra.mrb[16].mxu0 %vm395_vm0, %v364_v15  ;;  %v198_v15 = vmul.f32 %v1697_v4, %v1916_v2  ;;  %v199_v18 = vmul.f32 %v1698_v11, %v1916_v2  ;;  %v318_v27 = vmax.f32 %v2055_v25, 0.0  ;;  %1841 = vmatprep.mubr.msk.bf16.mxu1 %vm395_vm0, %v373_v12  ;;  %v268_v30 = vadd.f32 %v1930_v8, %v197_v13  ;;  %v1765_v13 = vld [vmem:[%s2825_s0 + $0xd8] sm:$0xff]  }
  0x2f   :  { %1825 = vmatprep.mubr.msk.bf16.mxu0 %vm395_vm0, %v365_v16  ;;  %v330_v16 = vmax.f32 %v266_v9, 0.0  ;;  %v331_v31 = vmax.f32 %v267_v14, 0.0  ;;  %v319_v32 = vmax.f32 %v2071_v37, 0.0  ;;  %v187_v34 = vmul.f32 %v1674_v28, %v1916_v2 }
  0x30   :  { %v200_v35 = vmul.f32 %v1701_v21, %v1916_v2  ;;  %v201_v36 = vmul.f32 %v1702_v22, %v1916_v2  ;;  %v320_v20 = vmax.f32 %v2081_v46, 0.0  ;;  %v332_v24 = vmax.f32 %v268_v30, 0.0 }
  0x31   :  { %v1705_v25 = vunpack.c.l.bf16 %v1761_v23  ;;  %v1706_v38 = vunpack.c.h.bf16 %v1761_v23  ;;  %v374_v37 = vpack.c.bf16 %v330_v16, %v329_v10  ;;  %v269_v0 = vadd.f32 %v1930_v8, %v198_v15  ;;  %v1766_v16 = vld [vmem:[%s2825_s0 + $0xe0] sm:$0xff]  }
  0x32   :  { %v270_v28 = vadd.f32 %v1930_v8, %v199_v18  ;;  %v271_v39 = vadd.f32 %v1930_v8, %v200_v35  ;;  %v375_v40 = vpack.c.bf16 %v332_v24, %v331_v31  ;;  %v272_v41 = vadd.f32 %v1930_v8, %v201_v36 }
  0x33   :  { %v1709_v42 = vunpack.c.l.bf16 %v1762_v5  ;;  %v1710_v43 = vunpack.c.h.bf16 %v1762_v5  ;;  %v257_v44 = vadd.f32 %v1930_v8, %v2062_v29  ;;  %v258_v45 = vadd.f32 %v1930_v8, %v187_v34 }
  0x34   :  { %v203_v46 = vmul.f32 %v1706_v38, %v1916_v2  ;;  %v368_v47 = vpack.c.bf16 %v318_v27, %v317_v33  ;;  %v369_v48 = vpack.c.bf16 %v320_v20, %v319_v32  ;;  %v333_v49 = vmax.f32 %v269_v0, 0.0  ;;  %v1767_v38 = vld [vmem:[%s2825_s0 + $0xe8] sm:$0xff]  }
  0x35   :  { %1842 = vmatmul.mubr.msk.bf16.gmra.mrb[4].mxu1 %vm395_vm0, %v374_v37  ;;  %v334_v50 = vmax.f32 %v270_v28, 0.0  ;;  %v335_v29 = vmax.f32 %v271_v39, 0.0  ;;  %v336_v52 = vmax.f32 %v272_v41, 0.0  ;;  %v204_v53 = vmul.f32 %v1709_v42, %v1916_v2  ;;  %v1768_v28 = vld [vmem:[%s2825_s0 + $0xf0] sm:$0xff]  }
  0x36   :  { %1826 = vmatmul.mubr.msk.bf16.gmra.mrb[20].mxu0 %vm395_vm0, %v2045_v19  ;;  %v202_v19 = vmul.f32 %v1705_v25, %v1916_v2  ;;  %1845 = vmatprep.mubr.msk.bf16.mxu1 %vm395_vm0, %v375_v40  ;;  %v205_v54 = vmul.f32 %v1710_v43, %v1916_v2  ;;  %v321_v33 = vmax.f32 %v257_v44, 0.0  ;;  %v322_v55 = vmax.f32 %v258_v45, 0.0 }
  0x37   :  { %1829 = vmatprep.mubr.msk.bf16.mxu0 %vm395_vm0, %v367_v26  ;;  %v274_v57 = vadd.f32 %v1930_v8, %v203_v46  ;;  %v1713_v58 = vunpack.c.l.bf16 %v1763_v51  ;;  %v376_v59 = vpack.c.bf16 %v334_v50, %v333_v49  ;;  %v1714_v60 = vunpack.c.h.bf16 %v1763_v51 }
  0x38   :  { %v273_v56 = vadd.f32 %v1930_v8, %v202_v19  ;;  %v1717_v61 = vunpack.c.l.bf16 %v1764_v17  ;;  %v1718_v62 = vunpack.c.h.bf16 %v1764_v17  ;;  %v377_v63 = vpack.c.bf16 %v336_v52, %v335_v29  ;;  %v1769_v17 = vld [vmem:[%s2825_s0 + $0xf8] sm:$0xff]  }
  0x39   :  { %v275_v1 = vadd.f32 %v1930_v8, %v204_v53  ;;  %v276_v3 = vadd.f32 %v1930_v8, %v205_v54  ;;  %v338_v6 = vmax.f32 %v274_v57, 0.0  ;;  %v206_v7 = vmul.f32 %v1713_v58, %v1916_v2 }
  0x3a   :  { %v337_v4 = vmax.f32 %v273_v56, 0.0  ;;  %v370_v9 = vpack.c.bf16 %v322_v55, %v321_v33  ;;  %v207_v10 = vmul.f32 %v1714_v60, %v1916_v2  ;;  %v208_v11 = vmul.f32 %v1717_v61, %v1916_v2 }
  0x3b   :  { %v209_v12 = vmul.f32 %v1718_v62, %v1916_v2  ;;  %v339_v14 = vmax.f32 %v275_v1, 0.0  ;;  %v340_v15 = vmax.f32 %v276_v3, 0.0  ;;  %v277_v21 = vadd.f32 %v1930_v8, %v206_v7 }
  0x3c   :  { %v378_v18 = vpack.c.bf16 %v338_v6, %v337_v4  ;;  %v1721_v22 = vunpack.c.l.bf16 %v1765_v13  ;;  %v278_v23 = vadd.f32 %v1930_v8, %v207_v10  ;;  %v279_v26 = vadd.f32 %v1930_v8, %v208_v11 }
  0x3d   :  { %1846 = vmatmul.mubr.msk.bf16.gmra.mrb[8].mxu1 %vm395_vm0, %v376_v59  ;;  %v280_v27 = vadd.f32 %v1930_v8, %v209_v12  ;;  %v1722_v30 = vunpack.c.h.bf16 %v1765_v13  ;;  %v379_v31 = vpack.c.bf16 %v340_v15, %v339_v14  ;;  %v1725_v32 = vunpack.c.l.bf16 %v1766_v16 }
  0x3e   :  { %1830 = vmatmul.mubr.msk.bf16.gmra.mrb[24].mxu0 %vm395_vm0, %v368_v47  ;;  %1849 = vmatprep.mubr.msk.bf16.mxu1 %vm395_vm0, %v377_v63  ;;  %v1726_v34 = vunpack.c.h.bf16 %v1766_v16  ;;  %v341_v35 = vmax.f32 %v277_v21, 0.0  ;;  %v210_v36 = vmul.f32 %v1721_v22, %v1916_v2  ;;  %v342_v5 = vmax.f32 %v278_v23, 0.0 }
  0x3f   :  { %1833 = vmatprep.mubr.msk.bf16.mxu0 %vm395_vm0, %v369_v48  ;;  %v343_v20 = vmax.f32 %v279_v26, 0.0  ;;  %v344_v24 = vmax.f32 %v280_v27, 0.0  ;;  %v211_v25 = vmul.f32 %v1722_v30, %v1916_v2  ;;  %v212_v37 = vmul.f32 %v1725_v32, %v1916_v2 }
  0x40   :  { %v213_v0 = vmul.f32 %v1726_v34, %v1916_v2  ;;  %v281_v39 = vadd.f32 %v1930_v8, %v210_v36  ;;  %v1729_v40 = vunpack.c.l.bf16 %v1767_v38  ;;  %v380_v41 = vpack.c.bf16 %v342_v5, %v341_v35 }
  0x41   :  { %v381_v42 = vpack.c.bf16 %v344_v24, %v343_v20  ;;  %v282_v43 = vadd.f32 %v1930_v8, %v211_v25  ;;  %v1730_v44 = vunpack.c.h.bf16 %v1767_v38  ;;  %v283_v45 = vadd.f32 %v1930_v8, %v212_v37 }
  0x42   :  { %v284_v19 = vadd.f32 %v1930_v8, %v213_v0  ;;  %v1733_v46 = vunpack.c.l.bf16 %v1768_v28  ;;  %v1734_v47 = vunpack.c.h.bf16 %v1768_v28  ;;  %v214_v48 = vmul.f32 %v1729_v40, %v1916_v2 }
  0x43   :  { %v345_v49 = vmax.f32 %v281_v39, 0.0  ;;  %v346_v50 = vmax.f32 %v282_v43, 0.0  ;;  %v215_v51 = vmul.f32 %v1730_v44, %v1916_v2  ;;  %v347_v29 = vmax.f32 %v283_v45, 0.0 }
  0x44   :  { %v348_v52 = vmax.f32 %v284_v19, 0.0  ;;  %v216_v53 = vmul.f32 %v1733_v46, %v1916_v2  ;;  %v217_v54 = vmul.f32 %v1734_v47, %v1916_v2  ;;  %v285_v33 = vadd.f32 %v1930_v8, %v214_v48 }
  0x45   :  { %1850 = vmatmul.mubr.msk.bf16.gmra.mrb[12].mxu1 %vm395_vm0, %v378_v18  ;;  %v382_v55 = vpack.c.bf16 %v346_v50, %v345_v49  ;;  %v286_v56 = vadd.f32 %v1930_v8, %v215_v51  ;;  %v1737_v57 = vunpack.c.l.bf16 %v1769_v17  ;;  %v1738_v58 = vunpack.c.h.bf16 %v1769_v17 }
  0x46   :  { %1834 = vmatmul.mubr.msk.bf16.gmra.mrb[28].mxu0 %vm395_vm0, %v370_v9  ;;  %1853 = vmatprep.mubr.msk.bf16.mxu1 %vm395_vm0, %v379_v31  ;;  %v383_v59 = vpack.c.bf16 %v348_v52, %v347_v29  ;;  %v287_v60 = vadd.f32 %v1930_v8, %v216_v53  ;;  %v288_v61 = vadd.f32 %v1930_v8, %v217_v54  ;;  %v349_v62 = vmax.f32 %v285_v33, 0.0 }
  0x47   :  { %v350_v63 = vmax.f32 %v286_v56, 0.0  ;;  %v218_v1 = vmul.f32 %v1737_v57, %v1916_v2  ;;  %v219_v3 = vmul.f32 %v1738_v58, %v1916_v2 }
  0x48   :  { %v351_v4 = vmax.f32 %v287_v60, 0.0  ;;  %v352_v6 = vmax.f32 %v288_v61, 0.0 }
  0x49   :  { %v384_v7 = vpack.c.bf16 %v350_v63, %v349_v62  ;;  %v289_v9 = vadd.f32 %v1930_v8, %v218_v1  ;;  %v290_v10 = vadd.f32 %v1930_v8, %v219_v3 }
  0x4a   :  { %v385_v11 = vpack.c.bf16 %v352_v6, %v351_v4 }
  0x4b   :  { %v353_v12 = vmax.f32 %v289_v9, 0.0  ;;  %v354_v13 = vmax.f32 %v290_v10, 0.0 }
  0x4d   :  { %1854 = vmatmul.mubr.msk.bf16.gmra.mrb[16].mxu1 %vm395_vm0, %v380_v41  ;;  %v386_v14 = vpack.c.bf16 %v354_v13, %v353_v12 }
  0x4e   :  { %1857 = vmatprep.mubr.msk.bf16.mxu1 %vm395_vm0, %v381_v42 }
  0x55   :  { %1858 = vmatmul.mubr.msk.bf16.gmra.mrb[20].mxu1 %vm395_vm0, %v382_v55 }
  0x56   :  { %1861 = vmatprep.mubr.msk.bf16.mxu1 %vm395_vm0, %v383_v59 }
  0x5d   :  { %1862 = vmatmul.mubr.msk.bf16.gmra.mrb[24].mxu1 %vm395_vm0, %v384_v7 }
  0x5e   :  { %1865 = vmatprep.mubr.msk.bf16.mxu1 %vm395_vm0, %v385_v11 }
  0x65   :  { %1866 = vmatmul.mubr.msk.bf16.gmra.mrb[28].mxu1 %vm395_vm0, %v386_v14 }
  0xe1   :  { %v1807_v2 = vpop.f32.mrb[0].mxu0 }
  0xe2   :  { %v1549_v15 = vpack.c.bf16 %v1807_v2, %v1807_v2  ;;  %v526_v16 = vpop.f32.mrb[1].mxu0  ;;  %v919_v23 = vmul.f32 %v1807_v2, %v1807_v2  ;;  %v785_v36 = vsel %vm781_vm2, %v1807_v2, 0.0 }
  0xe3   :  { %v917_v18 = vmul.f32 %v526_v16, %v526_v16  ;;  %v1547_v21 = vpack.c.bf16 %v526_v16, %v526_v16  ;;  %v1808_v22 = vpop.f32.mrb[2].mxu0  ;;  %v782_v27 = vsel %vm781_vm2, %v526_v16, 0.0 }
  0xe4   :  { %1374 = vst.msk [vmem:[%s2828_s4 + $0x8] sm:$0xf] %vm1371_vm1, %v1549_v15  ;;  %v1550_v8 = vpack.c.bf16 %v1808_v22, %v1808_v22  ;;  %v529_v26 = vpop.f32.mrb[3].mxu0  ;;  %v920_v34 = vmul.f32 %v1808_v22, %v1808_v22  ;;  %v984_v38 = vsel %vm781_vm2, %v919_v23, 0.0  ;;  %v787_v0 = vsel %vm781_vm2, %v1808_v22, 0.0 }
  0xe5   :  { %1372 = vst.msk [vmem:[%s2828_s4] sm:$0xf] %vm1371_vm1, %v1547_v21  ;;  %v783_v30 = vsel %vm781_vm2, %v529_v26, 0.0  ;;  %v918_v31 = vmul.f32 %v529_v26, %v529_v26  ;;  %v1548_v32 = vpack.c.bf16 %v529_v26, %v529_v26  ;;  %v981_v5 = vsel %vm781_vm2, %v917_v18, 0.0 }
  0xe6   :  { %1375 = vst.msk [vmem:[%s2828_s4 + $0xc] sm:$0xf] %vm1371_vm1, %v1550_v8  ;;  %v784_v35 = vadd.f32 %v783_v30, %v782_v27  ;;  %v986_v28 = vsel %vm781_vm2, %v920_v34, 0.0 }
  0xe7   :  { %v982_v20 = vsel %vm781_vm2, %v918_v31, 0.0  ;;  %1373 = vst.msk [vmem:[%s2828_s4 + $0x4] sm:$0xf] %vm1371_vm1, %v1548_v32 }
  0xe8   :  { %v786_v24 = vadd.f32 %v785_v36, %v784_v35  ;;  %v983_v25 = vadd.f32 %v982_v20, %v981_v5 }
  0xe9   :  { %v1811_v37 = vpop.f32.mrb[4].mxu0 }
  0xea   :  { %v985_v39 = vadd.f32 %v984_v38, %v983_v25  ;;  %v1553_v40 = vpack.c.bf16 %v1811_v37, %v1811_v37  ;;  %v542_v41 = vpop.f32.mrb[5].mxu0  ;;  %v788_v42 = vadd.f32 %v787_v0, %v786_v24  ;;  %v923_v29 = vmul.f32 %v1811_v37, %v1811_v37 }
  0xeb   :  { %v789_v43 = vsel %vm781_vm2, %v542_v41, 0.0  ;;  %v921_v44 = vmul.f32 %v542_v41, %v542_v41  ;;  %v1551_v45 = vpack.c.bf16 %v542_v41, %v542_v41  ;;  %v1812_v19 = vpop.f32.mrb[6].mxu0  ;;  %v793_v33 = vsel %vm781_vm2, %v1811_v37, 0.0 }
  0xec   :  { %1378 = vst.msk [vmem:[%s2828_s4 + $0x18] sm:$0xf] %vm1371_vm1, %v1553_v40  ;;  %v987_v46 = vadd.f32 %v986_v28, %v985_v39  ;;  %v545_v47 = vpop.f32.mrb[7].mxu0  ;;  %v790_v48 = vadd.f32 %v789_v43, %v788_v42  ;;  %v1554_v50 = vpack.c.bf16 %v1812_v19, %v1812_v19  ;;  %v924_v55 = vmul.f32 %v1812_v19, %v1812_v19 }
  0xed   :  { %v988_v49 = vsel %vm781_vm2, %v921_v44, 0.0  ;;  %1376 = vst.msk [vmem:[%s2828_s4 + $0x10] sm:$0xf] %vm1371_vm1, %v1551_v45  ;;  %v791_v51 = vsel %vm781_vm2, %v545_v47, 0.0  ;;  %v922_v53 = vmul.f32 %v545_v47, %v545_v47  ;;  %v1552_v54 = vpack.c.bf16 %v545_v47, %v545_v47 }
  0xee   :  { %v989_v52 = vadd.f32 %v988_v49, %v987_v46  ;;  %1379 = vst.msk [vmem:[%s2828_s4 + $0x1c] sm:$0xf] %vm1371_vm1, %v1554_v50  ;;  %v792_v17 = vadd.f32 %v791_v51, %v790_v48  ;;  %v992_v60 = vsel %vm781_vm2, %v923_v29, 0.0  ;;  %v795_v61 = vsel %vm781_vm2, %v1812_v19, 0.0 }
  0xef   :  { %v990_v56 = vsel %vm781_vm2, %v922_v53, 0.0  ;;  %1377 = vst.msk [vmem:[%s2828_s4 + $0x14] sm:$0xf] %vm1371_vm1, %v1552_v54  ;;  %v994_v9 = vsel %vm781_vm2, %v924_v55, 0.0 }
  0xf0   :  { %v794_v57 = vadd.f32 %v793_v33, %v792_v17  ;;  %v991_v58 = vadd.f32 %v990_v56, %v989_v52 }
  0xf1   :  { %v1815_v59 = vpop.f32.mrb[8].mxu0 }
  0xf2   :  { %v1557_v62 = vpack.c.bf16 %v1815_v59, %v1815_v59  ;;  %v558_v63 = vpop.f32.mrb[9].mxu0  ;;  %v993_v1 = vadd.f32 %v992_v60, %v991_v58  ;;  %v796_v3 = vadd.f32 %v795_v61, %v794_v57  ;;  %v927_v15 = vmul.f32 %v1815_v59, %v1815_v59 }
  0xf3   :  { %v797_v4 = vsel %vm781_vm2, %v558_v63, 0.0  ;;  %v925_v6 = vmul.f32 %v558_v63, %v558_v63  ;;  %v1816_v7 = vpop.f32.mrb[10].mxu0  ;;  %v1555_v10 = vpack.c.bf16 %v558_v63, %v558_v63  ;;  %v801_v8 = vsel %vm781_vm2, %v1815_v59, 0.0 }
  0xf4   :  { %1382 = vst.msk [vmem:[%s2828_s4 + $0x28] sm:$0xf] %vm1371_vm1, %v1557_v62  ;;  %v561_v11 = vpop.f32.mrb[11].mxu0  ;;  %v798_v12 = vadd.f32 %v797_v4, %v796_v3  ;;  %v995_v13 = vadd.f32 %v994_v9, %v993_v1  ;;  %v1558_v2 = vpack.c.bf16 %v1816_v7, %v1816_v7  ;;  %v928_v26 = vmul.f32 %v1816_v7, %v1816_v7 }
  0xf5   :  { %v996_v14 = vsel %vm781_vm2, %v925_v6, 0.0  ;;  %1380 = vst.msk [vmem:[%s2828_s4 + $0x20] sm:$0xf] %vm1371_vm1, %v1555_v10  ;;  %v799_v16 = vsel %vm781_vm2, %v561_v11, 0.0  ;;  %v926_v18 = vmul.f32 %v561_v11, %v561_v11  ;;  %v1556_v21 = vpack.c.bf16 %v561_v11, %v561_v11 }
  0xf6   :  { %v997_v22 = vadd.f32 %v996_v14, %v995_v13  ;;  %1383 = vst.msk [vmem:[%s2828_s4 + $0x2c] sm:$0xf] %vm1371_vm1, %v1558_v2  ;;  %v800_v23 = vadd.f32 %v799_v16, %v798_v12  ;;  %v1000_v34 = vsel %vm781_vm2, %v927_v15, 0.0  ;;  %v803_v35 = vsel %vm781_vm2, %v1816_v7, 0.0 }
  0xf7   :  { %v998_v27 = vsel %vm781_vm2, %v926_v18, 0.0  ;;  %1381 = vst.msk [vmem:[%s2828_s4 + $0x24] sm:$0xf] %vm1371_vm1, %v1556_v21  ;;  %v1002_v0 = vsel %vm781_vm2, %v928_v26, 0.0 }
  0xf8   :  { %v802_v30 = vadd.f32 %v801_v8, %v800_v23  ;;  %v999_v31 = vadd.f32 %v998_v27, %v997_v22 }
  0xf9   :  { %v1819_v32 = vpop.f32.mrb[12].mxu0 }
  0xfa   :  { %v1561_v36 = vpack.c.bf16 %v1819_v32, %v1819_v32  ;;  %v574_v5 = vpop.f32.mrb[13].mxu0  ;;  %v1001_v20 = vadd.f32 %v1000_v34, %v999_v31  ;;  %v804_v24 = vadd.f32 %v803_v35, %v802_v30  ;;  %v931_v44 = vmul.f32 %v1819_v32, %v1819_v32 }
  0xfb   :  { %v805_v25 = vsel %vm781_vm2, %v574_v5, 0.0  ;;  %v929_v38 = vmul.f32 %v574_v5, %v574_v5  ;;  %v1820_v37 = vpop.f32.mrb[14].mxu0  ;;  %v1559_v28 = vpack.c.bf16 %v574_v5, %v574_v5  ;;  %v809_v49 = vsel %vm781_vm2, %v1819_v32, 0.0 }
  0xfc   :  { %1386 = vst.msk [vmem:[%s2828_s4 + $0x38] sm:$0xf] %vm1371_vm1, %v1561_v36  ;;  %v577_v39 = vpop.f32.mrb[15].mxu0  ;;  %v806_v40 = vadd.f32 %v805_v25, %v804_v24  ;;  %v1003_v41 = vadd.f32 %v1002_v0, %v1001_v20  ;;  %v1562_v43 = vpack.c.bf16 %v1820_v37, %v1820_v37  ;;  %v932_v50 = vmul.f32 %v1820_v37, %v1820_v37 }
  0xfd   :  { %v1004_v42 = vsel %vm781_vm2, %v929_v38, 0.0  ;;  %1384 = vst.msk [vmem:[%s2828_s4 + $0x30] sm:$0xf] %vm1371_vm1, %v1559_v28  ;;  %v807_v45 = vsel %vm781_vm2, %v577_v39, 0.0  ;;  %v930_v19 = vmul.f32 %v577_v39, %v577_v39  ;;  %v1560_v46 = vpack.c.bf16 %v577_v39, %v577_v39 }
  0xfe   :  { %v1005_v47 = vadd.f32 %v1004_v42, %v1003_v41  ;;  %1387 = vst.msk [vmem:[%s2828_s4 + $0x3c] sm:$0xf] %vm1371_vm1, %v1562_v43  ;;  %v808_v48 = vadd.f32 %v807_v45, %v806_v40  ;;  %v1008_v54 = vsel %vm781_vm2, %v931_v44, 0.0  ;;  %v811_v17 = vsel %vm781_vm2, %v1820_v37, 0.0 }
  0xff   :  { %v1006_v51 = vsel %vm781_vm2, %v930_v19, 0.0  ;;  %1385 = vst.msk [vmem:[%s2828_s4 + $0x34] sm:$0xf] %vm1371_vm1, %v1560_v46  ;;  %v1010_v61 = vsel %vm781_vm2, %v932_v50, 0.0 }
 0x100   :  { %v810_v29 = vadd.f32 %v809_v49, %v808_v48  ;;  %v1007_v52 = vadd.f32 %v1006_v51, %v1005_v47  ;;  %v2312_v7 = vpop.f32.mrb[0].mxu1 }
 0x101   :  { %v1823_v53 = vpop.f32.mrb[16].mxu0  ;;  %v2319_v13 = vpop.f32.mrb[1].mxu1  ;;  %v1581_v22 = vpack.c.bf16 %v2312_v7, %v2312_v7 }
 0x102   :  { %v1565_v33 = vpack.c.bf16 %v1823_v53, %v1823_v53  ;;  %v590_v55 = vpop.f32.mrb[17].mxu0  ;;  %v1009_v56 = vadd.f32 %v1008_v54, %v1007_v52  ;;  %v812_v57 = vadd.f32 %v811_v17, %v810_v29  ;;  %v935_v9 = vmul.f32 %v1823_v53, %v1823_v53  ;;  %v2325_v15 = vpop.f32.mrb[2].mxu1 }
 0x103   :  { %v813_v58 = vsel %vm781_vm2, %v590_v55, 0.0  ;;  %v933_v59 = vmul.f32 %v590_v55, %v590_v55  ;;  %v1824_v60 = vpop.f32.mrb[18].mxu0  ;;  %v1563_v62 = vpack.c.bf16 %v590_v55, %v590_v55  ;;  %v817_v16 = vsel %vm781_vm2, %v1823_v53, 0.0  ;;  %v2335_v23 = vpop.f32.mrb[3].mxu1  ;;  %1406 = vst.msk [vmem:[%s2828_s4 + $0x88] sm:$0xf] %vm1371_vm1, %v1581_v22 }
 0x104   :  { %1390 = vst.msk [vmem:[%s2828_s4 + $0x48] sm:$0xf] %vm1371_vm1, %v1565_v33  ;;  %v593_v63 = vpop.f32.mrb[19].mxu0  ;;  %v814_v1 = vadd.f32 %v813_v58, %v812_v57  ;;  %v1011_v3 = vadd.f32 %v1010_v61, %v1009_v56  ;;  %v1566_v6 = vpack.c.bf16 %v1824_v60, %v1824_v60  ;;  %v936_v18 = vmul.f32 %v1824_v60, %v1824_v60 }
 0x105   :  { %v1012_v4 = vsel %vm781_vm2, %v933_v59, 0.0  ;;  %1388 = vst.msk [vmem:[%s2828_s4 + $0x40] sm:$0xf] %vm1371_vm1, %v1563_v62  ;;  %v815_v10 = vsel %vm781_vm2, %v593_v63, 0.0  ;;  %v934_v11 = vmul.f32 %v593_v63, %v593_v63  ;;  %v1564_v12 = vpack.c.bf16 %v593_v63, %v593_v63 }
 0x106   :  { %v1013_v14 = vadd.f32 %v1012_v4, %v1011_v3  ;;  %1391 = vst.msk [vmem:[%s2828_s4 + $0x4c] sm:$0xf] %vm1371_vm1, %v1566_v6  ;;  %v816_v2 = vadd.f32 %v815_v10, %v814_v1  ;;  %v1579_v30 = vpack.c.bf16 %v2319_v13, %v2319_v13  ;;  %v1016_v31 = vsel %vm781_vm2, %v935_v9, 0.0 }
 0x107   :  { %v1014_v21 = vsel %vm781_vm2, %v934_v11, 0.0  ;;  %1389 = vst.msk [vmem:[%s2828_s4 + $0x44] sm:$0xf] %vm1371_vm1, %v1564_v12  ;;  %v819_v32 = vsel %vm781_vm2, %v1824_v60, 0.0  ;;  %v1018_v38 = vsel %vm781_vm2, %v936_v18, 0.0  ;;  %v1582_v52 = vpack.c.bf16 %v2325_v15, %v2325_v15 }
 0x108   :  { %v818_v8 = vadd.f32 %v817_v16, %v816_v2  ;;  %v1015_v26 = vadd.f32 %v1014_v21, %v1013_v14  ;;  %1404 = vst.msk [vmem:[%s2828_s4 + $0x80] sm:$0xf] %vm1371_vm1, %v1579_v30  ;;  %v2356_v42 = vpop.f32.mrb[4].mxu1  ;;  %v1580_v55 = vpack.c.bf16 %v2335_v23, %v2335_v23 }
 0x109   :  { %v1827_v27 = vpop.f32.mrb[20].mxu0  ;;  %v2363_v46 = vpop.f32.mrb[5].mxu1  ;;  %1407 = vst.msk [vmem:[%s2828_s4 + $0x8c] sm:$0xf] %vm1371_vm1, %v1582_v52 }
 0x10a   :  { %v1569_v34 = vpack.c.bf16 %v1827_v27, %v1827_v27  ;;  %v606_v35 = vpop.f32.mrb[21].mxu0  ;;  %v1017_v36 = vadd.f32 %v1016_v31, %v1015_v26  ;;  %v820_v5 = vadd.f32 %v819_v32, %v818_v8  ;;  %v939_v43 = vmul.f32 %v1827_v27, %v1827_v27  ;;  %v2369_v49 = vpop.f32.mrb[6].mxu1  ;;  %1405 = vst.msk [vmem:[%s2828_s4 + $0x84] sm:$0xf] %vm1371_vm1, %v1580_v55 }
 0x10b   :  { %v821_v20 = vsel %vm781_vm2, %v606_v35, 0.0  ;;  %v937_v24 = vmul.f32 %v606_v35, %v606_v35  ;;  %v1828_v25 = vpop.f32.mrb[22].mxu0  ;;  %v1567_v37 = vpack.c.bf16 %v606_v35, %v606_v35  ;;  %v825_v50 = vsel %vm781_vm2, %v1827_v27, 0.0  ;;  %v2379_v53 = vpop.f32.mrb[7].mxu1 }
 0x10c   :  { %1394 = vst.msk [vmem:[%s2828_s4 + $0x58] sm:$0xf] %vm1371_vm1, %v1569_v34  ;;  %v609_v0 = vpop.f32.mrb[23].mxu0  ;;  %v822_v28 = vadd.f32 %v821_v20, %v820_v5  ;;  %v1019_v39 = vadd.f32 %v1018_v38, %v1017_v36  ;;  %v1570_v41 = vpack.c.bf16 %v1828_v25, %v1828_v25  ;;  %v940_v51 = vmul.f32 %v1828_v25, %v1828_v25 }
 0x10d   :  { %v1020_v40 = vsel %vm781_vm2, %v937_v24, 0.0  ;;  %1392 = vst.msk [vmem:[%s2828_s4 + $0x50] sm:$0xf] %vm1371_vm1, %v1567_v37  ;;  %v823_v44 = vsel %vm781_vm2, %v609_v0, 0.0  ;;  %v938_v45 = vmul.f32 %v609_v0, %v609_v0  ;;  %v1568_v19 = vpack.c.bf16 %v609_v0, %v609_v0 }
 0x10e   :  { %v1021_v47 = vadd.f32 %v1020_v40, %v1019_v39  ;;  %1395 = vst.msk [vmem:[%s2828_s4 + $0x5c] sm:$0xf] %vm1371_vm1, %v1570_v41  ;;  %v824_v48 = vadd.f32 %v823_v44, %v822_v28  ;;  %v1024_v56 = vsel %vm781_vm2, %v939_v43, 0.0  ;;  %v827_v57 = vsel %vm781_vm2, %v1828_v25, 0.0 }
 0x10f   :  { %v1022_v29 = vsel %vm781_vm2, %v938_v45, 0.0  ;;  %1393 = vst.msk [vmem:[%s2828_s4 + $0x54] sm:$0xf] %vm1371_vm1, %v1568_v19  ;;  %v1026_v3 = vsel %vm781_vm2, %v940_v51, 0.0  ;;  %v1585_v34 = vpack.c.bf16 %v2356_v42, %v2356_v42  ;;  %v1583_v24 = vpack.c.bf16 %v2363_v46, %v2363_v46 }
 0x110   :  { %v826_v54 = vadd.f32 %v825_v50, %v824_v48  ;;  %v1023_v17 = vadd.f32 %v1022_v29, %v1021_v47  ;;  %v2400_v14 = vpop.f32.mrb[8].mxu1 }
 0x111   :  { %v1831_v33 = vpop.f32.mrb[24].mxu0  ;;  %v2407_v22 = vpop.f32.mrb[9].mxu1  ;;  %1410 = vst.msk [vmem:[%s2828_s4 + $0x98] sm:$0xf] %vm1371_vm1, %v1585_v34  ;;  %1408 = vst.msk [vmem:[%s2828_s4 + $0x90] sm:$0xf] %vm1371_vm1, %v1583_v24  ;;  %v951_v34 = vmul.f32 %v2312_v7, %v2312_v7 }
 0x112   :  { %v1573_v58 = vpack.c.bf16 %v1831_v33, %v1831_v33  ;;  %v622_v59 = vpop.f32.mrb[25].mxu0  ;;  %v1025_v60 = vadd.f32 %v1024_v56, %v1023_v17  ;;  %v828_v61 = vadd.f32 %v827_v57, %v826_v54  ;;  %v943_v2 = vmul.f32 %v1831_v33, %v1831_v33  ;;  %v2413_v27 = vpop.f32.mrb[10].mxu1 }
 0x113   :  { %v829_v62 = vsel %vm781_vm2, %v622_v59, 0.0  ;;  %v941_v63 = vmul.f32 %v622_v59, %v622_v59  ;;  %v1832_v1 = vpop.f32.mrb[26].mxu0  ;;  %v1571_v4 = vpack.c.bf16 %v622_v59, %v622_v59  ;;  %v833_v30 = vsel %vm781_vm2, %v1831_v33, 0.0  ;;  %v2423_v35 = vpop.f32.mrb[11].mxu1 }
 0x114   :  { %1398 = vst.msk [vmem:[%s2828_s4 + $0x68] sm:$0xf] %vm1371_vm1, %v1573_v58  ;;  %v625_v6 = vpop.f32.mrb[27].mxu0  ;;  %v830_v9 = vadd.f32 %v829_v62, %v828_v61  ;;  %v1027_v10 = vadd.f32 %v1026_v3, %v1025_v60  ;;  %v1574_v12 = vpack.c.bf16 %v1832_v1, %v1832_v1  ;;  %v944_v31 = vmul.f32 %v1832_v1, %v1832_v1 }
 0x115   :  { %v1028_v11 = vsel %vm781_vm2, %v941_v63, 0.0  ;;  %1396 = vst.msk [vmem:[%s2828_s4 + $0x60] sm:$0xf] %vm1371_vm1, %v1571_v4  ;;  %v831_v16 = vsel %vm781_vm2, %v625_v6, 0.0  ;;  %v942_v18 = vmul.f32 %v625_v6, %v625_v6  ;;  %v1572_v21 = vpack.c.bf16 %v625_v6, %v625_v6 }
 0x116   :  { %v1029_v8 = vadd.f32 %v1028_v11, %v1027_v10  ;;  %1399 = vst.msk [vmem:[%s2828_s4 + $0x6c] sm:$0xf] %vm1371_vm1, %v1574_v12  ;;  %v832_v26 = vadd.f32 %v831_v16, %v830_v9  ;;  %v1032_v25 = vsel %vm781_vm2, %v943_v2, 0.0  ;;  %v835_v38 = vsel %vm781_vm2, %v1832_v1, 0.0 }
 0x117   :  { %v1030_v32 = vsel %vm781_vm2, %v942_v18, 0.0  ;;  %1397 = vst.msk [vmem:[%s2828_s4 + $0x64] sm:$0xf] %vm1371_vm1, %v1572_v21  ;;  %v1034_v44 = vsel %vm781_vm2, %v944_v31, 0.0  ;;  %v949_v58 = vmul.f32 %v2319_v13, %v2319_v13  ;;  %v1586_v63 = vpack.c.bf16 %v2369_v49, %v2369_v49 }
 0x118   :  { %v834_v36 = vadd.f32 %v833_v30, %v832_v26  ;;  %v1031_v5 = vadd.f32 %v1030_v32, %v1029_v8  ;;  %v2444_v29 = vpop.f32.mrb[12].mxu1  ;;  %v1584_v6 = vpack.c.bf16 %v2379_v53, %v2379_v53  ;;  %v845_v11 = vsel %vm781_vm2, %v2319_v13, 0.0 }
 0x119   :  { %v1835_v20 = vpop.f32.mrb[28].mxu0  ;;  %v2451_v55 = vpop.f32.mrb[13].mxu1  ;;  %1411 = vst.msk [vmem:[%s2828_s4 + $0x9c] sm:$0xf] %vm1371_vm1, %v1586_v63  ;;  %v1589_v12 = vpack.c.bf16 %v2400_v14, %v2400_v14  ;;  %v1044_v21 = vsel %vm781_vm2, %v949_v58, 0.0  ;;  %v950_v13 = vmul.f32 %v2335_v23, %v2335_v23  ;;  %v1587_v8 = vpack.c.bf16 %v2407_v22, %v2407_v22 }
 0x11a   :  { %v1577_v37 = vpack.c.bf16 %v1835_v20, %v1835_v20  ;;  %v638_v0 = vpop.f32.mrb[29].mxu0  ;;  %v1033_v28 = vadd.f32 %v1032_v25, %v1031_v5  ;;  %v836_v39 = vadd.f32 %v835_v38, %v834_v36  ;;  %v947_v52 = vmul.f32 %v1835_v20, %v1835_v20  ;;  %v2459_v59 = vpop.f32.mrb[14].mxu1  ;;  %1409 = vst.msk [vmem:[%s2828_s4 + $0x94] sm:$0xf] %vm1371_vm1, %v1584_v6 }
 0x11b   :  { %v837_v40 = vsel %vm781_vm2, %v638_v0, 0.0  ;;  %v945_v41 = vmul.f32 %v638_v0, %v638_v0  ;;  %v1836_v43 = vpop.f32.mrb[30].mxu0  ;;  %v1575_v45 = vpack.c.bf16 %v638_v0, %v638_v0  ;;  %v841_v60 = vsel %vm781_vm2, %v1835_v20, 0.0  ;;  %v2469_v1 = vpop.f32.mrb[15].mxu1  ;;  %1414 = vst.msk [vmem:[%s2828_s4 + $0xa8] sm:$0xf] %vm1371_vm1, %v1589_v12 }
 0x11c   :  { %1402 = vst.msk [vmem:[%s2828_s4 + $0x78] sm:$0xf] %vm1371_vm1, %v1577_v37  ;;  %v641_v19 = vpop.f32.mrb[31].mxu0  ;;  %v838_v47 = vadd.f32 %v837_v40, %v836_v39  ;;  %v1035_v48 = vadd.f32 %v1034_v44, %v1033_v28  ;;  %v1578_v51 = vpack.c.bf16 %v1836_v43, %v1836_v43  ;;  %v948_v61 = vmul.f32 %v1836_v43, %v1836_v43 }
 0x11d   :  { %v1036_v50 = vsel %vm781_vm2, %v945_v41, 0.0  ;;  %1400 = vst.msk [vmem:[%s2828_s4 + $0x70] sm:$0xf] %vm1371_vm1, %v1575_v45  ;;  %v839_v54 = vsel %vm781_vm2, %v641_v19, 0.0  ;;  %v946_v17 = vmul.f32 %v641_v19, %v641_v19  ;;  %v1576_v33 = vpack.c.bf16 %v641_v19, %v641_v19  ;;  %1412 = vst.msk [vmem:[%s2828_s4 + $0xa0] sm:$0xf] %vm1371_vm1, %v1587_v8 }
 0x11e   :  { %v1037_v56 = vadd.f32 %v1036_v50, %v1035_v48  ;;  %1403 = vst.msk [vmem:[%s2828_s4 + $0x7c] sm:$0xf] %vm1371_vm1, %v1578_v51  ;;  %v840_v57 = vadd.f32 %v839_v54, %v838_v47  ;;  %v1040_v9 = vsel %vm781_vm2, %v947_v52, 0.0  ;;  %v843_v10 = vsel %vm781_vm2, %v1836_v43, 0.0 }
 0x11f   :  { %v1038_v62 = vsel %vm781_vm2, %v946_v17, 0.0  ;;  %1401 = vst.msk [vmem:[%s2828_s4 + $0x74] sm:$0xf] %vm1371_vm1, %v1576_v33  ;;  %v1042_v18 = vsel %vm781_vm2, %v948_v61, 0.0  ;;  %v1590_v31 = vpack.c.bf16 %v2413_v27, %v2413_v27  ;;  %v847_v36 = vsel %vm781_vm2, %v2335_v23, 0.0 }
 0x120   :  { %v842_v3 = vadd.f32 %v841_v60, %v840_v57  ;;  %v1039_v4 = vadd.f32 %v1038_v62, %v1037_v56  ;;  %v2499_v32 = vpop.f32.mrb[16].mxu1  ;;  %v1588_v5 = vpack.c.bf16 %v2423_v35, %v2423_v35  ;;  %v849_v24 = vsel %vm781_vm2, %v2312_v7, 0.0 }
 0x121   :  { %v2511_v20 = vpop.f32.mrb[17].mxu1  ;;  %1415 = vst.msk [vmem:[%s2828_s4 + $0xac] sm:$0xf] %vm1371_vm1, %v1590_v31  ;;  %v952_v37 = vmul.f32 %v2325_v15, %v2325_v15  ;;  %v1046_v0 = vsel %vm781_vm2, %v950_v13, 0.0  ;;  %v953_v28 = vmul.f32 %v2363_v46, %v2363_v46  ;;  %v1593_v7 = vpack.c.bf16 %v2444_v29, %v2444_v29 }
 0x122   :  { %v1041_v2 = vadd.f32 %v1040_v9, %v1039_v4  ;;  %v844_v16 = vadd.f32 %v843_v10, %v842_v3  ;;  %v2519_v23 = vpop.f32.mrb[18].mxu1  ;;  %1413 = vst.msk [vmem:[%s2828_s4 + $0xa4] sm:$0xf] %vm1371_vm1, %v1588_v5  ;;  %v1591_v43 = vpack.c.bf16 %v2451_v55, %v2451_v55  ;;  %v1048_v44 = vsel %vm781_vm2, %v951_v34, 0.0 }
 0x123   :  { %v2532_v39 = vpop.f32.mrb[19].mxu1  ;;  %v851_v45 = vsel %vm781_vm2, %v2325_v15, 0.0  ;;  %v853_v19 = vsel %vm781_vm2, %v2363_v46, 0.0  ;;  %1418 = vst.msk [vmem:[%s2828_s4 + $0xb8] sm:$0xf] %vm1371_vm1, %v1593_v7  ;;  %v1594_v47 = vpack.c.bf16 %v2459_v59, %v2459_v59  ;;  %v1050_v15 = vsel %vm781_vm2, %v952_v37, 0.0 }
 0x124   :  { %v846_v26 = vadd.f32 %v845_v11, %v844_v16  ;;  %v1043_v30 = vadd.f32 %v1042_v18, %v1041_v2  ;;  %1416 = vst.msk [vmem:[%s2828_s4 + $0xb0] sm:$0xf] %vm1371_vm1, %v1591_v43  ;;  %v1052_v51 = vsel %vm781_vm2, %v953_v28, 0.0  ;;  %v954_v46 = vmul.f32 %v2379_v53, %v2379_v53 }
 0x125   :  { %1419 = vst.msk [vmem:[%s2828_s4 + $0xbc] sm:$0xf] %vm1371_vm1, %v1594_v47  ;;  %v1592_v52 = vpack.c.bf16 %v2469_v1, %v2469_v1  ;;  %v1597_v33 = vpack.c.bf16 %v2499_v32, %v2499_v32  ;;  %v955_v57 = vmul.f32 %v2356_v42, %v2356_v42  ;;  %v855_v58 = vsel %vm781_vm2, %v2379_v53, 0.0 }
 0x126   :  { %v1045_v25 = vadd.f32 %v1044_v21, %v1043_v30  ;;  %v848_v38 = vadd.f32 %v847_v36, %v846_v26  ;;  %v1595_v60 = vpack.c.bf16 %v2511_v20, %v2511_v20  ;;  %v857_v62 = vsel %vm781_vm2, %v2356_v42, 0.0 }
 0x127   :  { %1417 = vst.msk [vmem:[%s2828_s4 + $0xb4] sm:$0xf] %vm1371_vm1, %v1592_v52  ;;  %1422 = vst.msk [vmem:[%s2828_s4 + $0xc8] sm:$0xf] %vm1371_vm1, %v1597_v33  ;;  %v956_v4 = vmul.f32 %v2369_v49, %v2369_v49  ;;  %v1054_v6 = vsel %vm781_vm2, %v954_v46, 0.0  ;;  %v957_v9 = vmul.f32 %v2407_v22, %v2407_v22  ;;  %v1598_v42 = vpack.c.bf16 %v2519_v23, %v2519_v23 }
 0x128   :  { %v850_v40 = vadd.f32 %v849_v24, %v848_v38  ;;  %v1047_v41 = vadd.f32 %v1046_v0, %v1045_v25  ;;  %v2563_v56 = vpop.f32.mrb[20].mxu1  ;;  %1420 = vst.msk [vmem:[%s2828_s4 + $0xc0] sm:$0xf] %vm1371_vm1, %v1595_v60  ;;  %v1596_v2 = vpack.c.bf16 %v2532_v39, %v2532_v39  ;;  %v1056_v16 = vsel %vm781_vm2, %v955_v57, 0.0 }
 0x129   :  { %v2575_v61 = vpop.f32.mrb[21].mxu1  ;;  %v859_v18 = vsel %vm781_vm2, %v2369_v49, 0.0  ;;  %v861_v21 = vsel %vm781_vm2, %v2407_v22, 0.0  ;;  %1423 = vst.msk [vmem:[%s2828_s4 + $0xcc] sm:$0xf] %vm1371_vm1, %v1598_v42  ;;  %v1601_v13 = vpack.c.bf16 %v2563_v56, %v2563_v56  ;;  %v1058_v49 = vsel %vm781_vm2, %v956_v4, 0.0 }
 0x12a   :  { %v1049_v48 = vadd.f32 %v1048_v44, %v1047_v41  ;;  %v852_v50 = vadd.f32 %v851_v45, %v850_v40  ;;  %v2583_v53 = vpop.f32.mrb[22].mxu1  ;;  %1421 = vst.msk [vmem:[%s2828_s4 + $0xc4] sm:$0xf] %vm1371_vm1, %v1596_v2  ;;  %v1060_v30 = vsel %vm781_vm2, %v957_v9, 0.0  ;;  %v958_v22 = vmul.f32 %v2423_v35, %v2423_v35 }
 0x12b   :  { %v2596_v10 = vpop.f32.mrb[23].mxu1  ;;  %1426 = vst.msk [vmem:[%s2828_s4 + $0xd8] sm:$0xf] %vm1371_vm1, %v1601_v13  ;;  %v1599_v31 = vpack.c.bf16 %v2575_v61, %v2575_v61  ;;  %v1602_v5 = vpack.c.bf16 %v2583_v53, %v2583_v53  ;;  %v959_v25 = vmul.f32 %v2400_v14, %v2400_v14  ;;  %v863_v38 = vsel %vm781_vm2, %v2423_v35, 0.0 }
 0x12c   :  { %v854_v54 = vadd.f32 %v853_v19, %v852_v50  ;;  %v1051_v17 = vadd.f32 %v1050_v15, %v1049_v48  ;;  %v1600_v37 = vpack.c.bf16 %v2596_v10, %v2596_v10  ;;  %v865_v28 = vsel %vm781_vm2, %v2400_v14, 0.0 }
 0x12d   :  { %1424 = vst.msk [vmem:[%s2828_s4 + $0xd0] sm:$0xf] %vm1371_vm1, %v1599_v31  ;;  %1427 = vst.msk [vmem:[%s2828_s4 + $0xdc] sm:$0xf] %vm1371_vm1, %v1602_v5  ;;  %v960_v41 = vmul.f32 %v2413_v27, %v2413_v27  ;;  %v1062_v43 = vsel %vm781_vm2, %v958_v22, 0.0  ;;  %v961_v44 = vmul.f32 %v2451_v55, %v2451_v55  ;;  %v1064_v50 = vsel %vm781_vm2, %v959_v25, 0.0 }
 0x12e   :  { %v1053_v63 = vadd.f32 %v1052_v51, %v1051_v17  ;;  %v856_v3 = vadd.f32 %v855_v58, %v854_v54  ;;  %1425 = vst.msk [vmem:[%s2828_s4 + $0xd4] sm:$0xf] %vm1371_vm1, %v1600_v37  ;;  %v867_v15 = vsel %vm781_vm2, %v2413_v27, 0.0  ;;  %v869_v51 = vsel %vm781_vm2, %v2451_v55, 0.0 }
 0x12f   :  { %v1066_v27 = vsel %vm781_vm2, %v960_v41, 0.0  ;;  %v1068_v17 = vsel %vm781_vm2, %v961_v44, 0.0  ;;  %v962_v55 = vmul.f32 %v2469_v1, %v2469_v1  ;;  %v965_v2 = vmul.f32 %v2511_v20, %v2511_v20 }
 0x130   :  { %v858_v11 = vadd.f32 %v857_v62, %v856_v3  ;;  %v1055_v12 = vadd.f32 %v1054_v6, %v1053_v63  ;;  %v2627_v24 = vpop.f32.mrb[24].mxu1  ;;  %v963_v62 = vmul.f32 %v2444_v29, %v2444_v29  ;;  %v871_v63 = vsel %vm781_vm2, %v2469_v1, 0.0 }
 0x131   :  { %v2639_v0 = vpop.f32.mrb[25].mxu1  ;;  %v1605_v14 = vpack.c.bf16 %v2627_v24, %v2627_v24  ;;  %v873_v6 = vsel %vm781_vm2, %v2444_v29, 0.0  ;;  %v964_v1 = vmul.f32 %v2459_v59, %v2459_v59  ;;  %v967_v25 = vmul.f32 %v2499_v32, %v2499_v32 }
 0x132   :  { %v1057_v8 = vadd.f32 %v1056_v16, %v1055_v12  ;;  %v860_v26 = vadd.f32 %v859_v18, %v858_v11  ;;  %v2647_v35 = vpop.f32.mrb[26].mxu1  ;;  %v1603_v48 = vpack.c.bf16 %v2639_v0, %v2639_v0  ;;  %v1070_v12 = vsel %vm781_vm2, %v962_v55, 0.0 }
 0x133   :  { %v2660_v45 = vpop.f32.mrb[27].mxu1  ;;  %1430 = vst.msk [vmem:[%s2828_s4 + $0xe8] sm:$0xf] %vm1371_vm1, %v1605_v14  ;;  %v1606_v46 = vpack.c.bf16 %v2647_v35, %v2647_v35  ;;  %v972_v55 = vmul.f32 %v2583_v53, %v2583_v53 }
 0x134   :  { %v862_v34 = vadd.f32 %v861_v21, %v860_v26  ;;  %v1059_v36 = vadd.f32 %v1058_v49, %v1057_v8  ;;  %1428 = vst.msk [vmem:[%s2828_s4 + $0xe0] sm:$0xf] %vm1371_vm1, %v1603_v48  ;;  %v1604_v33 = vpack.c.bf16 %v2660_v45, %v2660_v45  ;;  %v1072_v8 = vsel %vm781_vm2, %v963_v62, 0.0 }
 0x135   :  { %1431 = vst.msk [vmem:[%s2828_s4 + $0xec] sm:$0xf] %vm1371_vm1, %v1606_v46  ;;  %v875_v26 = vsel %vm781_vm2, %v2459_v59, 0.0  ;;  %v877_v49 = vsel %vm781_vm2, %v2511_v20, 0.0  ;;  %v1074_v59 = vsel %vm781_vm2, %v964_v1, 0.0  ;;  %v966_v20 = vmul.f32 %v2532_v39, %v2532_v39 }
 0x136   :  { %v1061_v7 = vadd.f32 %v1060_v30, %v1059_v36  ;;  %v864_v40 = vadd.f32 %v863_v38, %v862_v34  ;;  %1429 = vst.msk [vmem:[%s2828_s4 + $0xe4] sm:$0xf] %vm1371_vm1, %v1604_v33  ;;  %v1076_v34 = vsel %vm781_vm2, %v965_v2, 0.0  ;;  %v879_v38 = vsel %vm781_vm2, %v2532_v39, 0.0 }
 0x137   :  { %v1078_v41 = vsel %vm781_vm2, %v966_v20, 0.0  ;;  %v883_v39 = vsel %vm781_vm2, %v2519_v23, 0.0  ;;  %v974_v1 = vmul.f32 %v2660_v45, %v2660_v45 }
 0x138   :  { %v866_v19 = vadd.f32 %v865_v28, %v864_v40  ;;  %v1063_v47 = vadd.f32 %v1062_v43, %v1061_v7  ;;  %v2689_v60 = vpop.f32.mrb[28].mxu1  ;;  %v881_v7 = vsel %vm781_vm2, %v2499_v32, 0.0  ;;  %v968_v40 = vmul.f32 %v2519_v23, %v2519_v23 }
 0x139   :  { %v1609_v3 = vpack.c.bf16 %v2689_v60, %v2689_v60  ;;  %v2701_v4 = vpop.f32.mrb[29].mxu1  ;;  %v969_v43 = vmul.f32 %v2575_v61, %v2575_v61  ;;  %v887_v23 = vsel %vm781_vm2, %v2596_v10, 0.0 }
 0x13a   :  { %v1065_v52 = vadd.f32 %v1064_v50, %v1063_v47  ;;  %v868_v54 = vadd.f32 %v867_v15, %v866_v19  ;;  %v2705_v11 = vpop.f32.mrb[30].mxu1  ;;  %v1607_v29 = vpack.c.bf16 %v2701_v4, %v2701_v4  ;;  %v1080_v19 = vsel %vm781_vm2, %v967_v25, 0.0 }
 0x13b   :  { %1434 = vst.msk [vmem:[%s2828_s4 + $0xf8] sm:$0xf] %vm1371_vm1, %v1609_v3  ;;  %v2718_v16 = vpop.f32.mrb[31].mxu1  ;;  %v1610_v13 = vpack.c.bf16 %v2705_v11, %v2705_v11  ;;  %v885_v47 = vsel %vm781_vm2, %v2575_v61, 0.0  ;;  %v1082_v50 = vsel %vm781_vm2, %v968_v40, 0.0  ;;  %v1084_v15 = vsel %vm781_vm2, %v969_v43, 0.0 }
 0x13c   :  { %v870_v57 = vadd.f32 %v869_v51, %v868_v54  ;;  %v1067_v58 = vadd.f32 %v1066_v27, %v1065_v52  ;;  %1432 = vst.msk [vmem:[%s2828_s4 + $0xf0] sm:$0xf] %vm1371_vm1, %v1607_v29  ;;  %v1608_v30 = vpack.c.bf16 %v2718_v16, %v2718_v16  ;;  %v970_v51 = vmul.f32 %v2596_v10, %v2596_v10 }
 0x13d   :  { %1435 = vst.msk [vmem:[%s2828_s4 + $0xfc] sm:$0xf] %vm1371_vm1, %v1610_v13  ;;  %v971_v54 = vmul.f32 %v2563_v56, %v2563_v56  ;;  %v889_v61 = vsel %vm781_vm2, %v2563_v56, 0.0  ;;  %v891_v10 = vsel %vm781_vm2, %v2583_v53, 0.0  ;;  %v893_v3 = vsel %vm781_vm2, %v2639_v0, 0.0 }
 0x13e   :  { %v1069_v9 = vadd.f32 %v1068_v17, %v1067_v58  ;;  %v872_v42 = vadd.f32 %v871_v63, %v870_v57  ;;  %1433 = vst.msk [vmem:[%s2828_s4 + $0xf4] sm:$0xf] %vm1371_vm1, %v1608_v30  ;;  %v1086_v33 = vsel %vm781_vm2, %v970_v51, 0.0  ;;  %v973_v57 = vmul.f32 %v2639_v0, %v2639_v0 }
 0x13f   :  { %v1088_v63 = vsel %vm781_vm2, %v971_v54, 0.0  ;;  %v975_v29 = vmul.f32 %v2627_v24, %v2627_v24  ;;  %v895_v53 = vsel %vm781_vm2, %v2660_v45, 0.0  ;;  %v897_v0 = vsel %vm781_vm2, %v2627_v24, 0.0 }
 0x140   :  { %v874_v18 = vadd.f32 %v873_v6, %v872_v42  ;;  %v1071_v21 = vadd.f32 %v1070_v12, %v1069_v9  ;;  %v1090_v9 = vsel %vm781_vm2, %v972_v55, 0.0  ;;  %v1092_v42 = vsel %vm781_vm2, %v973_v57, 0.0 }
 0x141   :  { %v976_v13 = vmul.f32 %v2647_v35, %v2647_v35  ;;  %v899_v45 = vsel %vm781_vm2, %v2647_v35, 0.0  ;;  %v903_v35 = vsel %vm781_vm2, %v2718_v16, 0.0 }
 0x142   :  { %v1073_v22 = vadd.f32 %v1072_v8, %v1071_v21  ;;  %v876_v31 = vadd.f32 %v875_v26, %v874_v18  ;;  %v1094_v8 = vsel %vm781_vm2, %v974_v1, 0.0  ;;  %v977_v26 = vmul.f32 %v2701_v4, %v2701_v4 }
 0x144   :  { %v878_v36 = vadd.f32 %v877_v49, %v876_v31  ;;  %v1075_v5 = vadd.f32 %v1074_v59, %v1073_v22  ;;  %v1096_v22 = vsel %vm781_vm2, %v975_v29, 0.0  ;;  %v901_v31 = vsel %vm781_vm2, %v2701_v4, 0.0 }
 0x145   :  { %v1100_v20 = vsel %vm781_vm2, %v977_v26, 0.0  ;;  %v905_v4 = vsel %vm781_vm2, %v2689_v60, 0.0 }
 0x146   :  { %v1077_v37 = vadd.f32 %v1076_v34, %v1075_v5  ;;  %v880_v28 = vadd.f32 %v879_v38, %v878_v36  ;;  %v1098_v34 = vsel %vm781_vm2, %v976_v13, 0.0  ;;  %v978_v36 = vmul.f32 %v2718_v16, %v2718_v16 }
 0x147   :  { %v979_v38 = vmul.f32 %v2689_v60, %v2689_v60 }
 0x148   :  { %v882_v44 = vadd.f32 %v881_v7, %v880_v28  ;;  %v1079_v14 = vadd.f32 %v1078_v41, %v1077_v37  ;;  %v980_v7 = vmul.f32 %v2705_v11, %v2705_v11  ;;  %v1102_v40 = vsel %vm781_vm2, %v978_v36, 0.0 }
 0x14a   :  { %v1081_v48 = vadd.f32 %v1080_v19, %v1079_v14  ;;  %v884_v32 = vadd.f32 %v883_v39, %v882_v44  ;;  %v1104_v44 = vsel %vm781_vm2, %v979_v38, 0.0  ;;  %v907_v14 = vsel %vm781_vm2, %v2705_v11, 0.0 }
 0x14b   :  { %v1106_v16 = vsel %vm781_vm2, %v980_v7, 0.0 }
 0x14c   :  { %v886_v46 = vadd.f32 %v885_v47, %v884_v32  ;;  %v1083_v52 = vadd.f32 %v1082_v50, %v1081_v48 }
 0x14e   :  { %v1085_v27 = vadd.f32 %v1084_v15, %v1083_v52  ;;  %v888_v17 = vadd.f32 %v887_v23, %v886_v46 }
 0x150   :  { %v890_v58 = vadd.f32 %v889_v61, %v888_v17  ;;  %v1087_v62 = vadd.f32 %v1086_v33, %v1085_v27 }
 0x152   :  { %v1089_v6 = vadd.f32 %v1088_v63, %v1087_v62  ;;  %v892_v56 = vadd.f32 %v891_v10, %v890_v58 }
 0x154   :  { %v894_v12 = vadd.f32 %v893_v3, %v892_v56  ;;  %v1091_v2 = vadd.f32 %v1090_v9, %v1089_v6 }
 0x156   :  { %v1093_v18 = vadd.f32 %v1092_v42, %v1091_v2  ;;  %v896_v21 = vadd.f32 %v895_v53, %v894_v12 }
 0x158   :  { %v898_v49 = vadd.f32 %v897_v0, %v896_v21  ;;  %v1095_v30 = vadd.f32 %v1094_v8, %v1093_v18 }
 0x15a   :  { %v1097_v59 = vadd.f32 %v1096_v22, %v1095_v30  ;;  %v900_v24 = vadd.f32 %v899_v45, %v898_v49 }
 0x15c   :  { %v902_v5 = vadd.f32 %v901_v31, %v900_v24  ;;  %v1099_v25 = vadd.f32 %v1098_v34, %v1097_v59 }
 0x15e   :  { %v1101_v37 = vadd.f32 %v1100_v20, %v1099_v25  ;;  %v904_v28 = vadd.f32 %v903_v35, %v902_v5 }
 0x160   :  { %v906_v41 = vadd.f32 %v905_v4, %v904_v28  ;;  %v1103_v43 = vadd.f32 %v1102_v40, %v1101_v37 }
 0x162   :  { %v908_v19 = vadd.f32 %v907_v14, %v906_v41  ;;  %v1105_v39 = vadd.f32 %v1104_v44, %v1103_v43 }
 0x164   :  { %v909_v47 = vrot.slane %v908_v19, 4  ;;  %v1107_v48 = vadd.f32 %v1106_v16, %v1105_v39 }
 0x166   :  { %v910_v32 = vadd.f32 %v909_v47, %v908_v19  ;;  %v1108_v60 = vrot.slane %v1107_v48, 4 }
 0x168   :  { %v911_v50 = vrot.slane %v910_v32, 2  ;;  %v1109_v15 = vadd.f32 %v1108_v60, %v1107_v48 }
 0x16a   :  { %v912_v51 = vadd.f32 %v911_v50, %v910_v32  ;;  %v1110_v46 = vrot.slane %v1109_v15, 2 }
 0x16c   :  { %v913_v52 = vrot.slane %v912_v51, 1  ;;  %v1111_v54 = vadd.f32 %v1110_v46, %v1109_v15 }
 0x16e   :  { %v914_v23 = vadd.f32 %v913_v52, %v912_v51  ;;  %v1112_v27 = vrot.slane %v1111_v54, 1 }
 0x170   :  { %916 = vst.msk [vmem:[%s2829_s5] sm:$0x1] %vm915_vm3, %v914_v23  ;;  %v1113_v11 = vadd.f32 %v1112_v27, %v1111_v54 }
 0x172   :  { %1114 = vst.msk [vmem:[%s2830_s6] sm:$0x1] %vm915_vm3, %v1113_v11 }

// kernel: _forward.6
= control target key start
LH: loop header
LB: loop body
LE: loop exit
PB: predicated region body
PF: predicated region fallthrough
CT: control target
= control target key end

     0   :  { %s3477_s21 = smov 0   ;;  %s4550_s0 = inlined_call_operand.vmem [shape: bf16[2,256,8], index: 0, kind: input, shape index: {}]   ;;  %s4551_s1 = inlined_call_operand.vmem [shape: f32[1,8], index: 1, kind: input, shape index: {}]   ;;  %s4552_s2 = inlined_call_operand.vmem [shape: f32[1,8], index: 2, kind: input, shape index: {}]   ;;  %s4553_s3 = inlined_call_operand.vmem [shape: bf16[3,24,8], index: 3, kind: input, shape index: {}]   ;;  %s4554_s4 = inlined_call_operand.vmem [shape: bf16[2,256,8], index: 4, kind: output, shape index: {0}]   ;;  %s4555_s5 = inlined_call_operand.vmem [shape: f32[2,1,8], index: 5, kind: output, shape index: {1}]   ;;  %s4556_s6 = inlined_call_operand.vmem [shape: f32[2,1,8], index: 6, kind: output, shape index: {2}]  }
   0x1 LB: > { %s2802_s22 = sadd.s32 4294967295, %s3437_s21   ;;  %p2806_p0 = scmp.ge.s32.totalorder %s3437_s21, 1  ;;  %s3437_s21 = sphi %s3477_s21, %s17_s21  }
   0x2   : > { %p217_p1 = scmp.lt.s32.totalorder %s3437_s21, 3 }
   0x4   : > { %p218_p2 = pnand %p2806_p0, %p217_p1 }
   0x5   : > { %p253_p3 = scmp.lt.s32.totalorder (!%p218_p2), %s2802_s22, 1  ;;  %v447_v0 = vlaneseq (!%p218_p2)  ;;  %v3493_v2 = vld [vmem:[%s4551_s1] ss:$0 sm:$0xff] (!%p218_p2)  ;;  %vm1153_vm0 = vcmask (!%p218_p2), 1046528   ;;  %s3439_s9 = smov (!%p218_p2), 8   ;;  %vm928_vm13 = vcmask (!%p218_p2), 1040384  }
   0x6   : > { %221 = sbr.rel (%p218_p2) target bundleno = 492 (0x1ec), region = 36  ;;  %v3527_v20 = vld [vmem:[%s4552_s2] ss:$0 sm:$0xff] (!%p218_p2)  ;;  %s3440_s12 = smov (!%p218_p2), 16  }
   0x7   : > { %v3487_v1 = vshrl.u32 (!%p218_p2), %v447_v0, 7  ;;  %v3576_v54 = vld [vmem:[%s4553_s3] sm:$0xff] (!%p218_p2)  }
   0x8   : > { %3110 = vmatprep.subr.bf16.mxu0 (!%p218_p2), %v3576_v54 }
   0x9   : > { %v449_v3 = vadd.s32 (!%p218_p2), 8, %v3487_v1  ;;  %v451_v4 = vadd.s32 (!%p218_p2), 24, %v3487_v1  ;;  %v453_v5 = vadd.s32 (!%p218_p2), 40, %v3487_v1  ;;  %v3506_v6 = vadd.s32 (!%p218_p2), 56, %v3487_v1  ;;  %3111 = vmatpush3.bf16.msra.mxu0 (!%p218_p2), %v3576_v54 }
   0xa   : > { %v3509_v7 = vadd.s32 (!%p218_p2), 72, %v3487_v1  ;;  %v3512_v8 = vadd.s32 (!%p218_p2), 88, %v3487_v1  ;;  %v3518_v13 = vadd.s32 (!%p218_p2), 104, %v3487_v1  ;;  %v3521_v14 = vadd.s32 (!%p218_p2), 120, %v3487_v1 }
   0xb   : > { %v491_v11 = vand.u32 (!%p218_p2), 15, %v449_v3  ;;  %v505_v23 = vand.u32 (!%p218_p2), 15, %v451_v4  ;;  %v519_v24 = vand.u32 (!%p218_p2), 15, %v453_v5 }
   0xd   : > { %s4616_s22 = smov (!%p253_p3, %s2802_s22), 1  ;;  %vm3533_vm1 = vcmp.ne.s32.totalorder %v491_v11, 15  ;;  %vm3564_vm2 = vcmp.ne.s32.totalorder %v505_v23, 15  ;;  %vm3568_vm3 = vcmp.ne.s32.totalorder %v519_v24, 15  ;;  %v533_v24 = vand.u32 15, %v3506_v6 }
   0xe   : > { %s2907_s23 = sshll.u32 %s4616_s22, 7  ;;  %s268_s7 = scalar_lea.vmem %s4556_s6, %s4616_s22 }
   0xf   : > { %s3503_s28 = scalar_lea.vmem %s4550_s0, %s2907_s23  ;;  %vm3621_vm4 = vcmp.ne.s32.totalorder %v533_v24, 15  ;;  %s4401_s26 = scalar_lea.vmem %s4554_s4, %s2907_s23 }
  0x10   : > { %v2942_v9 = vld [vmem:[%s3503_s28] sm:$0xff]   ;;  %v3005_v10 = vld [vmem:[%s3503_s28 + $0x8] sm:$0xff]   ;;  %v3006_v12 = vld [vmem:[%s3503_s28 + $0x10] sm:$0xff]  }
  0x11   : > { %v2943_v15 = vunpack.c.l.bf16 %v2942_v9  ;;  %v2944_v16 = vunpack.c.h.bf16 %v2942_v9  ;;  %v2947_v17 = vunpack.c.l.bf16 %v3005_v10  ;;  %v2948_v18 = vunpack.c.h.bf16 %v3005_v10  ;;  %v3007_v19 = vld [vmem:[%s3503_s28 + $0x18] sm:$0xff]   ;;  %v3008_v53 = vld [vmem:[%s3503_s28 + $0x20] sm:$0xff]   ;;  %v3010_v29 = vld [vmem:[%s3503_s28 + $0x30] sm:$0xff]  }
  0x12   : > { %v2951_v21 = vunpack.c.l.bf16 %v3006_v12  ;;  %v2952_v22 = vunpack.c.h.bf16 %v3006_v12  ;;  %v2955_v32 = vunpack.c.l.bf16 %v3007_v19  ;;  %v2956_v40 = vunpack.c.h.bf16 %v3007_v19  ;;  %v3009_v12 = vld [vmem:[%s3503_s28 + $0x28] sm:$0xff]  }
  0x13   : > { %v344_v25 = vmul.f32 %v2943_v15, %v3493_v2  ;;  %v345_v26 = vmul.f32 %v2944_v16, %v3493_v2  ;;  %v346_v27 = vmul.f32 %v2947_v17, %v3493_v2  ;;  %v347_v28 = vmul.f32 %v2948_v18, %v3493_v2  ;;  %v3426_v15 = vld [vmem:[%s4553_s3 + $0xc] sm:$0xff]  }
  0x14   : > { %v348_v30 = vmul.f32 %v2951_v21, %v3493_v2  ;;  %v349_v31 = vmul.f32 %v2952_v22, %v3493_v2  ;;  %v350_v39 = vmul.f32 %v2955_v32, %v3493_v2  ;;  %v351_v48 = vmul.f32 %v2956_v40, %v3493_v2  ;;  %3074 = vmatprep.subr.bf16.mxu1 %v3426_v15 }
  0x15   : > { %v383_v33 = vadd.f32 %v3527_v20, %v344_v25  ;;  %v384_v34 = vadd.f32 %v3527_v20, %v345_v26  ;;  %v385_v35 = vadd.f32 %v3527_v20, %v346_v27  ;;  %v386_v36 = vadd.f32 %v3527_v20, %v347_v28  ;;  %3075 = vmatpush3.bf16.msra.mxu1 %v3426_v15 }
  0x16   : > { %v387_v37 = vadd.f32 %v3527_v20, %v348_v30  ;;  %v388_v38 = vadd.f32 %v3527_v20, %v349_v31  ;;  %v389_v47 = vadd.f32 %v3527_v20, %v350_v39  ;;  %v390_v3 = vadd.f32 %v3527_v20, %v351_v48 }
  0x17   : > { %v3546_v41 = vmax.f32 %v383_v33, 0.0  ;;  %v3548_v42 = vmax.f32 %v384_v34, 0.0  ;;  %v3550_v43 = vmax.f32 %v385_v35, 0.0  ;;  %v3552_v44 = vmax.f32 %v386_v36, 0.0 }
  0x18   : > { %v3554_v45 = vmax.f32 %v387_v37, 0.0  ;;  %v3556_v46 = vmax.f32 %v388_v38, 0.0  ;;  %v3586_v61 = vmax.f32 %v389_v47, 0.0  ;;  %v2959_v4 = vunpack.c.l.bf16 %v3008_v53  ;;  %v3011_v47 = vld [vmem:[%s3503_s28 + $0x38] sm:$0xff]  }
  0x19   : > { %v3265_v49 = vpack.i.bf16 %v3548_v42, %v3546_v41  ;;  %v3270_v50 = vpack.i.bf16 %v3552_v44, %v3550_v43  ;;  %v1154_v55 = vrot.slane %v3546_v41, 1  ;;  %v1155_v56 = vrot.slane %v3548_v42, 1 }
  0x1a   : > { %v1157_v57 = vrot.slane %v3550_v43, 1  ;;  %v3275_v58 = vpack.i.bf16 %v3556_v46, %v3554_v45  ;;  %v1159_v59 = vrot.slane %v3552_v44, 1  ;;  %v1161_v60 = vrot.slane %v3554_v45, 1 }
  0x1b   : > { %3266 = vrot.lane.b32.xlu0 %v3265_v49, %s3439_s9  ;;  %v1163_v62 = vrot.slane %v3556_v46, 1  ;;  %v1156_v63 = vsel %vm1153_vm0, %v1154_v55, %v1155_v56  ;;  %v1165_v18 = vrot.slane %v3586_v61, 1  ;;  %v3606_v19 = vmax.f32 %v390_v3, 0.0 }
  0x1c   : > { %v1158_v0 = vsel %vm1153_vm0, %v1155_v56, %v1157_v57  ;;  %v1160_v9 = vsel %vm1153_vm0, %v1157_v57, %v1159_v59  ;;  %v1162_v10 = vsel %vm1153_vm0, %v1159_v59, %v1161_v60  ;;  %v2960_v22 = vunpack.c.h.bf16 %v3008_v53 }
  0x1d   : > { %v1315_v5 = vsel %vm3533_vm1, %v1158_v0, 0.0  ;;  %v1164_v11 = vsel %vm1153_vm0, %v1161_v60, %v1163_v62  ;;  %v1317_v17 = vsel %vm3564_vm2, %v1162_v10, 0.0  ;;  %v352_v23 = vmul.f32 %v2959_v4, %v3493_v2 }
  0x1e   : > { %v3280_v16 = vpack.i.bf16 %v1315_v5, %v1156_v63  ;;  %v3285_v21 = vpack.i.bf16 %v1317_v17, %v1160_v9  ;;  %v1166_v25 = vsel %vm1153_vm0, %v1163_v62, %v1165_v18  ;;  %v3290_v26 = vpack.i.bf16 %v3606_v19, %v3586_v61 }
  0x1f   : > { %3271 = vrot.lane.b32.xlu0 %v3270_v50, %s3439_s9  ;;  %v1167_v27 = vrot.slane %v3606_v19, 1  ;;  %v2963_v28 = vunpack.c.l.bf16 %v3009_v12  ;;  %v1319_v30 = vsel %vm3568_vm3, %v1166_v25, 0.0  ;;  %v353_v6 = vmul.f32 %v2960_v22, %v3493_v2  ;;  %v3012_v25 = vld [vmem:[%s3503_s28 + $0x40] sm:$0xff]  }
  0x20   : > { %3281 = vrot.lane.b32.xlu1 %v3280_v16, %s3440_s12  ;;  %v391_v31 = vadd.f32 %v3527_v20, %v352_v23  ;;  %v3295_v33 = vpack.i.bf16 %v1319_v30, %v1164_v11  ;;  %v547_v36 = vand.u32 15, %v3509_v7  ;;  %v2964_v39 = vunpack.c.h.bf16 %v3009_v12 }
  0x21   : > { %v1168_v34 = vsel %vm1153_vm0, %v1165_v18, %v1167_v27  ;;  %v354_v35 = vmul.f32 %v2963_v28, %v3493_v2  ;;  %v392_v37 = vadd.f32 %v3527_v20, %v353_v6  ;;  %v2967_v40 = vunpack.c.l.bf16 %v3010_v29 }
  0x22   : > { %v3630_v38 = vmax.f32 %v391_v31, 0.0  ;;  %vm3635_vm5 = vcmp.ne.s32.totalorder %v547_v36, 15  ;;  %v2968_v50 = vunpack.c.h.bf16 %v3010_v29  ;;  %v561_v7 = vand.u32 15, %v3512_v8  ;;  %v3013_v36 = vld [vmem:[%s3503_s28 + $0x48] sm:$0xff]  }
  0x23   : > { %3276 = vrot.lane.b32.xlu0 %v3275_v58, %s3439_s9  ;;  %v393_v48 = vadd.f32 %v3527_v20, %v354_v35  ;;  %v3640_v51 = vmax.f32 %v392_v37, 0.0  ;;  %v355_v53 = vmul.f32 %v2964_v39, %v3493_v2  ;;  %v356_v55 = vmul.f32 %v2967_v40, %v3493_v2 }
  0x24   : > { %3286 = vrot.lane.b32.xlu1 %v3285_v21, %s3440_s12  ;;  %v1169_v52 = vrot.slane %v3630_v38, 1  ;;  %v357_v57 = vmul.f32 %v2968_v50, %v3493_v2  ;;  %vm3648_vm6 = vcmp.ne.s32.totalorder %v561_v7, 15  ;;  %v2971_v59 = vunpack.c.l.bf16 %v3011_v47 }
  0x25   : > { %v3645_v56 = vmax.f32 %v393_v48, 0.0  ;;  %v3300_v8 = vpack.i.bf16 %v3640_v51, %v3630_v38  ;;  %v1171_v62 = vrot.slane %v3640_v51, 1  ;;  %v394_v63 = vadd.f32 %v3527_v20, %v355_v53 }
  0x26   : > { %v1170_v60 = vsel %vm1153_vm0, %v1167_v27, %v1169_v52  ;;  %v395_v4 = vadd.f32 %v3527_v20, %v356_v55  ;;  %v396_v5 = vadd.f32 %v3527_v20, %v357_v57  ;;  %v358_v12 = vmul.f32 %v2971_v59, %v3493_v2  ;;  %v3014_v57 = vld [vmem:[%s3503_s28 + $0x50] sm:$0xff]  }
  0x27   : > { %3296 = vrot.lane.b32.xlu0 %v3295_v33, %s3440_s12  ;;  %v1321_v0 = vsel %vm3621_vm4, %v1170_v60, 0.0  ;;  %v1173_v3 = vrot.slane %v3645_v56, 1  ;;  %v1172_v10 = vsel %vm1153_vm0, %v1169_v52, %v1171_v62  ;;  %v3665_v11 = vmax.f32 %v394_v63, 0.0 }
  0x28   : > { %3291 = vrot.lane.b32.xlu1 %v3290_v26, %s3439_s9  ;;  %v3305_v9 = vpack.i.bf16 %v1321_v0, %v1168_v34  ;;  %v3669_v16 = vmax.f32 %v395_v4, 0.0  ;;  %v3671_v17 = vmax.f32 %v396_v5, 0.0  ;;  %v575_v18 = vand.u32 15, %v3518_v13 }
  0x29   : > { %v1174_v15 = vsel %vm1153_vm0, %v1171_v62, %v1173_v3  ;;  %v3310_v22 = vpack.i.bf16 %v3665_v11, %v3645_v56  ;;  %v1175_v23 = vrot.slane %v3665_v11, 1  ;;  %v397_v24 = vadd.f32 %v3527_v20, %v358_v12 }
  0x2a   : > { %v1323_v21 = vsel %vm3635_vm5, %v1174_v15, 0.0  ;;  %v3325_v13 = vpack.i.bf16 %v3671_v17, %v3669_v16  ;;  %v1177_v27 = vrot.slane %v3669_v16, 1  ;;  %vm3686_vm7 = vcmp.ne.s32.totalorder %v575_v18, 15 }
  0x2b   : > { %3301 = vrot.lane.b32.xlu0 %v3300_v8, %s3439_s9  ;;  %v3315_v26 = vpack.i.bf16 %v1323_v21, %v1172_v10  ;;  %v1176_v29 = vsel %vm1153_vm0, %v1173_v3, %v1175_v23  ;;  %v3691_v30 = vmax.f32 %v397_v24, 0.0  ;;  %v1179_v6 = vrot.slane %v3671_v17, 1 }
  0x2c   : > { %3306 = vrot.lane.b32.xlu1 %v3305_v9, %s3440_s12  ;;  %v2972_v31 = vunpack.c.h.bf16 %v3011_v47  ;;  %v1178_v32 = vsel %vm1153_vm0, %v1175_v23, %v1177_v27  ;;  %v2975_v33 = vunpack.c.l.bf16 %v3012_v25  ;;  %v2976_v34 = vunpack.c.h.bf16 %v3012_v25 }
  0x2d   : > { %v589_v35 = vand.u32 15, %v3521_v14  ;;  %v1325_v37 = vsel %vm3648_vm6, %v1178_v32, 0.0  ;;  %v1180_v39 = vsel %vm1153_vm0, %v1177_v27, %v1179_v6  ;;  %v1181_v40 = vrot.slane %v3691_v30, 1 }
  0x2e   : > { %v359_v48 = vmul.f32 %v2972_v31, %v3493_v2  ;;  %v3320_v47 = vpack.i.bf16 %v1325_v37, %v1176_v29  ;;  %v360_v49 = vmul.f32 %v2975_v33, %v3493_v2  ;;  %v361_v14 = vmul.f32 %v2976_v34, %v3493_v2  ;;  %v3015_v33 = vld [vmem:[%s3503_s28 + $0x58] sm:$0xff]  }
  0x2f   : > { %3316 = vrot.lane.b32.xlu0 %v3315_v26, %s3440_s12  ;;  %vm3706_vm8 = vcmp.ne.s32.totalorder %v589_v35, 15  ;;  %v1182_v7 = vsel %vm1153_vm0, %v1179_v6, %v1181_v40  ;;  %v2979_v53 = vunpack.c.l.bf16 %v3013_v36  ;;  %v465_v55 = vadd.s32 136, %v3487_v1 }
  0x30   : > { %3311 = vrot.lane.b32.xlu1 %v3310_v22, %s3439_s9  ;;  %v398_v52 = vadd.f32 %v3527_v20, %v359_v48  ;;  %v1327_v58 = vsel %vm3686_vm7, %v1182_v7, 0.0  ;;  %v399_v59 = vadd.f32 %v3527_v20, %v360_v49  ;;  %v400_v8 = vadd.f32 %v3527_v20, %v361_v14 }
  0x31   : > { %v2980_v60 = vunpack.c.h.bf16 %v3013_v36  ;;  %v3335_v62 = vpack.i.bf16 %v1327_v58, %v1180_v39  ;;  %v362_v0 = vmul.f32 %v2979_v53, %v3493_v2  ;;  %v603_v3 = vand.u32 15, %v465_v55 }
  0x32   : > { %v3719_v63 = vmax.f32 %v398_v52, 0.0  ;;  %v3723_v4 = vmax.f32 %v399_v59, 0.0  ;;  %v3725_v5 = vmax.f32 %v400_v8, 0.0  ;;  %v2983_v10 = vunpack.c.l.bf16 %v3014_v57  ;;  %v3016_v52 = vld [vmem:[%s3503_s28 + $0x60] sm:$0xff]  }
  0x33   : > { %3326 = vrot.lane.b32.xlu0 %v3325_v13, %s3439_s9  ;;  %v363_v9 = vmul.f32 %v2980_v60, %v3493_v2  ;;  %v401_v18 = vadd.f32 %v3527_v20, %v362_v0  ;;  %vm3732_vm9 = vcmp.ne.s32.totalorder %v603_v3, 15  ;;  %v2984_v27 = vunpack.c.h.bf16 %v3014_v57 }
  0x34   : > { %3321 = vrot.lane.b32.xlu1 %v3320_v47, %s3440_s12  ;;  %v3330_v12 = vpack.i.bf16 %v3719_v63, %v3691_v30  ;;  %v1183_v15 = vrot.slane %v3719_v63, 1  ;;  %v3345_v22 = vpack.i.bf16 %v3725_v5, %v3723_v4  ;;  %v1185_v23 = vrot.slane %v3723_v4, 1 }
  0x35   : > { %v1187_v24 = vrot.slane %v3725_v5, 1  ;;  %v402_v25 = vadd.f32 %v3527_v20, %v363_v9  ;;  %v3743_v13 = vmax.f32 %v401_v18, 0.0  ;;  %v364_v28 = vmul.f32 %v2983_v10, %v3493_v2 }
  0x36   : > { %v1184_v26 = vsel %vm1153_vm0, %v1181_v40, %v1183_v15  ;;  %v1186_v29 = vsel %vm1153_vm0, %v1183_v15, %v1185_v23  ;;  %v467_v32 = vadd.s32 152, %v3487_v1  ;;  %v365_v36 = vmul.f32 %v2984_v27, %v3493_v2 }
  0x37   : > { %3336 = vrot.lane.b32.xlu0 %v3335_v62, %s3440_s12  ;;  %v1188_v6 = vsel %vm1153_vm0, %v1185_v23, %v1187_v24  ;;  %v3749_v31 = vmax.f32 %v402_v25, 0.0  ;;  %v1329_v34 = vsel %vm3706_vm8, %v1186_v29, 0.0  ;;  %v1189_v35 = vrot.slane %v3743_v13, 1 }
  0x38   : > { %3331 = vrot.lane.b32.xlu1 %v3330_v12, %s3439_s9  ;;  %v403_v37 = vadd.f32 %v3527_v20, %v364_v28  ;;  %v3340_v39 = vpack.i.bf16 %v1329_v34, %v1184_v26  ;;  %v617_v48 = vand.u32 15, %v467_v32  ;;  %v404_v14 = vadd.f32 %v3527_v20, %v365_v36 }
  0x39   : > { %v3350_v40 = vpack.i.bf16 %v3749_v31, %v3743_v13  ;;  %v1191_v47 = vrot.slane %v3749_v31, 1  ;;  %v1190_v49 = vsel %vm1153_vm0, %v1187_v24, %v1189_v35  ;;  %v2987_v7 = vunpack.c.l.bf16 %v3015_v33 }
  0x3a   : > { %v3764_v50 = vmax.f32 %v403_v37, 0.0  ;;  %v1331_v53 = vsel %vm3732_vm9, %v1190_v49, 0.0  ;;  %vm3770_vm10 = vcmp.ne.s32.totalorder %v617_v48, 15  ;;  %v469_v58 = vadd.s32 168, %v3487_v1 }
  0x3b   : > { %3346 = vrot.lane.b32.xlu0 %v3345_v22, %s3439_s9  ;;  %v1192_v57 = vsel %vm1153_vm0, %v1189_v35, %v1191_v47  ;;  %v3355_v59 = vpack.i.bf16 %v1331_v53, %v1188_v6  ;;  %v3776_v8 = vmax.f32 %v404_v14, 0.0  ;;  %v366_v62 = vmul.f32 %v2987_v7, %v3493_v2  ;;  %v3017_v22 = vld [vmem:[%s3503_s28 + $0x68] sm:$0xff]  }
  0x3c   : > { %3341 = vrot.lane.b32.xlu1 %v3340_v39, %s3440_s12  ;;  %v1193_v60 = vrot.slane %v3764_v50, 1  ;;  %v631_v0 = vand.u32 15, %v469_v58  ;;  %v2988_v3 = vunpack.c.h.bf16 %v3015_v33  ;;  %v2991_v9 = vunpack.c.l.bf16 %v3016_v52 }
  0x3d   : > { %v2992_v10 = vunpack.c.h.bf16 %v3016_v52  ;;  %v3365_v12 = vpack.i.bf16 %v3776_v8, %v3764_v50  ;;  %v405_v18 = vadd.f32 %v3527_v20, %v366_v62  ;;  %v1195_v21 = vrot.slane %v3776_v8, 1 }
  0x3e   : > { %v1194_v15 = vsel %vm1153_vm0, %v1191_v47, %v1193_v60  ;;  %vm3790_vm11 = vcmp.ne.s32.totalorder %v631_v0, 15  ;;  %v367_v25 = vmul.f32 %v2988_v3, %v3493_v2  ;;  %v368_v26 = vmul.f32 %v2991_v9, %v3493_v2 }
  0x3f   : > { %3356 = vrot.lane.b32.xlu0 %v3355_v59, %s3440_s12  ;;  %v1333_v23 = vsel %vm3770_vm10, %v1194_v15, 0.0  ;;  %v3796_v28 = vmax.f32 %v405_v18, 0.0  ;;  %v1196_v29 = vsel %vm1153_vm0, %v1193_v60, %v1195_v21  ;;  %v369_v6 = vmul.f32 %v2992_v10, %v3493_v2  ;;  %v3018_v60 = vld [vmem:[%s3503_s28 + $0x70] sm:$0xff]  }
  0x40   : > { %3351 = vrot.lane.b32.xlu1 %v3350_v40, %s3439_s9  ;;  %v3360_v27 = vpack.i.bf16 %v1333_v23, %v1192_v57  ;;  %v406_v32 = vadd.f32 %v3527_v20, %v367_v25  ;;  %v407_v33 = vadd.f32 %v3527_v20, %v368_v26  ;;  %v471_v34 = vadd.s32 184, %v3487_v1  ;;  %v3019_v25 = vld [vmem:[%s3503_s28 + $0x78] sm:$0xff]   ;;  %s265_s28 = scalar_lea.vmem %s4555_s5, %s4616_s22 }
  0x41   : > { %v2995_v35 = vunpack.c.l.bf16 %v3017_v22  ;;  %v1197_v36 = vrot.slane %v3796_v28, 1  ;;  %v408_v37 = vadd.f32 %v3527_v20, %v369_v6  ;;  %v473_v39 = vadd.s32 200, %v3487_v1 }
  0x42   : > { %v2996_v40 = vunpack.c.h.bf16 %v3017_v22  ;;  %v3808_v48 = vmax.f32 %v406_v32, 0.0  ;;  %v3810_v47 = vmax.f32 %v407_v33, 0.0  ;;  %v645_v49 = vand.u32 15, %v471_v34 }
  0x43   : > { %3366 = vrot.lane.b32.xlu0 %v3365_v12, %s3439_s9  ;;  %v370_v14 = vmul.f32 %v2995_v35, %v3493_v2  ;;  %v1198_v7 = vsel %vm1153_vm0, %v1195_v21, %v1197_v36  ;;  %v3814_v52 = vmax.f32 %v408_v37, 0.0  ;;  %v659_v59 = vand.u32 15, %v473_v39 }
  0x44   : > { %3361 = vrot.lane.b32.xlu1 %v3360_v27, %s3440_s12  ;;  %v371_v53 = vmul.f32 %v2996_v40, %v3493_v2  ;;  %v1335_v55 = vsel %vm3790_vm11, %v1198_v7, 0.0  ;;  %v3370_v57 = vpack.i.bf16 %v3808_v48, %v3796_v28  ;;  %v1199_v58 = vrot.slane %v3808_v48, 1 }
  0x45   : > { %v3375_v62 = vpack.i.bf16 %v1335_v55, %v1196_v29  ;;  %vm3823_vm12 = vcmp.ne.s32.totalorder %v645_v49, 15  ;;  %v1201_v3 = vrot.slane %v3810_v47, 1  ;;  %v409_v9 = vadd.f32 %v3527_v20, %v370_v14 }
  0x46   : > { %v3385_v10 = vpack.i.bf16 %v3814_v52, %v3810_v47  ;;  %v1200_v12 = vsel %vm1153_vm0, %v1197_v36, %v1199_v58  ;;  %v1203_v15 = vrot.slane %v3814_v52, 1  ;;  %v410_v18 = vadd.f32 %v3527_v20, %v371_v53 }
  0x47   : > { %3376 = vrot.lane.b32.xlu0 %v3375_v62, %s3440_s12  ;;  %v1202_v21 = vsel %vm1153_vm0, %v1199_v58, %v1201_v3  ;;  %v3837_v22 = vmax.f32 %v409_v9, 0.0  ;;  %v2999_v23 = vunpack.c.l.bf16 %v3018_v60  ;;  %v3000_v24 = vunpack.c.h.bf16 %v3018_v60 }
  0x48   : > { %3371 = vrot.lane.b32.xlu1 %v3370_v57, %s3439_s9  ;;  %v1337_v26 = vsel %vm3823_vm12, %v1202_v21, 0.0  ;;  %vm3842_vm14 = vcmp.ne.s32.totalorder %v659_v59, 15  ;;  %v3846_v29 = vmax.f32 %v410_v18, 0.0  ;;  %v475_v6 = vadd.s32 216, %v3487_v1 }
  0x49   : > { %v3380_v32 = vpack.i.bf16 %v1337_v26, %v1200_v12  ;;  %v1205_v33 = vrot.slane %v3837_v22, 1  ;;  %v372_v34 = vmul.f32 %v2999_v23, %v3493_v2  ;;  %v373_v35 = vmul.f32 %v3000_v24, %v3493_v2 }
  0x4a   : > { %v1204_v36 = vsel %vm1153_vm0, %v1201_v3, %v1203_v15  ;;  %v3390_v37 = vpack.i.bf16 %v3846_v29, %v3837_v22  ;;  %v673_v39 = vand.u32 15, %v475_v6  ;;  %v3003_v40 = vunpack.c.l.bf16 %v3019_v25 }
  0x4b   : > { %3386 = vrot.lane.b32.xlu0 %v3385_v10, %s3439_s9  ;;  %v1206_v49 = vsel %vm1153_vm0, %v1203_v15, %v1205_v33  ;;  %v411_v14 = vadd.f32 %v3527_v20, %v372_v34  ;;  %v412_v7 = vadd.f32 %v3527_v20, %v373_v35  ;;  %v477_v53 = vadd.s32 232, %v3487_v1 }
  0x4c   : > { %3381 = vrot.lane.b32.xlu1 %v3380_v32, %s3440_s12  ;;  %v930_v55 = vrot.slane %v3548_v42, 7  ;;  %v1339_v57 = vsel %vm3842_vm14, %v1206_v49, 0.0  ;;  %v1207_v58 = vrot.slane %v3846_v29, 1  ;;  %v374_v59 = vmul.f32 %v3003_v40, %v3493_v2 }
  0x4d   : > { %v929_v60 = vrot.slane %v3546_v41, 7  ;;  %v3395_v62 = vpack.i.bf16 %v1339_v57, %v1204_v36  ;;  %v3867_v0 = vmax.f32 %v411_v14, 0.0  ;;  %v3869_v3 = vmax.f32 %v412_v7, 0.0 }
  0x4e   : > { %v413_v9 = vadd.f32 %v3527_v20, %v374_v59  ;;  %v687_v10 = vand.u32 15, %v477_v53  ;;  %v3004_v12 = vunpack.c.h.bf16 %v3019_v25  ;;  %v479_v42 = vadd.s32 248, %v3487_v1 }
  0x4f   : > { %3396 = vrot.lane.b32.xlu0 %v3395_v62, %s3440_s12  ;;  %v3405_v15 = vpack.i.bf16 %v3869_v3, %v3867_v0  ;;  %vm1148_vm15 = vcmp.ne.s32.totalorder %v673_v39, 15  ;;  %v1209_v18 = vrot.slane %v3867_v0, 1  ;;  %v1211_v21 = vrot.slane %v3869_v3, 1  ;;  %v3920_v62 = vld [vmem:[%s4553_s3 + $0x8] ss:$0 sps:$4 sm:$0xff]  }
  0x50   : > { %3391 = vrot.lane.b32.xlu1 %v3390_v37, %s3439_s9  ;;  %v1208_v23 = vsel %vm1153_vm0, %v1205_v33, %v1207_v58  ;;  %v3880_v24 = vmax.f32 %v413_v9, 0.0  ;;  %v375_v25 = vmul.f32 %v3004_v12, %v3493_v2  ;;  %v701_v27 = vand.u32 15, %v479_v42  ;;  %v3428_v9 = vld [vmem:[%s4553_s3 + $0x14] ss:$0 sps:$4 sm:$0xff]  }
  0x51   : > { %v1210_v26 = vsel %vm1153_vm0, %v1207_v58, %v1209_v18  ;;  %v3887_v6 = vsel %vm928_vm13, %v929_v60, %v930_v55  ;;  %vm1150_vm1 = vcmp.ne.s32.totalorder %v687_v10, 15  ;;  %v1212_v36 = vsel %vm1153_vm0, %v1209_v18, %v1211_v21 }
  0x52   : > { %v1341_v32 = vsel %vm1148_vm15, %v1210_v26, 0.0  ;;  %v1213_v34 = vrot.slane %v3880_v24, 1  ;;  %v414_v35 = vadd.f32 %v3527_v20, %v375_v25  ;;  %v932_v2 = vrot.slane %v3550_v43, 7 }
  0x53   : > { %3406 = vrot.lane.b32.xlu0 %v3405_v15, %s3439_s9  ;;  %v3400_v33 = vpack.i.bf16 %v1341_v32, %v1208_v23  ;;  %v934_v40 = vrot.slane %v3552_v44, 7  ;;  %vm3899_vm2 = vcmp.ne.s32.totalorder %v701_v27, 15  ;;  %v936_v44 = vrot.slane %v3554_v45, 7 }
  0x54   : > { %v1214_v37 = vsel %vm1153_vm0, %v1211_v21, %v1213_v34  ;;  %v3895_v39 = vmax.f32 %v414_v35, 0.0  ;;  %v3904_v20 = vsel %vm928_vm13, %v930_v55, %v932_v2  ;;  %v938_v58 = vrot.slane %v3556_v46, 7  ;;  %v3940_v21 = vld [vmem:[%s4553_s3 + $0x18] sm:$0xff]  }
  0x55   : > { %3401 = vrot.lane.b32.xlu1 %v3400_v33, %s3440_s12  ;;  %v1343_v49 = vsel %vm1150_vm1, %v1214_v37, 0.0  ;;  %v3910_v57 = vsel %vm928_vm13, %v932_v2, %v934_v40  ;;  %v3929_v46 = vsel %vm928_vm13, %v934_v40, %v936_v44  ;;  %v940_v42 = vrot.slane %v3586_v61, 7 }
  0x56   : > { %v3415_v7 = vpack.i.bf16 %v1343_v49, %v1212_v36  ;;  %v3410_v43 = vpack.i.bf16 %v3895_v39, %v3880_v24  ;;  %v1215_v53 = vrot.slane %v3895_v39, 1  ;;  %v3932_v10 = vsel %vm928_vm13, %v936_v44, %v938_v58 }
  0x57   : > { %v942_v15 = vrot.slane %v3606_v19, 7  ;;  %v944_v18 = vrot.slane %v3630_v38, 7  ;;  %vm270_vm3 = vcmask 195584   ;;  %v3943_v23 = vsel %vm928_vm13, %v938_v58, %v940_v42 }
  0x58   : > { %3416 = vrot.lane.b32.xlu0 %v3415_v7, %s3440_s12  ;;  %v1216_v59 = vsel %vm1153_vm0, %v1213_v34, %v1215_v53  ;;  %v1249_v55 = vsel %vm1153_vm0, %v1215_v53, 0.0  ;;  %vm1749_vm0 = vcmask 1043456   ;;  %v946_v38 = vrot.slane %v3640_v51, 7 }
  0x59   : > { %3411 = vrot.lane.b32.xlu1 %v3410_v43, %s3439_s9  ;;  %v1345_v45 = vsel %vm3899_vm2, %v1249_v55, 0.0  ;;  %v3946_v25 = vsel %vm928_vm13, %v940_v42, %v942_v15  ;;  %3251 = vmatprep.subr.msk.bf16.mxu0 %vm1749_vm0, %v3920_v62  ;;  %v3954_v61 = vsel %vm1749_vm0, %v3920_v62, 0  ;;  %v3957_v19 = vsel %vm928_vm13, %v942_v15, %v944_v18 }
  0x5a   : > { %v3420_v12 = vpack.i.bf16 %v1345_v45, %v1216_v59  ;;  %3250 = vmatprep.subr.msk.bf16.mxu1 %vm1749_vm0, %v3428_v9  ;;  %3113 = vmatpush3.bf16.msra.mxu0 %v3954_v61  ;;  %v1751_v26 = vsel %vm1749_vm0, %v3428_v9, 0  ;;  %v3441_v27 = vmov 0   ;;  %v948_v32 = vrot.slane %v3645_v56, 7 }
  0x5b   : > { %271 = vst.msk [vmem:[#allocation2] sm:$0xff] %vm270_vm3, %v3441_v27  ;;  %272 = vst.msk [vmem:[#allocation2 + $0x88] sm:$0xff] %vm270_vm3, %v3441_v27  ;;  %3077 = vmatpush3.bf16.msra.mxu1 %v1751_v26  ;;  %v950_v34 = vrot.slane %v3665_v11, 7  ;;  %3146 = vmatprep.subr.bf16.mxu0 %v3940_v21  ;;  %v3968_v35 = vsel %vm928_vm13, %v944_v18, %v946_v38  ;;  %v952_v51 = vrot.slane %v3669_v16, 7  ;;  %v954_v2 = vrot.slane %v3671_v17, 7 }
  0x5c   : > { %3182 = vmatprep.subr.bf16.mxu1 %v3576_v54  ;;  %v3973_v33 = vsel %vm928_vm13, %v946_v38, %v948_v32  ;;  %v956_v11 = vrot.slane %v3691_v30, 7  ;;  %v958_v40 = vrot.slane %v3719_v63, 7  ;;  %v960_v14 = vrot.slane %v3723_v4, 7 }
  0x5d   : > { %3421 = vrot.lane.b32.xlu1 %v3420_v12, %s3440_s12  ;;  %v3976_v36 = vsel %vm928_vm13, %v948_v32, %v950_v34  ;;  %v3980_v56 = vsel %vm928_vm13, %v950_v34, %v952_v51  ;;  %v3984_v37 = vsel %vm928_vm13, %v952_v51, %v954_v2  ;;  %v962_v17 = vrot.slane %v3725_v5, 7 }
  0x5e   : > { %v3988_v16 = vsel %vm928_vm13, %v954_v2, %v956_v11  ;;  %v3991_v49 = vsel %vm928_vm13, %v956_v11, %v958_v40  ;;  %v964_v43 = vrot.slane %v3743_v13, 7  ;;  %v966_v30 = vrot.slane %v3749_v31, 7 }
  0x5f   : > { %v3999_v53 = vsel %vm928_vm13, %v958_v40, %v960_v14  ;;  %v4002_v63 = vsel %vm928_vm13, %v960_v14, %v962_v17  ;;  %v968_v5 = vrot.slane %v3764_v50, 7  ;;  %v970_v13 = vrot.slane %v3776_v8, 7 }
  0x60   : > { %v4005_v44 = vsel %vm928_vm13, %v962_v17, %v964_v43  ;;  %v4008_v4 = vsel %vm928_vm13, %v964_v43, %v966_v30  ;;  %v972_v31 = vrot.slane %v3796_v28, 7  ;;  %v974_v59 = vrot.slane %v3808_v48, 7 }
  0x61   : > { %v4014_v58 = vsel %vm928_vm13, %v966_v30, %v968_v5  ;;  %v4018_v55 = vsel %vm928_vm13, %v968_v5, %v970_v13  ;;  %v976_v45 = vrot.slane %v3810_v47, 7  ;;  %v978_v50 = vrot.slane %v3814_v52, 7 }
  0x62   : > { %v1668_v7 = vld [vmem:[#allocation2] sm:$0xff]  ;;  %v4021_v9 = vsel %vm928_vm13, %v970_v13, %v972_v31  ;;  %v4025_v12 = vsel %vm928_vm13, %v972_v31, %v974_v59  ;;  %v980_v48 = vrot.slane %v3837_v22, 7  ;;  %v982_v42 = vrot.slane %v3846_v29, 7 }
  0x63   : > { %3114 = vmatprep.mubr.msk.bf16.mxu0 %vm270_vm3, %v1668_v7  ;;  %v4029_v8 = vsel %vm928_vm13, %v974_v59, %v976_v45  ;;  %v4032_v28 = vsel %vm928_vm13, %v976_v45, %v978_v50  ;;  %v984_v47 = vrot.slane %v3867_v0, 7  ;;  %v986_v18 = vrot.slane %v3869_v3, 7 }
  0x64   : > { %v4037_v15 = vsel %vm928_vm13, %v978_v50, %v980_v48  ;;  %v4042_v38 = vsel %vm928_vm13, %v980_v48, %v982_v42  ;;  %v988_v52 = vrot.slane %v3880_v24, 7  ;;  %v990_v29 = vrot.slane %v3895_v39, 7 }
  0x65   : > { %v4046_v26 = vsel %vm928_vm13, %v982_v42, %v984_v47  ;;  %v4049_v27 = vsel %vm928_vm13, %v984_v47, %v986_v18  ;;  %v484_v3 = vand.u32 15, %v3487_v1  ;;  %v450_v32 = vadd.s32 16, %v3487_v1 }
  0x66   : > { %v4052_v22 = vsel %vm928_vm13, %v986_v18, %v988_v52  ;;  %v4056_v0 = vsel %vm928_vm13, %v988_v52, %v990_v29  ;;  %v452_v24 = vadd.s32 32, %v3487_v1  ;;  %v1024_v34 = vsel %vm928_vm13, 0.0, %v929_v60 }
  0x67   : > { %vm864_vm4 = vcmp.ne.s32.totalorder %v484_v3, 0  ;;  %v498_v51 = vand.u32 15, %v450_v32  ;;  %vm1570_vm5 = vcmask 64512   ;;  %v454_v7 = vadd.s32 48, %v3487_v1 }
  0x68   : > { %v512_v11 = vand.u32 15, %v452_v24  ;;  %v1089_v39 = vsel %vm864_vm4, %v1024_v34, 0.0  ;;  %vm1603_vm7 = vcmask 130048   ;;  %v456_v48 = vadd.s32 64, %v3487_v1 }
  0x69   : > { %vm4064_vm6 = vcmp.ne.s32.totalorder %v498_v51, 0  ;;  %v526_v42 = vand.u32 15, %v454_v7 }
  0x6a   : > { %vm4069_vm8 = vcmp.ne.s32.totalorder %v512_v11, 0  ;;  %v1091_v59 = vsel %vm4064_vm6, %v3904_v20, 0.0  ;;  %v540_v11 = vand.u32 15, %v456_v48 }
  0x6b   : > { %vm4095_vm9 = vcmp.ne.s32.totalorder %v526_v42, 0 }
  0x6c   : > { %vm4099_vm10 = vcmp.ne.s32.totalorder %v540_v11, 0  ;;  %v1095_v42 = vsel %vm4095_vm9, %v3943_v23, 0.0 }
  0x8d   : > { %v3267_v2 = vpop.permute.xlu0 %3266 }
  0x8e   : > { %v3269_v40 = vunpack.i.h.bf16 %v3267_v2  ;;  %v3268_v14 = vunpack.i.l.bf16 %v3267_v2 }
  0x90   : > { %v1571_v41 = vsel %vm1570_vm5, %v1089_v39, %v3268_v14  ;;  %v1572_v60 = vsel %vm1570_vm5, %v3887_v6, %v3269_v40  ;;  %v1093_v6 = vsel %vm4069_vm8, %v3929_v46, 0.0 }
  0x91   : > { %v3272_v43 = vpop.permute.xlu0 %3271 }
  0x92   : > { %v3274_v5 = vunpack.i.h.bf16 %v3272_v43  ;;  %v3273_v13 = vunpack.i.l.bf16 %v3272_v43  ;;  %v3282_v31 = vpop.permute.xlu1 %3281 }
  0x93   : > { %v3284_v45 = vunpack.i.h.bf16 %v3282_v31  ;;  %v3283_v50 = vunpack.i.l.bf16 %v3282_v31 }
  0x94   : > { %v1574_v47 = vsel %vm1570_vm5, %v3910_v57, %v3274_v5  ;;  %v1573_v3 = vsel %vm1570_vm5, %v1091_v59, %v3273_v13  ;;  %v458_v57 = vadd.s32 80, %v3487_v1  ;;  %v460_v13 = vadd.s32 96, %v3487_v1 }
  0x95   : > { %v1604_v18 = vsel %vm1603_vm7, %v1571_v41, %v3283_v50  ;;  %v1605_v52 = vsel %vm1603_vm7, %v1572_v60, %v3284_v45  ;;  %v3277_v29 = vpop.permute.xlu0 %3276  ;;  %v464_v41 = vadd.s32 128, %v3487_v1 }
  0x96   : > { %v1636_v20 = vpack.c.bf16 %v1605_v52, %v1604_v18  ;;  %v3279_v32 = vunpack.i.h.bf16 %v3277_v29  ;;  %v3278_v24 = vunpack.i.l.bf16 %v3277_v29  ;;  %v3287_v34 = vpop.permute.xlu1 %3286  ;;  %v1097_v18 = vsel %vm4099_vm10, %v3957_v19, 0.0 }
  0x97   : > { %v3289_v51 = vunpack.i.h.bf16 %v3287_v34  ;;  %v3288_v2 = vunpack.i.l.bf16 %v3287_v34  ;;  %v568_v34 = vand.u32 15, %v460_v13 }
  0x98   : > { %1652 = vst.msk [vmem:[#allocation2 + $0x8] sm:$0xff] %vm270_vm3, %v1636_v20  ;;  %v1576_v40 = vsel %vm1570_vm5, %v3932_v10, %v3279_v32  ;;  %v1575_v14 = vsel %vm1570_vm5, %v1093_v6, %v3278_v24  ;;  %v554_v10 = vand.u32 15, %v458_v57 }
  0x99   : > { %v1607_v46 = vsel %vm1603_vm7, %v1574_v47, %v3289_v51  ;;  %v1606_v39 = vsel %vm1603_vm7, %v1573_v3, %v3288_v2  ;;  %v3297_v17 = vpop.permute.xlu0 %3296  ;;  %v3430_v3 = vld [vmem:[%s4553_s3 + $0x20] ss:$0 sps:$4 sm:$0xff]   ;;  %v462_v2 = vadd.s32 112, %v3487_v1  ;;  %vm4137_vm12 = vcmp.ne.s32.totalorder %v568_v34, 0 }
  0x9a   : > { %v1637_v7 = vpack.c.bf16 %v1607_v46, %v1606_v39  ;;  %v3299_v43 = vunpack.i.h.bf16 %v3297_v17  ;;  %v3298_v30 = vunpack.i.l.bf16 %v3297_v17  ;;  %v3292_v60 = vpop.permute.xlu1 %3291  ;;  %vm4122_vm11 = vcmp.ne.s32.totalorder %v554_v10, 0 }
  0x9b   : > { %v3294_v45 = vunpack.i.h.bf16 %v3292_v60  ;;  %v3293_v50 = vunpack.i.l.bf16 %v3292_v60 }
  0x9c   : > { %1653 = vst.msk [vmem:[#allocation2 + $0x10] sm:$0xff] %vm270_vm3, %v1637_v7  ;;  %v1608_v31 = vsel %vm1603_vm7, %v1575_v14, %v3298_v30  ;;  %v1609_v59 = vsel %vm1603_vm7, %v1576_v40, %v3299_v43  ;;  %v2168_v43 = vsel %vm1749_vm0, %v3430_v3, 0 }
  0x9d   : > { %v1638_v48 = vpack.c.bf16 %v1609_v59, %v1608_v31  ;;  %v3302_v47 = vpop.permute.xlu0 %3301  ;;  %v1578_v23 = vsel %vm1570_vm5, %v3946_v25, %v3294_v45  ;;  %v1577_v51 = vsel %vm1570_vm5, %v1095_v42, %v3293_v50  ;;  %v1099_v31 = vsel %vm4122_vm11, %v3973_v33, 0.0 }
  0x9e   : > { %v3304_v52 = vunpack.i.h.bf16 %v3302_v47  ;;  %v3303_v6 = vunpack.i.l.bf16 %v3302_v47  ;;  %v3307_v29 = vpop.permute.xlu1 %3306  ;;  %v1101_v45 = vsel %vm4137_vm12, %v3980_v56, 0.0 }
  0x9f   : > { %1654 = vst.msk [vmem:[#allocation2 + $0x18] sm:$0xff] %vm270_vm3, %v1638_v48  ;;  %v3309_v20 = vunpack.i.h.bf16 %v3307_v29  ;;  %v3308_v32 = vunpack.i.l.bf16 %v3307_v29  ;;  %v1669_v24 = vld [vmem:[#allocation2 + $0x8] sm:$0xff] }
  0xa0   : > { %3078 = vmatprep.mubr.msk.bf16.mxu1 %vm270_vm3, %v1669_v24  ;;  %3115 = vmatmul.mubr.msk.bf16.vlgmr.msra.gmra.mrb[0].mxu0 %vm270_vm3, %v1669_v24  ;;  %v1580_v11 = vsel %vm1570_vm5, %v3968_v35, %v3304_v52  ;;  %v1579_v57 = vsel %vm1570_vm5, %v1097_v18, %v3303_v6  ;;  %v582_v18 = vand.u32 15, %v462_v2  ;;  %v466_v6 = vadd.s32 144, %v3487_v1 }
  0xa1   : > { %v1610_v40 = vsel %vm1603_vm7, %v1577_v51, %v3308_v32  ;;  %v1611_v25 = vsel %vm1603_vm7, %v1578_v23, %v3309_v20  ;;  %v3317_v14 = vpop.permute.xlu0 %3316  ;;  %3147 = vmatpush3.bf16.msra.mxu0 %v3940_v21 }
  0xa2   : > { %v1639_v46 = vpack.c.bf16 %v1611_v25, %v1610_v40  ;;  %v3319_v39 = vunpack.i.h.bf16 %v3317_v14  ;;  %v3318_v17 = vunpack.i.l.bf16 %v3317_v14  ;;  %v3312_v7 = vpop.permute.xlu1 %3311  ;;  %3253 = vmatprep.subr.msk.bf16.mxu0 %vm1749_vm0, %v3430_v3  ;;  %vm4175_vm13 = vcmp.ne.s32.totalorder %v582_v18, 0 }
  0xa3   : > { %v4135_v30 = vld [vmem:[#allocation2 + $0x10] sm:$0xff]  ;;  %v3314_v5 = vunpack.i.h.bf16 %v3312_v7  ;;  %v3313_v10 = vunpack.i.l.bf16 %v3312_v7 }
  0xa4   : > { %1655 = vst.msk [vmem:[#allocation2 + $0x20] sm:$0xff] %vm270_vm3, %v1639_v46  ;;  %v1612_v21 = vsel %vm1603_vm7, %v1579_v57, %v3318_v17  ;;  %v1613_v60 = vsel %vm1603_vm7, %v1580_v11, %v3319_v39  ;;  %3079 = vmatmul.mubr.msk.bf16.vlgmr.msra.gmra.mrb[0].mxu1 %vm270_vm3, %v4135_v30  ;;  %3118 = vmatprep.mubr.msk.bf16.mxu0 %vm270_vm3, %v4135_v30  ;;  %v610_v11 = vand.u32 15, %v466_v6  ;;  %v468_v57 = vadd.s32 160, %v3487_v1 }
  0xa5   : > { %v1640_v13 = vpack.c.bf16 %v1613_v60, %v1612_v21  ;;  %3184 = vmatpush3.bf16.msra.mxu1 %v3576_v54  ;;  %v3327_v59 = vpop.permute.xlu0 %3326  ;;  %3149 = vmatpush3.bf16.msra.mxu0 %v2168_v43  ;;  %v596_v54 = vand.u32 15, %v464_v41  ;;  %v1582_v56 = vsel %vm1570_vm5, %v3976_v36, %v3314_v5  ;;  %v1581_v29 = vsel %vm1570_vm5, %v1099_v31, %v3313_v10 }
  0xa6   : > { %v3329_v50 = vunpack.i.h.bf16 %v3327_v59  ;;  %v3328_v48 = vunpack.i.l.bf16 %v3327_v59  ;;  %v3322_v42 = vpop.permute.xlu1 %3321  ;;  %v4156_v47 = vld [vmem:[#allocation2 + $0x18] sm:$0xff]  ;;  %3252 = vmatprep.subr.msk.bf16.mxu1 %vm1749_vm0, %v3920_v62  ;;  %v1103_v39 = vsel %vm4175_vm13, %v3988_v16, 0.0  ;;  %vm4209_vm15 = vcmp.ne.s32.totalorder %v610_v11, 0 }
  0xa7   : > { %1656 = vst.msk [vmem:[#allocation2 + $0x28] sm:$0xff] %vm270_vm3, %v1640_v13  ;;  %v3324_v33 = vunpack.i.h.bf16 %v3322_v42  ;;  %v3323_v52 = vunpack.i.l.bf16 %v3322_v42  ;;  %3082 = vmatprep.mubr.msk.bf16.mxu1 %vm270_vm3, %v4156_v47  ;;  %vm4181_vm14 = vcmp.ne.s32.totalorder %v596_v54, 0  ;;  %v624_v13 = vand.u32 15, %v468_v57 }
  0xa8   : > { %3119 = vmatmul.mubr.msk.bf16.gmra.mrb[4].mxu0 %vm270_vm3, %v4156_v47  ;;  %v1584_v62 = vsel %vm1570_vm5, %v3984_v37, %v3329_v50  ;;  %v1583_v3 = vsel %vm1570_vm5, %v1101_v45, %v3328_v48  ;;  %v1105_v7 = vsel %vm4181_vm14, %v3999_v53, 0.0  ;;  %v472_v6 = vadd.s32 192, %v3487_v1 }
  0xa9   : > { %v1614_v20 = vsel %vm1603_vm7, %v1581_v29, %v3323_v52  ;;  %v1615_v32 = vsel %vm1603_vm7, %v1582_v56, %v3324_v33  ;;  %v3337_v24 = vpop.permute.xlu0 %3336  ;;  %3185 = vmatpush3.bf16.msra.mxu1 %v3954_v61  ;;  %v470_v52 = vadd.s32 176, %v3487_v1  ;;  %vm4232_vm1 = vcmp.ne.s32.totalorder %v624_v13, 0 }
  0xaa   : > { %v1641_v34 = vpack.c.bf16 %v1615_v32, %v1614_v20  ;;  %v3339_v23 = vunpack.i.h.bf16 %v3337_v24  ;;  %v3338_v36 = vunpack.i.l.bf16 %v3337_v24  ;;  %v3332_v19 = vpop.permute.xlu1 %3331  ;;  %v1107_v20 = vsel %vm4209_vm15, %v4005_v44, 0.0 }
  0xab   : > { %v4179_v2 = vld [vmem:[#allocation2 + $0x20] sm:$0xff]  ;;  %v3334_v25 = vunpack.i.h.bf16 %v3332_v19  ;;  %v3333_v14 = vunpack.i.l.bf16 %v3332_v19 }
  0xac   : > { %1657 = vst.msk [vmem:[#allocation2 + $0x30] sm:$0xff] %vm270_vm3, %v1641_v34  ;;  %v1616_v61 = vsel %vm1603_vm7, %v1583_v3, %v3338_v36  ;;  %v1617_v40 = vsel %vm1603_vm7, %v1584_v62, %v3339_v23  ;;  %3083 = vmatmul.mubr.msk.bf16.gmra.mrb[4].mxu1 %vm270_vm3, %v4179_v2  ;;  %3122 = vmatprep.mubr.msk.bf16.mxu0 %vm270_vm3, %v4179_v2  ;;  %v638_v36 = vand.u32 15, %v470_v52 }
  0xad   : > { %v1642_v46 = vpack.c.bf16 %v1617_v40, %v1616_v61  ;;  %v3347_v17 = vpop.permute.xlu0 %3346  ;;  %v1586_v16 = vsel %vm1570_vm5, %v3991_v49, %v3334_v25  ;;  %v1585_v10 = vsel %vm1570_vm5, %v1103_v39, %v3333_v14  ;;  %v1109_v61 = vsel %vm4232_vm1, %v4014_v58, 0.0 }
  0xae   : > { %v3349_v43 = vunpack.i.h.bf16 %v3347_v17  ;;  %v3348_v35 = vunpack.i.l.bf16 %v3347_v17  ;;  %v3342_v41 = vpop.permute.xlu1 %3341  ;;  %v4199_v21 = vld [vmem:[#allocation2 + $0x28] sm:$0xff]  ;;  %v652_v40 = vand.u32 15, %v472_v6  ;;  %vm4256_vm2 = vcmp.ne.s32.totalorder %v638_v36, 0 }
  0xaf   : > { %1658 = vst.msk [vmem:[#allocation2 + $0x38] sm:$0xff] %vm270_vm3, %v1642_v46  ;;  %v3344_v60 = vunpack.i.h.bf16 %v3342_v41  ;;  %v3343_v5 = vunpack.i.l.bf16 %v3342_v41  ;;  %3086 = vmatprep.mubr.msk.bf16.mxu1 %vm270_vm3, %v4199_v21  ;;  %v1111_v53 = vsel %vm4256_vm2, %v4021_v9, 0.0 }
  0xb0   : > { %3123 = vmatmul.mubr.msk.bf16.gmra.mrb[8].mxu0 %vm270_vm3, %v4199_v21  ;;  %v1588_v31 = vsel %vm1570_vm5, %v4002_v63, %v3349_v43  ;;  %v1587_v59 = vsel %vm1570_vm5, %v1105_v7, %v3348_v35  ;;  %vm4265_vm0 = vcmp.ne.s32.totalorder %v652_v40, 0 }
  0xb1   : > { %v1618_v45 = vsel %vm1603_vm7, %v1585_v10, %v3343_v5  ;;  %v1619_v50 = vsel %vm1603_vm7, %v1586_v16, %v3344_v60  ;;  %v3357_v49 = vpop.permute.xlu0 %3356  ;;  %v474_v5 = vadd.s32 208, %v3487_v1 }
  0xb2   : > { %v1643_v48 = vpack.c.bf16 %v1619_v50, %v1618_v45  ;;  %v3359_v42 = vunpack.i.h.bf16 %v3357_v49  ;;  %v3358_v18 = vunpack.i.l.bf16 %v3357_v49  ;;  %v3352_v33 = vpop.permute.xlu1 %3351  ;;  %v1113_v45 = vsel %vm4265_vm0, %v4029_v8, 0.0 }
  0xb3   : > { %v4219_v54 = vld [vmem:[#allocation2 + $0x30] sm:$0xff]  ;;  %v3354_v29 = vunpack.i.h.bf16 %v3352_v33  ;;  %v3353_v62 = vunpack.i.l.bf16 %v3352_v33  ;;  %v666_v8 = vand.u32 15, %v474_v5 }
  0xb4   : > { %1659 = vst.msk [vmem:[#allocation2 + $0x40] sm:$0xff] %vm270_vm3, %v1643_v48  ;;  %v1620_v63 = vsel %vm1603_vm7, %v1587_v59, %v3358_v18  ;;  %v1621_v56 = vsel %vm1603_vm7, %v1588_v31, %v3359_v42  ;;  %3087 = vmatmul.mubr.msk.bf16.gmra.mrb[8].mxu1 %vm270_vm3, %v4219_v54  ;;  %3126 = vmatprep.mubr.msk.bf16.mxu0 %vm270_vm3, %v4219_v54  ;;  %v476_v31 = vadd.s32 224, %v3487_v1 }
  0xb5   : > { %v1644_v3 = vpack.c.bf16 %v1621_v56, %v1620_v63  ;;  %v3367_v24 = vpop.permute.xlu0 %3366  ;;  %v1590_v44 = vsel %vm1570_vm5, %v4008_v4, %v3354_v29  ;;  %v1589_v57 = vsel %vm1570_vm5, %v1107_v20, %v3353_v62  ;;  %vm4301_vm4 = vcmp.ne.s32.totalorder %v666_v8, 0 }
  0xb6   : > { %v3362_v34 = vpop.permute.xlu1 %3361  ;;  %v4236_v23 = vld [vmem:[#allocation2 + $0x38] sm:$0xff]  ;;  %v3369_v51 = vunpack.i.h.bf16 %v3367_v24  ;;  %v3368_v19 = vunpack.i.l.bf16 %v3367_v24  ;;  %v680_v56 = vand.u32 15, %v476_v31 }
  0xb7   : > { %1660 = vst.msk [vmem:[#allocation2 + $0x48] sm:$0xff] %vm270_vm3, %v1644_v3  ;;  %v3364_v37 = vunpack.i.h.bf16 %v3362_v34  ;;  %v3363_v11 = vunpack.i.l.bf16 %v3362_v34  ;;  %3090 = vmatprep.mubr.msk.bf16.mxu1 %vm270_vm3, %v4236_v23 }
  0xb8   : > { %3127 = vmatmul.mubr.msk.bf16.gmra.mrb[12].mxu0 %vm270_vm3, %v4236_v23  ;;  %v1592_v4 = vsel %vm1570_vm5, %v4018_v55, %v3369_v51  ;;  %v1591_v17 = vsel %vm1570_vm5, %v1109_v61, %v3368_v19  ;;  %vm4308_vm6 = vcmp.ne.s32.totalorder %v680_v56, 0 }
  0xb9   : > { %v1622_v25 = vsel %vm1603_vm7, %v1589_v57, %v3363_v11  ;;  %v1623_v14 = vsel %vm1603_vm7, %v1590_v44, %v3364_v37  ;;  %3150 = vmatprep.mubr.msk.bf16.mxu0 %vm270_vm3, %v4135_v30  ;;  %v3377_v7 = vpop.permute.xlu0 %3376  ;;  %v1115_v57 = vsel %vm4301_vm4, %v4037_v15, 0.0 }
  0xba   : > { %v1645_v46 = vpack.c.bf16 %v1623_v14, %v1622_v25  ;;  %v3372_v39 = vpop.permute.xlu1 %3371  ;;  %v3379_v35 = vunpack.i.h.bf16 %v3377_v7  ;;  %v3378_v41 = vunpack.i.l.bf16 %v3377_v7 }
  0xbb   : > { %v4260_v43 = vld [vmem:[#allocation2 + $0x40] sm:$0xff]  ;;  %v3374_v55 = vunpack.i.h.bf16 %v3372_v39  ;;  %v3373_v60 = vunpack.i.l.bf16 %v3372_v39 }
  0xbc   : > { %1661 = vst.msk [vmem:[#allocation2 + $0x50] sm:$0xff] %vm270_vm3, %v1645_v46  ;;  %3091 = vmatmul.mubr.msk.bf16.gmra.mrb[12].mxu1 %vm270_vm3, %v4260_v43  ;;  %v1624_v16 = vsel %vm1603_vm7, %v1591_v17, %v3378_v41  ;;  %v1625_v10 = vsel %vm1603_vm7, %v1592_v4, %v3379_v35 }
  0xbd   : > { %v1646_v59 = vpack.c.bf16 %v1625_v10, %v1624_v16  ;;  %v3387_v50 = vpop.permute.xlu0 %3386  ;;  %v1594_v9 = vsel %vm1570_vm5, %v4025_v12, %v3374_v55  ;;  %v1593_v52 = vsel %vm1570_vm5, %v1111_v53, %v3373_v60 }
  0xbe   : > { %v4275_v13 = vld [vmem:[#allocation2 + $0x48] sm:$0xff]  ;;  %v3382_v49 = vpop.permute.xlu1 %3381  ;;  %v3389_v48 = vunpack.i.h.bf16 %v3387_v50  ;;  %v3388_v42 = vunpack.i.l.bf16 %v3387_v50 }
  0xbf   : > { %3094 = vmatprep.mubr.msk.bf16.mxu1 %vm270_vm3, %v4275_v13  ;;  %v3384_v18 = vunpack.i.h.bf16 %v3382_v49  ;;  %v3383_v33 = vunpack.i.l.bf16 %v3382_v49  ;;  %1662 = vst.msk [vmem:[#allocation2 + $0x58] sm:$0xff] %vm270_vm3, %v1646_v59 }
  0xc0   : > { %3151 = vmatmul.mubr.msk.bf16.vlgmr.msra.gmra.mrb[0].mxu0 %vm270_vm3, %v4156_v47  ;;  %v1596_v29 = vsel %vm1570_vm5, %v4032_v28, %v3389_v48  ;;  %v1595_v47 = vsel %vm1570_vm5, %v1113_v45, %v3388_v42  ;;  %v478_v28 = vadd.s32 240, %v3487_v1  ;;  %v1117_v1 = vsel %vm4308_vm6, %v4046_v26, 0.0 }
  0xc1   : > { %3154 = vmatprep.mubr.msk.bf16.mxu0 %vm270_vm3, %v4179_v2  ;;  %v1626_v6 = vsel %vm1603_vm7, %v1593_v52, %v3383_v33  ;;  %v1627_v63 = vsel %vm1603_vm7, %v1594_v9, %v3384_v18  ;;  %v3397_v3 = vpop.permute.xlu0 %3396 }
  0xc2   : > { %v1647_v62 = vpack.c.bf16 %v1627_v63, %v1626_v6  ;;  %v3392_v20 = vpop.permute.xlu1 %3391  ;;  %v3399_v32 = vunpack.i.h.bf16 %v3397_v3  ;;  %v3398_v24 = vunpack.i.l.bf16 %v3397_v3  ;;  %v694_v46 = vand.u32 15, %v478_v28 }
  0xc3   : > { %v4296_v12 = vld [vmem:[#allocation2 + $0x50] sm:$0xff]  ;;  %v3394_v37 = vunpack.i.h.bf16 %v3392_v20  ;;  %v3393_v11 = vunpack.i.l.bf16 %v3392_v20 }
  0xc4   : > { %3095 = vmatmul.mubr.msk.bf16.gmra.mrb[16].mxu1 %vm270_vm3, %v4296_v12  ;;  %1663 = vst.msk [vmem:[#allocation2 + $0x60] sm:$0xff] %vm270_vm3, %v1647_v62  ;;  %v1628_v34 = vsel %vm1603_vm7, %v1595_v47, %v3398_v24  ;;  %v1629_v36 = vsel %vm1603_vm7, %v1596_v29, %v3399_v32  ;;  %vm4332_vm8 = vcmp.ne.s32.totalorder %v694_v46, 0 }
  0xc5   : > { %v1648_v19 = vpack.c.bf16 %v1629_v36, %v1628_v34  ;;  %v3407_v44 = vpop.permute.xlu0 %3406  ;;  %v1598_v4 = vsel %vm1570_vm5, %v4042_v38, %v3394_v37  ;;  %v1119_v31 = vsel %vm4332_vm8, %v4052_v22, 0.0 }
  0xc6   : > { %v3409_v61 = vunpack.i.h.bf16 %v3407_v44  ;;  %v3408_v40 = vunpack.i.l.bf16 %v3407_v44  ;;  %v1679_v25 = vld [vmem:[#allocation2 + $0x58] sm:$0xff] }
  0xc7   : > { %1664 = vst.msk [vmem:[#allocation2 + $0x68] sm:$0xff] %vm270_vm3, %v1648_v19  ;;  %v3402_v14 = vpop.permute.xlu1 %3401  ;;  %3098 = vmatprep.mubr.msk.bf16.mxu1 %vm270_vm3, %v1679_v25 }
  0xc8   : > { %3155 = vmatmul.mubr.msk.bf16.gmra.mrb[4].mxu0 %vm270_vm3, %v4199_v21  ;;  %v3404_v15 = vunpack.i.h.bf16 %v3402_v14  ;;  %v3403_v39 = vunpack.i.l.bf16 %v3402_v14  ;;  %v1597_v21 = vsel %vm1570_vm5, %v1115_v57, %v3393_v11  ;;  %v1600_v17 = vsel %vm1570_vm5, %v4049_v27, %v3409_v61 }
  0xc9   : > { %3158 = vmatprep.mubr.msk.bf16.mxu0 %vm270_vm3, %v4219_v54  ;;  %v1599_v7 = vsel %vm1570_vm5, %v1117_v1, %v3408_v40 }
  0xca   : > { %v1630_v26 = vsel %vm1603_vm7, %v1597_v21, %v3403_v39  ;;  %v1631_v58 = vsel %vm1603_vm7, %v1598_v4, %v3404_v15  ;;  %v3417_v35 = vpop.permute.xlu0 %3416 }
  0xcb   : > { %v1680_v41 = vld [vmem:[#allocation2 + $0x60] sm:$0xff]  ;;  %v1649_v54 = vpack.c.bf16 %v1631_v58, %v1630_v26  ;;  %v3419_v30 = vunpack.i.h.bf16 %v3417_v35  ;;  %v3418_v55 = vunpack.i.l.bf16 %v3417_v35  ;;  %v3412_v38 = vpop.permute.xlu1 %3411 }
  0xcc   : > { %3099 = vmatmul.mubr.msk.bf16.gmra.mrb[20].mxu1 %vm270_vm3, %v1680_v41  ;;  %v3414_v16 = vunpack.i.h.bf16 %v3412_v38  ;;  %v3413_v10 = vunpack.i.l.bf16 %v3412_v38 }
  0xcd   : > { %1665 = vst.msk [vmem:[#allocation2 + $0x70] sm:$0xff] %vm270_vm3, %v1649_v54  ;;  %v1632_v27 = vsel %vm1603_vm7, %v1599_v7, %v3418_v55  ;;  %v1633_v5 = vsel %vm1603_vm7, %v1600_v17, %v3419_v30 }
  0xce   : > { %v1650_v53 = vpack.c.bf16 %v1633_v5, %v1632_v27  ;;  %v1681_v59 = vld [vmem:[#allocation2 + $0x68] sm:$0xff]  ;;  %v1602_v48 = vsel %vm1570_vm5, %v4056_v0, %v3414_v16  ;;  %v1601_v42 = vsel %vm1570_vm5, %v1119_v31, %v3413_v10 }
  0xcf   : > { %v3422_v45 = vpop.permute.xlu1 %3421  ;;  %3102 = vmatprep.mubr.msk.bf16.mxu1 %vm270_vm3, %v1681_v59 }
  0xd0   : > { %3159 = vmatmul.mubr.msk.bf16.gmra.mrb[8].mxu0 %vm270_vm3, %v4236_v23  ;;  %1666 = vst.msk [vmem:[#allocation2 + $0x78] sm:$0xff] %vm270_vm3, %v1650_v53  ;;  %v3424_v50 = vunpack.i.h.bf16 %v3422_v45  ;;  %v3423_v49 = vunpack.i.l.bf16 %v3422_v45 }
  0xd1   : > { %3162 = vmatprep.mubr.msk.bf16.mxu0 %vm270_vm3, %v4260_v43 }
  0xd2   : > { %v1634_v22 = vsel %vm1603_vm7, %v1601_v42, %v3423_v49  ;;  %v1635_v18 = vsel %vm1603_vm7, %v1602_v48, %v3424_v50  ;;  %vm2593_vm7 = vcmask 57344  }
  0xd3   : > { %v1651_v23 = vpack.c.bf16 %v1635_v18, %v1634_v22 }
  0xd4   : > { %v1682_v33 = vld [vmem:[#allocation2 + $0x70] sm:$0xff] }
  0xd5   : > { %1667 = vst.msk [vmem:[#allocation2 + $0x80] sm:$0xff] %vm270_vm3, %v1651_v23  ;;  %3103 = vmatmul.mubr.msk.bf16.gmra.mrb[24].mxu1 %vm270_vm3, %v1682_v33 }
  0xd7   : > { %v1683_v9 = vld [vmem:[#allocation2 + $0x78] sm:$0xff] }
  0xd8   : > { %3163 = vmatmul.mubr.msk.bf16.gmra.mrb[12].mxu0 %vm270_vm3, %v4275_v13  ;;  %3106 = vmatprep.mubr.msk.bf16.mxu1 %vm270_vm3, %v1683_v9 }
  0xd9   : > { %3166 = vmatprep.mubr.msk.bf16.mxu0 %vm270_vm3, %v4296_v12 }
  0xdc   : > { %v1687_v0 = vld [vmem:[#allocation2 + $0x80] sm:$0xff] }
  0xdd   : > { %3107 = vmatmul.mubr.msk.bf16.gmra.mrb[28].mxu1 %vm270_vm3, %v1687_v0 }
  0xde   : > { %3130 = vmatprep.mubr.msk.bf16.mxu1 %vm270_vm3, %v4260_v43  ;;  %v2105_v43 = vld [vmem:[#allocation2 + $0x88] sm:$0xff] }
  0xe0   : > { %3167 = vmatmul.mubr.msk.bf16.gmra.mrb[16].mxu0 %vm270_vm3, %v1679_v25 }
  0xe1   : > { %3170 = vmatprep.mubr.msk.bf16.mxu0 %vm270_vm3, %v1680_v41 }
  0xe5   : > { %3131 = vmatmul.mubr.msk.bf16.vlgmr.msra.gmra.mrb[16].mxu1 %vm270_vm3, %v4275_v13 }
  0xe6   : > { %3134 = vmatprep.mubr.msk.bf16.mxu1 %vm270_vm3, %v4296_v12 }
  0xe8   : > { %3171 = vmatmul.mubr.msk.bf16.gmra.mrb[20].mxu0 %vm270_vm3, %v1681_v59 }
  0xe9   : > { %3174 = vmatprep.mubr.msk.bf16.mxu0 %vm270_vm3, %v1682_v33 }
  0xed   : > { %3135 = vmatmul.mubr.msk.bf16.gmra.mrb[20].mxu1 %vm270_vm3, %v1679_v25 }
  0xee   : > { %3138 = vmatprep.mubr.msk.bf16.mxu1 %vm270_vm3, %v1680_v41 }
  0xf0   : > { %3175 = vmatmul.mubr.msk.bf16.gmra.mrb[24].mxu0 %vm270_vm3, %v1683_v9 }
  0xf1   : > { %3178 = vmatprep.mubr.msk.bf16.mxu0 %vm270_vm3, %v1687_v0 }
  0xf5   : > { %3139 = vmatmul.mubr.msk.bf16.gmra.mrb[24].mxu1 %vm270_vm3, %v1681_v59 }
  0xf6   : > { %3142 = vmatprep.mubr.msk.bf16.mxu1 %vm270_vm3, %v1682_v33 }
  0xf8   : > { %3179 = vmatmul.mubr.msk.bf16.gmra.mrb[28].mxu0 %vm270_vm3, %v2105_v43 }
  0xfd   : > { %3143 = vmatmul.mubr.msk.bf16.gmra.mrb[28].mxu1 %vm270_vm3, %v1683_v9  ;;  %vm2491_vm3 = vcmask 60416  }
 0x177   : > { %v3080_v13 = vpop.f32.mrb[0].mxu1 }
 0x178   : > { %v1787_v52 = vpop.f32.mrb[1].mxu1 }
 0x179   : > { %v3081_v8 = vpop.f32.mrb[2].mxu1 }
 0x17a   : > { %v1790_v6 = vpop.f32.mrb[3].mxu1 }
 0x17f   : > { %v3084_v63 = vpop.f32.mrb[4].mxu1 }
 0x180   : > { %v1803_v56 = vpop.f32.mrb[5].mxu1 }
 0x181   : > { %v3085_v29 = vpop.f32.mrb[6].mxu1 }
 0x182   : > { %v1806_v47 = vpop.f32.mrb[7].mxu1 }
 0x187   : > { %v4380_v62 = vpop.f32.mrb[8].mxu1 }
 0x188   : > { %v4382_v3 = vpop.f32.mrb[9].mxu1 }
 0x189   : > { %v4384_v20 = vpop.f32.mrb[10].mxu1 }
 0x18a   : > { %v4386_v12 = vpop.f32.mrb[11].mxu1 }
 0x18f   : > { %v4388_v32 = vpop.f32.mrb[12].mxu1 }
 0x190   : > { %v4390_v24 = vpop.f32.mrb[13].mxu1 }
 0x191   : > { %v4392_v2 = vpop.f32.mrb[14].mxu1 }
 0x192   : > { %v4394_v28 = vpop.f32.mrb[15].mxu1 }
 0x193   : > { %v3152_v34 = vpop.f32.mrb[0].mxu0 }
 0x194   : > { %v3186_v36 = vadd.f32 %v3152_v34, %v3080_v13  ;;  %v2204_v51 = vpop.f32.mrb[1].mxu0 }
 0x195   : > { %v3187_v19 = vadd.f32 %v2204_v51, %v1787_v52  ;;  %v3153_v37 = vpop.f32.mrb[2].mxu0 }
 0x196   : > { %v2911_v11 = vpack.c.bf16 %v3186_v36, %v3186_v36  ;;  %v3188_v44 = vadd.f32 %v3153_v37, %v3081_v8  ;;  %v2207_v57 = vpop.f32.mrb[3].mxu0  ;;  %v2597_v1 = vmul.f32 %v3186_v36, %v3186_v36  ;;  %v2527_v7 = vsel %vm1570_vm5, %v3186_v36, 0.0 }
 0x197   : > { %v2909_v61 = vpack.c.bf16 %v3187_v19, %v3187_v19  ;;  %v2595_v40 = vmul.f32 %v3187_v19, %v3187_v19  ;;  %v3189_v25 = vadd.f32 %v2207_v57, %v1790_v6  ;;  %v2524_v46 = vsel %vm1570_vm5, %v3187_v19, 0.0 }
 0x198   : > { %2494 = vst.msk [vmem:[%s4401_s26 + $0x8] sm:$0xf] %vm2491_vm3, %v2911_v11  ;;  %v2912_v14 = vpack.c.bf16 %v3188_v44, %v3188_v44  ;;  %v2598_v21 = vmul.f32 %v3188_v44, %v3188_v44  ;;  %v2630_v60 = vsel %vm1570_vm5, %v2597_v1, 0.0  ;;  %v2529_v5 = vsel %vm1570_vm5, %v3188_v44, 0.0 }
 0x199   : > { %2492 = vst.msk [vmem:[%s4401_s26] sm:$0xf] %vm2491_vm3, %v2909_v61  ;;  %v2910_v15 = vpack.c.bf16 %v3189_v25, %v3189_v25  ;;  %v2525_v39 = vsel %vm1570_vm5, %v3189_v25, 0.0  ;;  %v2596_v4 = vmul.f32 %v3189_v25, %v3189_v25  ;;  %v2627_v26 = vsel %vm1570_vm5, %v2595_v40, 0.0 }
 0x19a   : > { %2495 = vst.msk [vmem:[%s4401_s26 + $0xc] sm:$0xf] %vm2491_vm3, %v2912_v14  ;;  %v2526_v17 = vadd.f32 %v2525_v39, %v2524_v46  ;;  %v2632_v16 = vsel %vm1570_vm5, %v2598_v21, 0.0 }
 0x19b   : > { %2493 = vst.msk [vmem:[%s4401_s26 + $0x4] sm:$0xf] %vm2491_vm3, %v2910_v15  ;;  %v2628_v58 = vsel %vm1570_vm5, %v2596_v4, 0.0  ;;  %v3156_v35 = vpop.f32.mrb[4].mxu0 }
 0x19c   : > { %v2528_v41 = vadd.f32 %v2527_v7, %v2526_v17  ;;  %v2629_v54 = vadd.f32 %v2628_v58, %v2627_v26  ;;  %v3190_v30 = vadd.f32 %v3156_v35, %v3084_v63  ;;  %v2220_v55 = vpop.f32.mrb[5].mxu0 }
 0x19d   : > { %v3191_v38 = vadd.f32 %v2220_v55, %v1803_v56  ;;  %v3157_v27 = vpop.f32.mrb[6].mxu0 }
 0x19e   : > { %v2631_v10 = vadd.f32 %v2630_v60, %v2629_v54  ;;  %v2915_v53 = vpack.c.bf16 %v3190_v30, %v3190_v30  ;;  %v2223_v31 = vpop.f32.mrb[7].mxu0  ;;  %v2530_v45 = vadd.f32 %v2529_v5, %v2528_v41  ;;  %v3192_v42 = vadd.f32 %v3157_v27, %v3085_v29 }
 0x19f   : > { %v2913_v59 = vpack.c.bf16 %v3191_v38, %v3191_v38  ;;  %v2531_v50 = vsel %vm1570_vm5, %v3191_v38, 0.0  ;;  %v2599_v49 = vmul.f32 %v3191_v38, %v3191_v38  ;;  %v3193_v22 = vadd.f32 %v2223_v31, %v1806_v47 }
 0x1a0   : > { %2498 = vst.msk [vmem:[%s4401_s26 + $0x18] sm:$0xf] %vm2491_vm3, %v2915_v53  ;;  %v2633_v48 = vadd.f32 %v2632_v16, %v2631_v10  ;;  %v2532_v18 = vadd.f32 %v2531_v50, %v2530_v45  ;;  %v2601_v33 = vmul.f32 %v3190_v30, %v3190_v30  ;;  %v2916_v0 = vpack.c.bf16 %v3192_v42, %v3192_v42 }
 0x1a1   : > { %2496 = vst.msk [vmem:[%s4401_s26 + $0x10] sm:$0xf] %vm2491_vm3, %v2913_v59  ;;  %v2634_v23 = vsel %vm1570_vm5, %v2599_v49, 0.0  ;;  %v2914_v43 = vpack.c.bf16 %v3193_v22, %v3193_v22  ;;  %v2533_v13 = vsel %vm1570_vm5, %v3193_v22, 0.0  ;;  %v2600_v52 = vmul.f32 %v3193_v22, %v3193_v22 }
 0x1a2   : > { %v2635_v9 = vadd.f32 %v2634_v23, %v2633_v48  ;;  %2499 = vst.msk [vmem:[%s4401_s26 + $0x1c] sm:$0xf] %vm2491_vm3, %v2916_v0  ;;  %v2534_v6 = vadd.f32 %v2533_v13, %v2532_v18  ;;  %v2535_v29 = vsel %vm1570_vm5, %v3190_v30, 0.0  ;;  %v2602_v47 = vmul.f32 %v3192_v42, %v3192_v42 }
 0x1a3   : > { %v3160_v8 = vpop.f32.mrb[8].mxu0  ;;  %2497 = vst.msk [vmem:[%s4401_s26 + $0x14] sm:$0xf] %vm2491_vm3, %v2914_v43  ;;  %v2636_v34 = vsel %vm1570_vm5, %v2600_v52, 0.0  ;;  %v2638_v19 = vsel %vm1570_vm5, %v2601_v33, 0.0 }
 0x1a4   : > { %v3194_v63 = vadd.f32 %v3160_v8, %v4380_v62  ;;  %v2236_v56 = vpop.f32.mrb[9].mxu0  ;;  %v2536_v37 = vadd.f32 %v2535_v29, %v2534_v6  ;;  %v2637_v11 = vadd.f32 %v2636_v34, %v2635_v9  ;;  %v2537_v62 = vsel %vm1570_vm5, %v3192_v42, 0.0 }
 0x1a5   : > { %v3195_v36 = vadd.f32 %v2236_v56, %v4382_v3  ;;  %v3161_v51 = vpop.f32.mrb[10].mxu0  ;;  %v2640_v15 = vsel %vm1570_vm5, %v2602_v47, 0.0 }
 0x1a6   : > { %v2919_v44 = vpack.c.bf16 %v3194_v63, %v3194_v63  ;;  %v2239_v57 = vpop.f32.mrb[11].mxu0  ;;  %v2639_v1 = vadd.f32 %v2638_v19, %v2637_v11  ;;  %v2538_v14 = vadd.f32 %v2537_v62, %v2536_v37  ;;  %v3196_v3 = vadd.f32 %v3161_v51, %v4384_v20 }
 0x1a7   : > { %v2917_v61 = vpack.c.bf16 %v3195_v36, %v3195_v36  ;;  %v2539_v40 = vsel %vm1570_vm5, %v3195_v36, 0.0  ;;  %v2603_v25 = vmul.f32 %v3195_v36, %v3195_v36  ;;  %v3197_v46 = vadd.f32 %v2239_v57, %v4386_v12 }
 0x1a8   : > { %2502 = vst.msk [vmem:[%s4401_s26 + $0x28] sm:$0xf] %vm2491_vm3, %v2919_v44  ;;  %v2605_v4 = vmul.f32 %v3194_v63, %v3194_v63  ;;  %v2540_v21 = vadd.f32 %v2539_v40, %v2538_v14  ;;  %v2641_v17 = vadd.f32 %v2640_v15, %v2639_v1  ;;  %v2920_v7 = vpack.c.bf16 %v3196_v3, %v3196_v3 }
 0x1a9   : > { %2500 = vst.msk [vmem:[%s4401_s26 + $0x20] sm:$0xf] %vm2491_vm3, %v2917_v61  ;;  %v2642_v39 = vsel %vm1570_vm5, %v2603_v25, 0.0  ;;  %v2918_v26 = vpack.c.bf16 %v3197_v46, %v3197_v46  ;;  %v2541_v58 = vsel %vm1570_vm5, %v3197_v46, 0.0  ;;  %v2604_v35 = vmul.f32 %v3197_v46, %v3197_v46 }
 0x1aa   : > { %v2643_v54 = vadd.f32 %v2642_v39, %v2641_v17  ;;  %2503 = vst.msk [vmem:[%s4401_s26 + $0x2c] sm:$0xf] %vm2491_vm3, %v2920_v7  ;;  %v2542_v20 = vadd.f32 %v2541_v58, %v2540_v21  ;;  %v2543_v55 = vsel %vm1570_vm5, %v3194_v63, 0.0  ;;  %v2606_v60 = vmul.f32 %v3196_v3, %v3196_v3 }
 0x1ab   : > { %v3164_v41 = vpop.f32.mrb[12].mxu0  ;;  %2501 = vst.msk [vmem:[%s4401_s26 + $0x24] sm:$0xf] %vm2491_vm3, %v2918_v26  ;;  %v2644_v38 = vsel %vm1570_vm5, %v2604_v35, 0.0  ;;  %v2646_v16 = vsel %vm1570_vm5, %v2605_v4, 0.0 }
 0x1ac   : > { %v3198_v12 = vadd.f32 %v3164_v41, %v4388_v32  ;;  %v2252_v30 = vpop.f32.mrb[13].mxu0  ;;  %v2544_v10 = vadd.f32 %v2543_v55, %v2542_v20  ;;  %v2645_v53 = vadd.f32 %v2644_v38, %v2643_v54  ;;  %v2545_v32 = vsel %vm1570_vm5, %v3196_v3, 0.0 }
 0x1ad   : > { %v3199_v27 = vadd.f32 %v2252_v30, %v4390_v24  ;;  %v3165_v5 = vpop.f32.mrb[14].mxu0  ;;  %v2648_v18 = vsel %vm1570_vm5, %v2606_v60, 0.0 }
 0x1ae   : > { %v2923_v31 = vpack.c.bf16 %v3198_v12, %v3198_v12  ;;  %v2255_v59 = vpop.f32.mrb[15].mxu0  ;;  %v2647_v48 = vadd.f32 %v2646_v16, %v2645_v53  ;;  %v2546_v42 = vadd.f32 %v2545_v32, %v2544_v10  ;;  %v3200_v24 = vadd.f32 %v3165_v5, %v4392_v2 }
 0x1af   : > { %v2921_v45 = vpack.c.bf16 %v3199_v27, %v3199_v27  ;;  %v2547_v50 = vsel %vm1570_vm5, %v3199_v27, 0.0  ;;  %v2607_v49 = vmul.f32 %v3199_v27, %v3199_v27  ;;  %v3201_v22 = vadd.f32 %v2255_v59, %v4394_v28 }
 0x1b0   : > { %2506 = vst.msk [vmem:[%s4401_s26 + $0x38] sm:$0xf] %vm2491_vm3, %v2923_v31  ;;  %v2548_v33 = vadd.f32 %v2547_v50, %v2546_v42  ;;  %v2649_v9 = vadd.f32 %v2648_v18, %v2647_v48  ;;  %v2924_v0 = vpack.c.bf16 %v3200_v24, %v3200_v24  ;;  %v2609_v43 = vmul.f32 %v3198_v12, %v3198_v12 }
 0x1b1   : > { %2504 = vst.msk [vmem:[%s4401_s26 + $0x30] sm:$0xf] %vm2491_vm3, %v2921_v45  ;;  %v2650_v23 = vsel %vm1570_vm5, %v2607_v49, 0.0  ;;  %v2922_v13 = vpack.c.bf16 %v3201_v22, %v3201_v22  ;;  %v2549_v52 = vsel %vm1570_vm5, %v3201_v22, 0.0  ;;  %v2608_v8 = vmul.f32 %v3201_v22, %v3201_v22 }
 0x1b2   : > { %v2651_v63 = vadd.f32 %v2650_v23, %v2649_v9  ;;  %2507 = vst.msk [vmem:[%s4401_s26 + $0x3c] sm:$0xf] %vm2491_vm3, %v2924_v0  ;;  %v2550_v2 = vadd.f32 %v2549_v52, %v2548_v33  ;;  %v2551_v56 = vsel %vm1570_vm5, %v3198_v12, 0.0  ;;  %v2610_v29 = vmul.f32 %v3200_v24, %v3200_v24 }
 0x1b3   : > { %v3168_v6 = vpop.f32.mrb[16].mxu0  ;;  %2505 = vst.msk [vmem:[%s4401_s26 + $0x34] sm:$0xf] %vm2491_vm3, %v2922_v13  ;;  %v2652_v47 = vsel %vm1570_vm5, %v2608_v8, 0.0  ;;  %v2654_v37 = vsel %vm1570_vm5, %v2609_v43, 0.0  ;;  %v2553_v11 = vsel %vm1570_vm5, %v3200_v24, 0.0 }
 0x1b4   : > { %v2268_v28 = vpop.f32.mrb[17].mxu0  ;;  %v2552_v36 = vadd.f32 %v2551_v56, %v2550_v2  ;;  %v2653_v51 = vadd.f32 %v2652_v47, %v2651_v63  ;;  %v2656_v62 = vsel %vm1570_vm5, %v2610_v29, 0.0 }
 0x1b5   : > { %v3169_v34 = vpop.f32.mrb[18].mxu0 }
 0x1b6   : > { %v2271_v19 = vpop.f32.mrb[19].mxu0  ;;  %v2655_v44 = vadd.f32 %v2654_v37, %v2653_v51  ;;  %v2554_v57 = vadd.f32 %v2553_v11, %v2552_v36 }
 0x1b8   : > { %v3132_v61 = vpop.f32.mrb[16].mxu1  ;;  %v2657_v40 = vadd.f32 %v2656_v62, %v2655_v44 }
 0x1b9   : > { %v3202_v25 = vadd.f32 %v3168_v6, %v3132_v61  ;;  %v2027_v1 = vpop.f32.mrb[17].mxu1 }
 0x1ba   : > { %v3203_v3 = vadd.f32 %v2268_v28, %v2027_v1  ;;  %v3133_v46 = vpop.f32.mrb[18].mxu1 }
 0x1bb   : > { %v3172_v14 = vpop.f32.mrb[20].mxu0  ;;  %v2927_v39 = vpack.c.bf16 %v3202_v25, %v3202_v25  ;;  %v3204_v4 = vadd.f32 %v3169_v34, %v3133_v46  ;;  %v2030_v21 = vpop.f32.mrb[19].mxu1  ;;  %v2613_v60 = vmul.f32 %v3202_v25, %v3202_v25  ;;  %v2559_v16 = vsel %vm1570_vm5, %v3202_v25, 0.0 }
 0x1bc   : > { %v2284_v15 = vpop.f32.mrb[21].mxu0  ;;  %v2925_v7 = vpack.c.bf16 %v3203_v3, %v3203_v3  ;;  %v2555_v26 = vsel %vm1570_vm5, %v3203_v3, 0.0  ;;  %v2611_v58 = vmul.f32 %v3203_v3, %v3203_v3  ;;  %v3205_v35 = vadd.f32 %v2271_v19, %v2030_v21 }
 0x1bd   : > { %v3173_v17 = vpop.f32.mrb[22].mxu0  ;;  %2510 = vst.msk [vmem:[%s4401_s26 + $0x48] sm:$0xf] %vm2491_vm3, %v2927_v39  ;;  %v2556_v54 = vadd.f32 %v2555_v26, %v2554_v57  ;;  %v2928_v20 = vpack.c.bf16 %v3204_v4, %v3204_v4  ;;  %v2614_v53 = vmul.f32 %v3204_v4, %v3204_v4  ;;  %v2561_v49 = vsel %vm1570_vm5, %v3204_v4, 0.0 }
 0x1be   : > { %v2287_v41 = vpop.f32.mrb[23].mxu0  ;;  %2508 = vst.msk [vmem:[%s4401_s26 + $0x40] sm:$0xf] %vm2491_vm3, %v2925_v7  ;;  %v2658_v12 = vsel %vm1570_vm5, %v2611_v58, 0.0  ;;  %v2926_v30 = vpack.c.bf16 %v3205_v35, %v3205_v35  ;;  %v2557_v55 = vsel %vm1570_vm5, %v3205_v35, 0.0  ;;  %v2612_v5 = vmul.f32 %v3205_v35, %v3205_v35 }
 0x1bf   : > { %v2659_v38 = vadd.f32 %v2658_v12, %v2657_v40  ;;  %2511 = vst.msk [vmem:[%s4401_s26 + $0x4c] sm:$0xf] %vm2491_vm3, %v2928_v20  ;;  %v2558_v27 = vadd.f32 %v2557_v55, %v2556_v54  ;;  %v2662_v18 = vsel %vm1570_vm5, %v2613_v60, 0.0  ;;  %v2664_v63 = vsel %vm1570_vm5, %v2614_v53, 0.0 }
 0x1c0   : > { %2509 = vst.msk [vmem:[%s4401_s26 + $0x44] sm:$0xf] %vm2491_vm3, %v2926_v30  ;;  %v3136_v10 = vpop.f32.mrb[20].mxu1  ;;  %v2660_v59 = vsel %vm1570_vm5, %v2612_v5, 0.0 }
 0x1c1   : > { %v2560_v31 = vadd.f32 %v2559_v16, %v2558_v27  ;;  %v3206_v32 = vadd.f32 %v3172_v14, %v3136_v10  ;;  %v2043_v45 = vpop.f32.mrb[21].mxu1  ;;  %v2661_v48 = vadd.f32 %v2660_v59, %v2659_v38 }
 0x1c2   : > { %v3207_v42 = vadd.f32 %v2284_v15, %v2043_v45  ;;  %v3137_v24 = vpop.f32.mrb[22].mxu1 }
 0x1c3   : > { %v3176_v50 = vpop.f32.mrb[24].mxu0  ;;  %v2931_v23 = vpack.c.bf16 %v3206_v32, %v3206_v32  ;;  %v2562_v33 = vadd.f32 %v2561_v49, %v2560_v31  ;;  %v2046_v9 = vpop.f32.mrb[23].mxu1  ;;  %v2663_v43 = vadd.f32 %v2662_v18, %v2661_v48  ;;  %v3208_v28 = vadd.f32 %v3173_v17, %v3137_v24 }
 0x1c4   : > { %v2300_v22 = vpop.f32.mrb[25].mxu0  ;;  %v2929_v13 = vpack.c.bf16 %v3207_v42, %v3207_v42  ;;  %v2563_v52 = vsel %vm1570_vm5, %v3207_v42, 0.0  ;;  %v2615_v8 = vmul.f32 %v3207_v42, %v3207_v42  ;;  %v3209_v56 = vadd.f32 %v2287_v41, %v2046_v9 }
 0x1c5   : > { %v3177_v0 = vpop.f32.mrb[26].mxu0  ;;  %2514 = vst.msk [vmem:[%s4401_s26 + $0x58] sm:$0xf] %vm2491_vm3, %v2931_v23  ;;  %v2564_v2 = vadd.f32 %v2563_v52, %v2562_v33  ;;  %v2665_v29 = vadd.f32 %v2664_v63, %v2663_v43  ;;  %v2617_v34 = vmul.f32 %v3206_v32, %v3206_v32  ;;  %v2932_v36 = vpack.c.bf16 %v3208_v28, %v3208_v28 }
 0x1c6   : > { %v2303_v6 = vpop.f32.mrb[27].mxu0  ;;  %2512 = vst.msk [vmem:[%s4401_s26 + $0x50] sm:$0xf] %vm2491_vm3, %v2929_v13  ;;  %v2666_v47 = vsel %vm1570_vm5, %v2615_v8, 0.0  ;;  %v2930_v51 = vpack.c.bf16 %v3209_v56, %v3209_v56  ;;  %v2565_v37 = vsel %vm1570_vm5, %v3209_v56, 0.0  ;;  %v2616_v11 = vmul.f32 %v3209_v56, %v3209_v56 }
 0x1c7   : > { %v2667_v19 = vadd.f32 %v2666_v47, %v2665_v29  ;;  %2515 = vst.msk [vmem:[%s4401_s26 + $0x5c] sm:$0xf] %vm2491_vm3, %v2932_v36  ;;  %v2566_v57 = vadd.f32 %v2565_v37, %v2564_v2  ;;  %v2567_v25 = vsel %vm1570_vm5, %v3206_v32, 0.0  ;;  %v2618_v1 = vmul.f32 %v3208_v28, %v3208_v28 }
 0x1c8   : > { %v3140_v44 = vpop.f32.mrb[24].mxu1  ;;  %2513 = vst.msk [vmem:[%s4401_s26 + $0x54] sm:$0xf] %vm2491_vm3, %v2930_v51  ;;  %v2668_v14 = vsel %vm1570_vm5, %v2616_v11, 0.0  ;;  %v2670_v39 = vsel %vm1570_vm5, %v2617_v34, 0.0  ;;  %v2569_v58 = vsel %vm1570_vm5, %v3208_v28, 0.0 }
 0x1c9   : > { %v3210_v62 = vadd.f32 %v3176_v50, %v3140_v44  ;;  %v2059_v61 = vpop.f32.mrb[25].mxu1  ;;  %v2568_v4 = vadd.f32 %v2567_v25, %v2566_v57  ;;  %v2669_v21 = vadd.f32 %v2668_v14, %v2667_v19  ;;  %v2672_v38 = vsel %vm1570_vm5, %v2618_v1, 0.0 }
 0x1ca   : > { %v3211_v3 = vadd.f32 %v2300_v22, %v2059_v61  ;;  %v3141_v46 = vpop.f32.mrb[26].mxu1 }
 0x1cb   : > { %v3180_v40 = vpop.f32.mrb[28].mxu0  ;;  %v2935_v17 = vpack.c.bf16 %v3210_v62, %v3210_v62  ;;  %v2062_v7 = vpop.f32.mrb[27].mxu1  ;;  %v2671_v12 = vadd.f32 %v2670_v39, %v2669_v21  ;;  %v2570_v30 = vadd.f32 %v2569_v58, %v2568_v4  ;;  %v3212_v55 = vadd.f32 %v3177_v0, %v3141_v46 }
 0x1cc   : > { %v2316_v15 = vpop.f32.mrb[29].mxu0  ;;  %v2933_v35 = vpack.c.bf16 %v3211_v3, %v3211_v3  ;;  %v2571_v41 = vsel %vm1570_vm5, %v3211_v3, 0.0  ;;  %v2619_v54 = vmul.f32 %v3211_v3, %v3211_v3  ;;  %v3213_v60 = vadd.f32 %v2303_v6, %v2062_v7 }
 0x1cd   : > { %v3181_v26 = vpop.f32.mrb[30].mxu0  ;;  %2518 = vst.msk [vmem:[%s4401_s26 + $0x68] sm:$0xf] %vm2491_vm3, %v2935_v17  ;;  %v2621_v5 = vmul.f32 %v3210_v62, %v3210_v62  ;;  %v2572_v16 = vadd.f32 %v2571_v41, %v2570_v30  ;;  %v2673_v10 = vadd.f32 %v2672_v38, %v2671_v12  ;;  %v2936_v53 = vpack.c.bf16 %v3212_v55, %v3212_v55 }
 0x1ce   : > { %v2319_v20 = vpop.f32.mrb[31].mxu0  ;;  %2516 = vst.msk [vmem:[%s4401_s26 + $0x60] sm:$0xf] %vm2491_vm3, %v2933_v35  ;;  %v2674_v27 = vsel %vm1570_vm5, %v2619_v54, 0.0  ;;  %v2934_v31 = vpack.c.bf16 %v3213_v60, %v3213_v60  ;;  %v2573_v59 = vsel %vm1570_vm5, %v3213_v60, 0.0  ;;  %v2620_v32 = vmul.f32 %v3213_v60, %v3213_v60 }
 0x1cf   : > { %v2675_v50 = vadd.f32 %v2674_v27, %v2673_v10  ;;  %2519 = vst.msk [vmem:[%s4401_s26 + $0x6c] sm:$0xf] %vm2491_vm3, %v2936_v53  ;;  %v2574_v49 = vadd.f32 %v2573_v59, %v2572_v16  ;;  %v2575_v24 = vsel %vm1570_vm5, %v3210_v62, 0.0  ;;  %v2622_v22 = vmul.f32 %v3212_v55, %v3212_v55 }
 0x1d0   : > { %v3144_v45 = vpop.f32.mrb[28].mxu1  ;;  %2517 = vst.msk [vmem:[%s4401_s26 + $0x64] sm:$0xf] %vm2491_vm3, %v2934_v31  ;;  %v2676_v18 = vsel %vm1570_vm5, %v2620_v32, 0.0  ;;  %v2678_v9 = vsel %vm1570_vm5, %v2621_v5, 0.0  ;;  %v2577_v8 = vsel %vm1570_vm5, %v3212_v55, 0.0 }
 0x1d1   : > { %v3214_v48 = vadd.f32 %v3180_v40, %v3144_v45  ;;  %v2075_v42 = vpop.f32.mrb[29].mxu1  ;;  %v2576_v0 = vadd.f32 %v2575_v24, %v2574_v49  ;;  %v2677_v43 = vadd.f32 %v2676_v18, %v2675_v50  ;;  %v2680_v34 = vsel %vm1570_vm5, %v2622_v22, 0.0 }
 0x1d2   : > { %v3215_v23 = vadd.f32 %v2316_v15, %v2075_v42  ;;  %v3145_v33 = vpop.f32.mrb[30].mxu1 }
 0x1d3   : > { %v2939_v13 = vpack.c.bf16 %v3214_v48, %v3214_v48  ;;  %v2078_v52 = vpop.f32.mrb[31].mxu1  ;;  %v2679_v28 = vadd.f32 %v2678_v9, %v2677_v43  ;;  %v2578_v56 = vadd.f32 %v2577_v8, %v2576_v0  ;;  %v3216_v29 = vadd.f32 %v3181_v26, %v3145_v33 }
 0x1d4   : > { %v2937_v6 = vpack.c.bf16 %v3215_v23, %v3215_v23  ;;  %v2579_v63 = vsel %vm1570_vm5, %v3215_v23, 0.0  ;;  %v2623_v2 = vmul.f32 %v3215_v23, %v3215_v23  ;;  %v3217_v47 = vadd.f32 %v2319_v20, %v2078_v52 }
 0x1d5   : > { %2522 = vst.msk [vmem:[%s4401_s26 + $0x78] sm:$0xf] %vm2491_vm3, %v2939_v13  ;;  %v2580_v51 = vadd.f32 %v2579_v63, %v2578_v56  ;;  %v2681_v19 = vadd.f32 %v2680_v34, %v2679_v28  ;;  %v2940_v37 = vpack.c.bf16 %v3216_v29, %v3216_v29  ;;  %v2625_v11 = vmul.f32 %v3214_v48, %v3214_v48 }
 0x1d6   : > { %2520 = vst.msk [vmem:[%s4401_s26 + $0x70] sm:$0xf] %vm2491_vm3, %v2937_v6  ;;  %v2682_v36 = vsel %vm1570_vm5, %v2623_v2, 0.0  ;;  %v2938_v44 = vpack.c.bf16 %v3217_v47, %v3217_v47  ;;  %v2581_v57 = vsel %vm1570_vm5, %v3217_v47, 0.0  ;;  %v2624_v62 = vmul.f32 %v3217_v47, %v3217_v47 }
 0x1d7   : > { %v2683_v61 = vadd.f32 %v2682_v36, %v2681_v19  ;;  %2523 = vst.msk [vmem:[%s4401_s26 + $0x7c] sm:$0xf] %vm2491_vm3, %v2940_v37  ;;  %v2582_v40 = vadd.f32 %v2581_v57, %v2580_v51  ;;  %v2583_v25 = vsel %vm1570_vm5, %v3214_v48, 0.0  ;;  %v2626_v1 = vmul.f32 %v3216_v29, %v3216_v29 }
 0x1d8   : > { %2521 = vst.msk [vmem:[%s4401_s26 + $0x74] sm:$0xf] %vm2491_vm3, %v2938_v44  ;;  %v2684_v14 = vsel %vm1570_vm5, %v2624_v62, 0.0  ;;  %v2686_v15 = vsel %vm1570_vm5, %v2625_v11, 0.0  ;;  %v2585_v39 = vsel %vm1570_vm5, %v3216_v29, 0.0 }
 0x1d9   : > { %v2584_v3 = vadd.f32 %v2583_v25, %v2582_v40  ;;  %v2685_v46 = vadd.f32 %v2684_v14, %v2683_v61  ;;  %v2688_v17 = vsel %vm1570_vm5, %v2626_v1, 0.0 }
 0x1db   : > { %v2586_v4 = vadd.f32 %v2585_v39, %v2584_v3  ;;  %v2687_v21 = vadd.f32 %v2686_v15, %v2685_v46 }
 0x1dd   : > { %v2587_v7 = vrot.slane %v2586_v4, 4  ;;  %v2689_v26 = vadd.f32 %v2688_v17, %v2687_v21 }
 0x1df   : > { %v2588_v58 = vadd.f32 %v2587_v7, %v2586_v4  ;;  %v2690_v35 = vrot.slane %v2689_v26, 4 }
 0x1e1   : > { %v2589_v41 = vrot.slane %v2588_v58, 2  ;;  %v2691_v54 = vadd.f32 %v2690_v35, %v2689_v26 }
 0x1e3   : > { %v2590_v20 = vadd.f32 %v2589_v41, %v2588_v58  ;;  %v2692_v12 = vrot.slane %v2691_v54, 2 }
 0x1e5   : > { %v2591_v30 = vrot.slane %v2590_v20, 1  ;;  %v2693_v55 = vadd.f32 %v2692_v12, %v2691_v54 }
 0x1e7   : > { %v2592_v60 = vadd.f32 %v2591_v30, %v2590_v20  ;;  %v2694_v38 = vrot.slane %v2693_v55, 1 }
 0x1e9   : > { %2594 = vst.msk [vmem:[%s265_s28] sm:$0x1] %vm2593_vm7, %v2592_v60  ;;  %v2695_v27 = vadd.f32 %v2694_v38, %v2693_v55 }
 0x1eb   : > { %2696 = vst.msk [vmem:[%s268_s7] sm:$0x1] %vm2593_vm7, %v2695_v27 }
 0x1ec PF: > { %s17_s21 = sadd.s32 1, %s3437_s21  }
 0x1ed   : > { %p14_p4 = scmp.ge.s32.totalorder %s17_s21, 4  }
 0x1ef   :  { %16 = sbr.rel (!%p14_p4) target bundleno = 1 (0x1), region = 92 }

// kernel: _forward.7
= control target key start
LH: loop header
LB: loop body
LE: loop exit
PB: predicated region body
PF: predicated region fallthrough
CT: control target
= control target key end

     0   :  { %vm614_vm0 = vcmask 1043456   ;;  %vm517_vm1 = vcmask 64512   ;;  %s1944_s0 = inlined_call_operand.vmem [shape: bf16[512,8], index: 0, kind: input, shape index: {}]   ;;  %s1945_s1 = inlined_call_operand.vmem [shape: f32[1,8], index: 1, kind: input, shape index: {}]   ;;  %s1946_s2 = inlined_call_operand.vmem [shape: f32[1,8], index: 2, kind: input, shape index: {}]   ;;  %s1947_s3 = inlined_call_operand.vmem [shape: bf16[8,32], index: 3, kind: input, shape index: {}]   ;;  %s1948_s4 = inlined_call_operand.vmem [shape: bf16[512,32], index: 4, kind: input, shape index: {}]   ;;  %s1949_s5 = inlined_call_operand.hbm [shape: f32[512,32], index: 5, kind: output, shape index: {}]  }
   0x1   :  { %v388_v0 = vld [vmem:[%s1947_s3] sm:$0xf]  ;;  %v1278_v7 = vld [vmem:[%s1944_s0 + $0x8] sm:$0xff]   ;;  %v1279_v30 = vld [vmem:[%s1944_s0 + $0x10] sm:$0xff]  }
   0x2   :  { %v1023_v1 = vld [vmem:[%s1944_s0] sm:$0xff]   ;;  %1441 = vmatprep.subr.msk.bf16.mxu0 %vm614_vm0, %v388_v0  ;;  %1442 = vmatprep.subr.msk.bf16.mxu1 %vm614_vm0, %v388_v0  ;;  %v616_v3 = vsel %vm614_vm0, %v388_v0, 0  ;;  %v1028_v11 = vunpack.c.l.bf16 %v1278_v7  ;;  %v1029_v12 = vunpack.c.h.bf16 %v1278_v7  ;;  %v1294_v13 = vld [vmem:[%s1944_s0 + $0x88] sm:$0xff]   ;;  %v1295_v35 = vld [vmem:[%s1944_s0 + $0x90] sm:$0xff]   ;;  %v1032_v44 = vunpack.c.l.bf16 %v1279_v30 }
   0x3   :  { %v1512_v2 = vld [vmem:[%s1945_s1] ss:$0 sm:$0xff]  ;;  %v1024_v4 = vunpack.c.l.bf16 %v1023_v1  ;;  %v1025_v5 = vunpack.c.h.bf16 %v1023_v1  ;;  %1374 = vmatpush3.bf16.msra.mxu0 %v616_v3  ;;  %1440 = vmatpush3.bf16.msra.mxu1 %v616_v3  ;;  %v1092_v16 = vunpack.c.l.bf16 %v1294_v13  ;;  %v1093_v17 = vunpack.c.h.bf16 %v1294_v13  ;;  %v1280_v40 = vld [vmem:[%s1944_s0 + $0x18] sm:$0xff]  }
   0x4   :  { %v1293_v6 = vld [vmem:[%s1944_s0 + $0x80] sm:$0xff]   ;;  %v159_v20 = vmul.f32 %v1028_v11, %v1512_v2  ;;  %v160_v21 = vmul.f32 %v1029_v12, %v1512_v2  ;;  %v1296_v45 = vld [vmem:[%s1944_s0 + $0x98] sm:$0xff]   ;;  %v1033_v48 = vunpack.c.h.bf16 %v1279_v30  ;;  %v1096_v49 = vunpack.c.l.bf16 %v1295_v35 }
   0x5   :  { %v1523_v8 = vld [vmem:[%s1946_s2] ss:$0 sm:$0xff]  ;;  %v1088_v9 = vunpack.c.l.bf16 %v1293_v6  ;;  %v1089_v10 = vunpack.c.h.bf16 %v1293_v6  ;;  %v157_v14 = vmul.f32 %v1024_v4, %v1512_v2  ;;  %v158_v15 = vmul.f32 %v1025_v5, %v1512_v2 }
   0x6   :  { %v191_v24 = vmul.f32 %v1092_v16, %v1512_v2  ;;  %v192_v25 = vmul.f32 %v1093_v17, %v1512_v2  ;;  %v230_v28 = vadd.f32 %v1523_v8, %v159_v20  ;;  %v231_v29 = vadd.f32 %v1523_v8, %v160_v21 }
   0x7   :  { %v189_v18 = vmul.f32 %v1088_v9, %v1512_v2  ;;  %v190_v19 = vmul.f32 %v1089_v10, %v1512_v2  ;;  %v228_v22 = vadd.f32 %v1523_v8, %v157_v14  ;;  %v229_v23 = vadd.f32 %v1523_v8, %v158_v15 }
   0x8   :  { %v262_v33 = vadd.f32 %v1523_v8, %v191_v24  ;;  %v263_v34 = vadd.f32 %v1523_v8, %v192_v25  ;;  %v294_v38 = vmax.f32 %v230_v28, 0.0  ;;  %v295_v39 = vmax.f32 %v231_v29, 0.0 }
   0x9   :  { %v260_v26 = vadd.f32 %v1523_v8, %v189_v18  ;;  %v261_v27 = vadd.f32 %v1523_v8, %v190_v19  ;;  %v292_v31 = vmax.f32 %v228_v22, 0.0  ;;  %v293_v32 = vmax.f32 %v229_v23, 0.0 }
   0xa   :  { %v326_v42 = vmax.f32 %v262_v33, 0.0  ;;  %v327_v43 = vmax.f32 %v263_v34, 0.0  ;;  %v357_v47 = vpack.c.bf16 %v295_v39, %v294_v38  ;;  %v161_v51 = vmul.f32 %v1032_v44, %v1512_v2 }
   0xb   :  { %v324_v36 = vmax.f32 %v260_v26, 0.0  ;;  %v325_v37 = vmax.f32 %v261_v27, 0.0  ;;  %v356_v41 = vpack.c.bf16 %v293_v32, %v292_v31  ;;  %v1097_v52 = vunpack.c.h.bf16 %v1295_v35 }
   0xc   :  { %v373_v50 = vpack.c.bf16 %v327_v43, %v326_v42  ;;  %v1036_v53 = vunpack.c.l.bf16 %v1280_v40  ;;  %v162_v54 = vmul.f32 %v1033_v48, %v1512_v2  ;;  %v193_v55 = vmul.f32 %v1096_v49, %v1512_v2 }
   0xd   :  { %v372_v46 = vpack.c.bf16 %v325_v37, %v324_v36  ;;  %1375 = vmatprep.mubr.msk.bf16.mxu0 %vm517_vm1, %v356_v41  ;;  %v1037_v56 = vunpack.c.h.bf16 %v1280_v40  ;;  %v1100_v57 = vunpack.c.l.bf16 %v1296_v45 }
   0xe   :  { %1376 = vmatmul.mubr.msk.bf16.vlgmr.msra.gmra.mrb[0].mxu0 %vm517_vm1, %v357_v47 }
   0xf   :  { %1407 = vmatprep.mubr.msk.bf16.mxu1 %vm517_vm1, %v372_v46 }
  0x10   :  { %10 = vsyncpa [#allocation3], 0  ;;  %1408 = vmatmul.mubr.msk.bf16.vlgmr.msra.gmra.mrb[0].mxu1 %vm517_vm1, %v373_v50  ;;  %v232_v58 = vadd.f32 %v1523_v8, %v161_v51  ;;  %v194_v59 = vmul.f32 %v1097_v52, %v1512_v2  ;;  %v163_v60 = vmul.f32 %v1036_v53, %v1512_v2  ;;  %v1101_v61 = vunpack.c.h.bf16 %v1296_v45  ;;  %v1281_v3 = vld [vmem:[%s1944_s0 + $0x20] sm:$0xff]   ;;  %v1282_v18 = vld [vmem:[%s1944_s0 + $0x28] sm:$0xff]  }
  0x11   :  { %v233_v62 = vadd.f32 %v1523_v8, %v162_v54  ;;  %v264_v63 = vadd.f32 %v1523_v8, %v193_v55  ;;  %v164_v0 = vmul.f32 %v1037_v56, %v1512_v2  ;;  %v195_v1 = vmul.f32 %v1100_v57, %v1512_v2  ;;  %v1297_v13 = vld [vmem:[%s1944_s0 + $0xa0] sm:$0xff]   ;;  %v1298_v27 = vld [vmem:[%s1944_s0 + $0xa8] sm:$0xff]   ;;  %v1283_v40 = vld [vmem:[%s1944_s0 + $0x30] sm:$0xff]  }
  0x12   :  { %v296_v4 = vmax.f32 %v232_v58, 0.0  ;;  %v265_v5 = vadd.f32 %v1523_v8, %v194_v59  ;;  %v234_v6 = vadd.f32 %v1523_v8, %v163_v60  ;;  %v196_v7 = vmul.f32 %v1101_v61, %v1512_v2  ;;  %v1299_v53 = vld [vmem:[%s1944_s0 + $0xb0] sm:$0xff]  }
  0x13   :  { %v297_v9 = vmax.f32 %v233_v62, 0.0  ;;  %v328_v10 = vmax.f32 %v264_v63, 0.0  ;;  %v235_v11 = vadd.f32 %v1523_v8, %v164_v0  ;;  %v266_v12 = vadd.f32 %v1523_v8, %v195_v1  ;;  %v1284_v62 = vld [vmem:[%s1944_s0 + $0x38] sm:$0xff]  }
  0x14   :  { %v329_v14 = vmax.f32 %v265_v5, 0.0  ;;  %v298_v15 = vmax.f32 %v234_v6, 0.0  ;;  %v267_v16 = vadd.f32 %v1523_v8, %v196_v7  ;;  %v1040_v17 = vunpack.c.l.bf16 %v1281_v3 }
  0x15   :  { %v358_v19 = vpack.c.bf16 %v297_v9, %v296_v4  ;;  %v299_v20 = vmax.f32 %v235_v11, 0.0  ;;  %v330_v21 = vmax.f32 %v266_v12, 0.0  ;;  %v1041_v22 = vunpack.c.h.bf16 %v1281_v3  ;;  %v1300_v4 = vld [vmem:[%s1944_s0 + $0xb8] sm:$0xff]  }
  0x16   :  { %v374_v23 = vpack.c.bf16 %v329_v14, %v328_v10  ;;  %v331_v24 = vmax.f32 %v267_v16, 0.0  ;;  %v165_v25 = vmul.f32 %v1040_v17, %v1512_v2  ;;  %v1104_v26 = vunpack.c.l.bf16 %v1297_v13  ;;  %v1285_v14 = vld [vmem:[%s1944_s0 + $0x40] sm:$0xff]  }
  0x17   :  { %1379 = vmatprep.mubr.msk.bf16.mxu0 %vm517_vm1, %v358_v19  ;;  %v359_v28 = vpack.c.bf16 %v299_v20, %v298_v15  ;;  %v166_v29 = vmul.f32 %v1041_v22, %v1512_v2  ;;  %v1105_v30 = vunpack.c.h.bf16 %v1297_v13  ;;  %v1044_v31 = vunpack.c.l.bf16 %v1282_v18 }
  0x18   :  { %1411 = vmatprep.mubr.msk.bf16.mxu1 %vm517_vm1, %v374_v23  ;;  %v375_v32 = vpack.c.bf16 %v331_v24, %v330_v21  ;;  %v236_v33 = vadd.f32 %v1523_v8, %v165_v25  ;;  %v197_v34 = vmul.f32 %v1104_v26, %v1512_v2  ;;  %v1045_v35 = vunpack.c.h.bf16 %v1282_v18 }
  0x19   :  { %1380 = vmatmul.mubr.msk.bf16.gmra.mrb[4].mxu0 %vm517_vm1, %v359_v28  ;;  %v237_v36 = vadd.f32 %v1523_v8, %v166_v29  ;;  %v198_v37 = vmul.f32 %v1105_v30, %v1512_v2  ;;  %v167_v38 = vmul.f32 %v1044_v31, %v1512_v2  ;;  %v1108_v39 = vunpack.c.l.bf16 %v1298_v27  ;;  %v1301_v31 = vld [vmem:[%s1944_s0 + $0xc0] sm:$0xff]  }
  0x1a   :  { %1412 = vmatmul.mubr.msk.bf16.gmra.mrb[4].mxu1 %vm517_vm1, %v375_v32  ;;  %v300_v41 = vmax.f32 %v236_v33, 0.0  ;;  %v268_v42 = vadd.f32 %v1523_v8, %v197_v34  ;;  %v168_v43 = vmul.f32 %v1045_v35, %v1512_v2  ;;  %v1109_v44 = vunpack.c.h.bf16 %v1298_v27 }
  0x1b   :  { %v301_v45 = vmax.f32 %v237_v36, 0.0  ;;  %v269_v46 = vadd.f32 %v1523_v8, %v198_v37  ;;  %v238_v47 = vadd.f32 %v1523_v8, %v167_v38  ;;  %v199_v48 = vmul.f32 %v1108_v39, %v1512_v2  ;;  %v1286_v36 = vld [vmem:[%s1944_s0 + $0x48] sm:$0xff]  }
  0x1c   :  { %v332_v49 = vmax.f32 %v268_v42, 0.0  ;;  %v239_v50 = vadd.f32 %v1523_v8, %v168_v43  ;;  %v200_v51 = vmul.f32 %v1109_v44, %v1512_v2  ;;  %v1048_v52 = vunpack.c.l.bf16 %v1283_v40 }
  0x1d   :  { %v360_v54 = vpack.c.bf16 %v301_v45, %v300_v41  ;;  %v333_v55 = vmax.f32 %v269_v46, 0.0  ;;  %v302_v56 = vmax.f32 %v238_v47, 0.0  ;;  %v270_v57 = vadd.f32 %v1523_v8, %v199_v48  ;;  %v1302_v45 = vld [vmem:[%s1944_s0 + $0xc8] sm:$0xff]  }
  0x1e   :  { %v303_v58 = vmax.f32 %v239_v50, 0.0  ;;  %v271_v59 = vadd.f32 %v1523_v8, %v200_v51  ;;  %v1049_v60 = vunpack.c.h.bf16 %v1283_v40  ;;  %v169_v61 = vmul.f32 %v1048_v52, %v1512_v2 }
  0x1f   :  { %1383 = vmatprep.mubr.msk.bf16.mxu0 %vm517_vm1, %v360_v54  ;;  %v376_v63 = vpack.c.bf16 %v333_v55, %v332_v49  ;;  %v334_v0 = vmax.f32 %v270_v57, 0.0  ;;  %v1112_v1 = vunpack.c.l.bf16 %v1299_v53  ;;  %v1113_v3 = vunpack.c.h.bf16 %v1299_v53 }
  0x20   :  { %v361_v5 = vpack.c.bf16 %v303_v58, %v302_v56  ;;  %v335_v6 = vmax.f32 %v271_v59, 0.0  ;;  %v170_v7 = vmul.f32 %v1049_v60, %v1512_v2  ;;  %v240_v9 = vadd.f32 %v1523_v8, %v169_v61  ;;  %v1287_v58 = vld [vmem:[%s1944_s0 + $0x50] sm:$0xff]  }
  0x21   :  { %1415 = vmatprep.mubr.msk.bf16.mxu1 %vm517_vm1, %v376_v63  ;;  %v201_v10 = vmul.f32 %v1112_v1, %v1512_v2  ;;  %v202_v11 = vmul.f32 %v1113_v3, %v1512_v2  ;;  %v1052_v12 = vunpack.c.l.bf16 %v1284_v62  ;;  %v1053_v13 = vunpack.c.h.bf16 %v1284_v62 }
  0x22   :  { %1384 = vmatmul.mubr.msk.bf16.gmra.mrb[8].mxu0 %vm517_vm1, %v361_v5  ;;  %v377_v15 = vpack.c.bf16 %v335_v6, %v334_v0  ;;  %v241_v16 = vadd.f32 %v1523_v8, %v170_v7  ;;  %v304_v17 = vmax.f32 %v240_v9, 0.0  ;;  %v1116_v18 = vunpack.c.l.bf16 %v1300_v4 }
  0x23   :  { %v272_v19 = vadd.f32 %v1523_v8, %v201_v10  ;;  %v273_v20 = vadd.f32 %v1523_v8, %v202_v11  ;;  %v171_v21 = vmul.f32 %v1052_v12, %v1512_v2  ;;  %v172_v22 = vmul.f32 %v1053_v13, %v1512_v2 }
  0x24   :  { %1416 = vmatmul.mubr.msk.bf16.gmra.mrb[8].mxu1 %vm517_vm1, %v377_v15  ;;  %v305_v23 = vmax.f32 %v241_v16, 0.0  ;;  %v1117_v24 = vunpack.c.h.bf16 %v1300_v4  ;;  %v203_v25 = vmul.f32 %v1116_v18, %v1512_v2  ;;  %v1056_v26 = vunpack.c.l.bf16 %v1285_v14  ;;  %v1303_v4 = vld [vmem:[%s1944_s0 + $0xd0] sm:$0xff]   ;;  %v1288_v18 = vld [vmem:[%s1944_s0 + $0x58] sm:$0xff]  }
  0x25   :  { %v336_v27 = vmax.f32 %v272_v19, 0.0  ;;  %v337_v28 = vmax.f32 %v273_v20, 0.0  ;;  %v242_v29 = vadd.f32 %v1523_v8, %v171_v21  ;;  %v243_v30 = vadd.f32 %v1523_v8, %v172_v22 }
  0x26   :  { %v362_v32 = vpack.c.bf16 %v305_v23, %v304_v17  ;;  %v204_v33 = vmul.f32 %v1117_v24, %v1512_v2  ;;  %v274_v34 = vadd.f32 %v1523_v8, %v203_v25  ;;  %v1057_v35 = vunpack.c.h.bf16 %v1285_v14  ;;  %v1304_v23 = vld [vmem:[%s1944_s0 + $0xd8] sm:$0xff]  }
  0x27   :  { %v378_v37 = vpack.c.bf16 %v337_v28, %v336_v27  ;;  %v306_v38 = vmax.f32 %v242_v29, 0.0  ;;  %v307_v39 = vmax.f32 %v243_v30, 0.0  ;;  %v173_v40 = vmul.f32 %v1056_v26, %v1512_v2 }
  0x28   :  { %1387 = vmatprep.mubr.msk.bf16.mxu0 %vm517_vm1, %v362_v32  ;;  %v275_v41 = vadd.f32 %v1523_v8, %v204_v33  ;;  %v338_v42 = vmax.f32 %v274_v34, 0.0  ;;  %v174_v43 = vmul.f32 %v1057_v35, %v1512_v2  ;;  %v1120_v44 = vunpack.c.l.bf16 %v1301_v31 }
  0x29   :  { %1419 = vmatprep.mubr.msk.bf16.mxu1 %vm517_vm1, %v378_v37  ;;  %v363_v46 = vpack.c.bf16 %v307_v39, %v306_v38  ;;  %v244_v47 = vadd.f32 %v1523_v8, %v173_v40  ;;  %v1121_v48 = vunpack.c.h.bf16 %v1301_v31  ;;  %v1060_v49 = vunpack.c.l.bf16 %v1286_v36 }
  0x2a   :  { %v339_v50 = vmax.f32 %v275_v41, 0.0  ;;  %v245_v51 = vadd.f32 %v1523_v8, %v174_v43  ;;  %v205_v52 = vmul.f32 %v1120_v44, %v1512_v2  ;;  %v1061_v53 = vunpack.c.h.bf16 %v1286_v36  ;;  %v1289_v36 = vld [vmem:[%s1944_s0 + $0x60] sm:$0xff]  }
  0x2b   :  { %1388 = vmatmul.mubr.msk.bf16.gmra.mrb[12].mxu0 %vm517_vm1, %v363_v46  ;;  %v308_v54 = vmax.f32 %v244_v47, 0.0  ;;  %v206_v55 = vmul.f32 %v1121_v48, %v1512_v2  ;;  %v175_v56 = vmul.f32 %v1060_v49, %v1512_v2  ;;  %v1124_v57 = vunpack.c.l.bf16 %v1302_v45  ;;  %v1305_v49 = vld [vmem:[%s1944_s0 + $0xe0] sm:$0xff]  }
  0x2c   :  { %v379_v59 = vpack.c.bf16 %v339_v50, %v338_v42  ;;  %v309_v60 = vmax.f32 %v245_v51, 0.0  ;;  %v276_v61 = vadd.f32 %v1523_v8, %v205_v52  ;;  %v176_v62 = vmul.f32 %v1061_v53, %v1512_v2 }
  0x2d   :  { %v277_v63 = vadd.f32 %v1523_v8, %v206_v55  ;;  %v246_v0 = vadd.f32 %v1523_v8, %v175_v56  ;;  %v1125_v1 = vunpack.c.h.bf16 %v1302_v45  ;;  %v207_v3 = vmul.f32 %v1124_v57, %v1512_v2 }
  0x2e   :  { %1420 = vmatmul.mubr.msk.bf16.gmra.mrb[12].mxu1 %vm517_vm1, %v379_v59  ;;  %v364_v5 = vpack.c.bf16 %v309_v60, %v308_v54  ;;  %v340_v6 = vmax.f32 %v276_v61, 0.0  ;;  %v247_v7 = vadd.f32 %v1523_v8, %v176_v62  ;;  %v1064_v9 = vunpack.c.l.bf16 %v1287_v58  ;;  %v1290_v54 = vld [vmem:[%s1944_s0 + $0x68] sm:$0xff]  }
  0x2f   :  { %v341_v10 = vmax.f32 %v277_v63, 0.0  ;;  %v310_v11 = vmax.f32 %v246_v0, 0.0  ;;  %v208_v12 = vmul.f32 %v1125_v1, %v1512_v2  ;;  %v278_v13 = vadd.f32 %v1523_v8, %v207_v3  ;;  %v1306_v63 = vld [vmem:[%s1944_s0 + $0xe8] sm:$0xff]  }
  0x30   :  { %1391 = vmatprep.mubr.msk.bf16.mxu0 %vm517_vm1, %v364_v5  ;;  %v311_v14 = vmax.f32 %v247_v7, 0.0  ;;  %v1065_v15 = vunpack.c.h.bf16 %v1287_v58  ;;  %v177_v16 = vmul.f32 %v1064_v9, %v1512_v2  ;;  %v1128_v17 = vunpack.c.l.bf16 %v1303_v4 }
  0x31   :  { %v380_v19 = vpack.c.bf16 %v341_v10, %v340_v6  ;;  %v279_v20 = vadd.f32 %v1523_v8, %v208_v12  ;;  %v342_v21 = vmax.f32 %v278_v13, 0.0  ;;  %v1129_v22 = vunpack.c.h.bf16 %v1303_v4 }
  0x32   :  { %v365_v24 = vpack.c.bf16 %v311_v14, %v310_v11  ;;  %v178_v25 = vmul.f32 %v1065_v15, %v1512_v2  ;;  %v248_v26 = vadd.f32 %v1523_v8, %v177_v16  ;;  %v209_v27 = vmul.f32 %v1128_v17, %v1512_v2  ;;  %v1291_v14 = vld [vmem:[%s1944_s0 + $0x70] sm:$0xff]  }
  0x33   :  { %1423 = vmatprep.mubr.msk.bf16.mxu1 %vm517_vm1, %v380_v19  ;;  %v343_v28 = vmax.f32 %v279_v20, 0.0  ;;  %v210_v29 = vmul.f32 %v1129_v22, %v1512_v2  ;;  %v1068_v30 = vunpack.c.l.bf16 %v1288_v18  ;;  %v1069_v31 = vunpack.c.h.bf16 %v1288_v18 }
  0x34   :  { %1392 = vmatmul.mubr.msk.bf16.gmra.mrb[16].mxu0 %vm517_vm1, %v365_v24  ;;  %v249_v32 = vadd.f32 %v1523_v8, %v178_v25  ;;  %v312_v33 = vmax.f32 %v248_v26, 0.0  ;;  %v280_v34 = vadd.f32 %v1523_v8, %v209_v27  ;;  %v1132_v35 = vunpack.c.l.bf16 %v1304_v23 }
  0x35   :  { %v381_v37 = vpack.c.bf16 %v343_v28, %v342_v21  ;;  %v281_v38 = vadd.f32 %v1523_v8, %v210_v29  ;;  %v179_v39 = vmul.f32 %v1068_v30, %v1512_v2  ;;  %v180_v40 = vmul.f32 %v1069_v31, %v1512_v2 }
  0x36   :  { %v313_v41 = vmax.f32 %v249_v32, 0.0  ;;  %v344_v42 = vmax.f32 %v280_v34, 0.0  ;;  %v1133_v43 = vunpack.c.h.bf16 %v1304_v23  ;;  %v211_v44 = vmul.f32 %v1132_v35, %v1512_v2  ;;  %v1307_v23 = vld [vmem:[%s1944_s0 + $0xf0] sm:$0xff]  }
  0x37   :  { %1424 = vmatmul.mubr.msk.bf16.gmra.mrb[16].mxu1 %vm517_vm1, %v381_v37  ;;  %v345_v45 = vmax.f32 %v281_v38, 0.0  ;;  %v250_v46 = vadd.f32 %v1523_v8, %v179_v39  ;;  %v251_v47 = vadd.f32 %v1523_v8, %v180_v40  ;;  %v1072_v48 = vunpack.c.l.bf16 %v1289_v36 }
  0x38   :  { %v366_v50 = vpack.c.bf16 %v313_v41, %v312_v33  ;;  %v212_v51 = vmul.f32 %v1133_v43, %v1512_v2  ;;  %v282_v52 = vadd.f32 %v1523_v8, %v211_v44  ;;  %v1073_v53 = vunpack.c.h.bf16 %v1289_v36  ;;  %v1292_v36 = vld [vmem:[%s1944_s0 + $0x78] sm:$0xff]  }
  0x39   :  { %v382_v55 = vpack.c.bf16 %v345_v45, %v344_v42  ;;  %v314_v56 = vmax.f32 %v250_v46, 0.0  ;;  %v315_v57 = vmax.f32 %v251_v47, 0.0  ;;  %v181_v58 = vmul.f32 %v1072_v48, %v1512_v2  ;;  %v1308_v41 = vld [vmem:[%s1944_s0 + $0xf8] sm:$0xff]  }
  0x3a   :  { %1395 = vmatprep.mubr.msk.bf16.mxu0 %vm517_vm1, %v366_v50  ;;  %v283_v59 = vadd.f32 %v1523_v8, %v212_v51  ;;  %v346_v60 = vmax.f32 %v282_v52, 0.0  ;;  %v182_v61 = vmul.f32 %v1073_v53, %v1512_v2  ;;  %v1136_v62 = vunpack.c.l.bf16 %v1305_v49 }
  0x3b   :  { %1427 = vmatprep.mubr.msk.bf16.mxu1 %vm517_vm1, %v382_v55  ;;  %v367_v0 = vpack.c.bf16 %v315_v57, %v314_v56  ;;  %v252_v1 = vadd.f32 %v1523_v8, %v181_v58  ;;  %v1137_v3 = vunpack.c.h.bf16 %v1305_v49  ;;  %v1076_v4 = vunpack.c.l.bf16 %v1290_v54 }
  0x3c   :  { %v347_v5 = vmax.f32 %v283_v59, 0.0  ;;  %v253_v6 = vadd.f32 %v1523_v8, %v182_v61  ;;  %v213_v7 = vmul.f32 %v1136_v62, %v1512_v2  ;;  %v1077_v9 = vunpack.c.h.bf16 %v1290_v54 }
  0x3d   :  { %1396 = vmatmul.mubr.msk.bf16.gmra.mrb[20].mxu0 %vm517_vm1, %v367_v0  ;;  %v316_v10 = vmax.f32 %v252_v1, 0.0  ;;  %v214_v11 = vmul.f32 %v1137_v3, %v1512_v2  ;;  %v183_v12 = vmul.f32 %v1076_v4, %v1512_v2  ;;  %v1140_v13 = vunpack.c.l.bf16 %v1306_v63 }
  0x3e   :  { %v383_v15 = vpack.c.bf16 %v347_v5, %v346_v60  ;;  %v317_v16 = vmax.f32 %v253_v6, 0.0  ;;  %v284_v17 = vadd.f32 %v1523_v8, %v213_v7  ;;  %v184_v18 = vmul.f32 %v1077_v9, %v1512_v2 }
  0x3f   :  { %v285_v19 = vadd.f32 %v1523_v8, %v214_v11  ;;  %v254_v20 = vadd.f32 %v1523_v8, %v183_v12  ;;  %v1141_v21 = vunpack.c.h.bf16 %v1306_v63  ;;  %v215_v22 = vmul.f32 %v1140_v13, %v1512_v2 }
  0x40   :  { %1428 = vmatmul.mubr.msk.bf16.gmra.mrb[20].mxu1 %vm517_vm1, %v383_v15  ;;  %v368_v24 = vpack.c.bf16 %v317_v16, %v316_v10  ;;  %v348_v25 = vmax.f32 %v284_v17, 0.0  ;;  %v255_v26 = vadd.f32 %v1523_v8, %v184_v18  ;;  %v1080_v27 = vunpack.c.l.bf16 %v1291_v14  ;;  %v1324_v15 = vld [vmem:[%s1948_s4 + $0x80] sm:$0xff]  }
  0x41   :  { %v349_v28 = vmax.f32 %v285_v19, 0.0  ;;  %v318_v29 = vmax.f32 %v254_v20, 0.0  ;;  %v216_v30 = vmul.f32 %v1141_v21, %v1512_v2  ;;  %v286_v31 = vadd.f32 %v1523_v8, %v215_v22 }
  0x42   :  { %1399 = vmatprep.mubr.msk.bf16.mxu0 %vm517_vm1, %v368_v24  ;;  %v319_v32 = vmax.f32 %v255_v26, 0.0  ;;  %v1081_v33 = vunpack.c.h.bf16 %v1291_v14  ;;  %v185_v34 = vmul.f32 %v1080_v27, %v1512_v2  ;;  %v1144_v35 = vunpack.c.l.bf16 %v1307_v23  ;;  %v1325_v14 = vld [vmem:[%s1948_s4 + $0x88] sm:$0xff]  }
  0x43   :  { %v384_v37 = vpack.c.bf16 %v349_v28, %v348_v25  ;;  %v287_v38 = vadd.f32 %v1523_v8, %v216_v30  ;;  %v350_v39 = vmax.f32 %v286_v31, 0.0  ;;  %v1145_v40 = vunpack.c.h.bf16 %v1307_v23 }
  0x44   :  { %v369_v42 = vpack.c.bf16 %v319_v32, %v318_v29  ;;  %v186_v43 = vmul.f32 %v1081_v33, %v1512_v2  ;;  %v256_v44 = vadd.f32 %v1523_v8, %v185_v34  ;;  %v217_v45 = vmul.f32 %v1144_v35, %v1512_v2 }
  0x45   :  { %1431 = vmatprep.mubr.msk.bf16.mxu1 %vm517_vm1, %v384_v37  ;;  %v351_v46 = vmax.f32 %v287_v38, 0.0  ;;  %v218_v47 = vmul.f32 %v1145_v40, %v1512_v2  ;;  %v1084_v48 = vunpack.c.l.bf16 %v1292_v36  ;;  %v1085_v49 = vunpack.c.h.bf16 %v1292_v36 }
  0x46   :  { %1400 = vmatmul.mubr.msk.bf16.gmra.mrb[24].mxu0 %vm517_vm1, %v369_v42  ;;  %v257_v50 = vadd.f32 %v1523_v8, %v186_v43  ;;  %v320_v51 = vmax.f32 %v256_v44, 0.0  ;;  %v288_v52 = vadd.f32 %v1523_v8, %v217_v45  ;;  %v1148_v53 = vunpack.c.l.bf16 %v1308_v41  ;;  %v1310_v42 = vld [vmem:[%s1948_s4 + $0x10] sm:$0xff]  }
  0x47   :  { %v385_v54 = vpack.c.bf16 %v351_v46, %v350_v39  ;;  %v289_v55 = vadd.f32 %v1523_v8, %v218_v47  ;;  %v187_v56 = vmul.f32 %v1084_v48, %v1512_v2  ;;  %v188_v57 = vmul.f32 %v1085_v49, %v1512_v2  ;;  %v1311_v39 = vld [vmem:[%s1948_s4 + $0x18] sm:$0xff]   ;;  %v1326_v43 = vld [vmem:[%s1948_s4 + $0x90] sm:$0xff]  }
  0x48   :  { %v321_v58 = vmax.f32 %v257_v50, 0.0  ;;  %v352_v59 = vmax.f32 %v288_v52, 0.0  ;;  %v1149_v60 = vunpack.c.h.bf16 %v1308_v41  ;;  %v219_v61 = vmul.f32 %v1148_v53, %v1512_v2  ;;  %v1327_v41 = vld [vmem:[%s1948_s4 + $0x98] sm:$0xff]  }
  0x49   :  { %1432 = vmatmul.mubr.msk.bf16.gmra.mrb[24].mxu1 %vm517_vm1, %v385_v54  ;;  %v353_v62 = vmax.f32 %v289_v55, 0.0  ;;  %v258_v63 = vadd.f32 %v1523_v8, %v187_v56  ;;  %v259_v0 = vadd.f32 %v1523_v8, %v188_v57  ;;  %v1220_v17 = vunpack.c.l.bf16 %v1325_v14 }
  0x4a   :  { %v370_v1 = vpack.c.bf16 %v321_v58, %v320_v51  ;;  %v220_v3 = vmul.f32 %v1149_v60, %v1512_v2  ;;  %v290_v4 = vadd.f32 %v1523_v8, %v219_v61  ;;  %v1309_v2 = vld [vmem:[%s1948_s4 + $0x8] sm:$0xff]   ;;  %v1216_v19 = vunpack.c.l.bf16 %v1324_v15 }
  0x4b   :  { %v386_v5 = vpack.c.bf16 %v353_v62, %v352_v59  ;;  %v322_v6 = vmax.f32 %v258_v63, 0.0  ;;  %v323_v7 = vmax.f32 %v259_v0, 0.0  ;;  %v1156_v16 = vunpack.c.l.bf16 %v1309_v2  ;;  %v1313_v0 = vld [vmem:[%s1948_s4 + $0x28] sm:$0xff]  }
  0x4c   :  { %1403 = vmatprep.mubr.msk.bf16.mxu0 %vm517_vm1, %v370_v1  ;;  %v291_v9 = vadd.f32 %v1523_v8, %v220_v3  ;;  %v354_v10 = vmax.f32 %v290_v4, 0.0  ;;  %v1151_v8 = vld [vmem:[%s1948_s4] sm:$0xff]   ;;  %v1157_v20 = vunpack.c.h.bf16 %v1309_v2  ;;  %vm907_vm2 = vcmask 261120  }
  0x4d   :  { %1435 = vmatprep.mubr.msk.bf16.mxu1 %vm517_vm1, %v386_v5  ;;  %v371_v11 = vpack.c.bf16 %v323_v7, %v322_v6  ;;  %v1152_v18 = vunpack.c.l.bf16 %v1151_v8  ;;  %v1221_v22 = vunpack.c.h.bf16 %v1325_v14  ;;  %v1153_v23 = vunpack.c.h.bf16 %v1151_v8  ;;  %v1312_v5 = vld [vmem:[%s1948_s4 + $0x20] sm:$0xff]   ;;  %v1329_v7 = vld [vmem:[%s1948_s4 + $0xa8] sm:$0xff]  }
  0x4e   :  { %v355_v12 = vmax.f32 %v291_v9, 0.0  ;;  %v1217_v27 = vunpack.c.h.bf16 %v1324_v15  ;;  %v1164_v44 = vunpack.c.l.bf16 %v1311_v39  ;;  %v1228_v45 = vunpack.c.l.bf16 %v1327_v41 }
  0x4f   :  { %1404 = vmatmul.mubr.msk.bf16.gmra.mrb[28].mxu0 %vm517_vm1, %v371_v11  ;;  %v1160_v46 = vunpack.c.l.bf16 %v1310_v42  ;;  %v1224_v47 = vunpack.c.l.bf16 %v1326_v43  ;;  %v1165_v48 = vunpack.c.h.bf16 %v1311_v39  ;;  %v1229_v50 = vunpack.c.h.bf16 %v1327_v41 }
  0x50   :  { %v387_v13 = vpack.c.bf16 %v355_v12, %v354_v10  ;;  %v1161_v51 = vunpack.c.h.bf16 %v1310_v42  ;;  %v1225_v55 = vunpack.c.h.bf16 %v1326_v43  ;;  %v1172_v9 = vunpack.c.l.bf16 %v1313_v0  ;;  %v1328_v10 = vld [vmem:[%s1948_s4 + $0xa0] sm:$0xff]  }
  0x51   :  { %v1168_v11 = vunpack.c.l.bf16 %v1312_v5  ;;  %v1236_v12 = vunpack.c.l.bf16 %v1329_v7  ;;  %v1232_v14 = vunpack.c.l.bf16 %v1328_v10  ;;  %v1169_v8 = vunpack.c.h.bf16 %v1312_v5 }
  0x52   :  { %1436 = vmatmul.mubr.msk.bf16.gmra.mrb[28].mxu1 %vm517_vm1, %v387_v13  ;;  %v1173_v13 = vunpack.c.h.bf16 %v1313_v0 }
  0xe1   :  { %v1377_v21 = vpop.f32.mrb[0].mxu0 }
  0xe2   :  { %v661_v24 = vadd.f32 %v1377_v21, %v1156_v16  ;;  %v652_v26 = vpop.f32.mrb[1].mxu0  ;;  %v1233_v21 = vunpack.c.h.bf16 %v1328_v10 }
  0xe3   :  { %v1409_v25 = vpop.f32.mrb[0].mxu1  ;;  %v653_v29 = vadd.f32 %v1152_v18, %v652_v26  ;;  %v1378_v31 = vpop.f32.mrb[2].mxu0  ;;  %v1315_v26 = vld [vmem:[%s1948_s4 + $0x38] sm:$0xff]  }
  0xe4   :  { %v789_v28 = vadd.f32 %v1409_v25, %v1220_v17  ;;  %v780_v30 = vpop.f32.mrb[1].mxu1  ;;  %910 = vst.msk [vmem:[#allocation2 + $0x10] sm:$0xff] %vm907_vm2, %v661_v24  ;;  %v664_v33 = vadd.f32 %v1378_v31, %v1157_v20  ;;  %v655_v35 = vpop.f32.mrb[3].mxu0  ;;  %v1237_v17 = vunpack.c.h.bf16 %v1329_v7 }
  0xe5   :  { %v781_v32 = vadd.f32 %v1216_v19, %v780_v30  ;;  %v1410_v34 = vpop.f32.mrb[2].mxu1  ;;  %908 = vst.msk [vmem:[#allocation2] sm:$0xff] %vm907_vm2, %v653_v29  ;;  %v656_v37 = vadd.f32 %v1153_v23, %v655_v35  ;;  %v1314_v30 = vld [vmem:[%s1948_s4 + $0x30] sm:$0xff]   ;;  %v1331_v35 = vld [vmem:[%s1948_s4 + $0xb8] sm:$0xff]  }
  0xe6   :  { %942 = vst.msk [vmem:[#allocation2 + $0x110] sm:$0xff] %vm907_vm2, %v789_v28  ;;  %v792_v36 = vadd.f32 %v1410_v34, %v1221_v22  ;;  %v783_v38 = vpop.f32.mrb[3].mxu1  ;;  %911 = vst.msk [vmem:[#allocation2 + $0x18] sm:$0xff] %vm907_vm2, %v664_v33  ;;  %v1180_v34 = vunpack.c.l.bf16 %v1315_v26  ;;  %v1177_v41 = vunpack.c.h.bf16 %v1314_v30 }
  0xe7   :  { %940 = vst.msk [vmem:[#allocation2 + $0x100] sm:$0xff] %vm907_vm2, %v781_v32  ;;  %v784_v40 = vadd.f32 %v1217_v27, %v783_v38  ;;  %909 = vst.msk [vmem:[#allocation2 + $0x8] sm:$0xff] %vm907_vm2, %v656_v37  ;;  %v1330_v37 = vld [vmem:[%s1948_s4 + $0xb0] sm:$0xff]   ;;  %v1181_v38 = vunpack.c.h.bf16 %v1315_v26  ;;  %v1335_v26 = vld [vmem:[%s1948_s4 + $0xd8] sm:$0xff]  }
  0xe8   :  { %943 = vst.msk [vmem:[#allocation2 + $0x118] sm:$0xff] %vm907_vm2, %v792_v36  ;;  %v1176_v36 = vunpack.c.l.bf16 %v1314_v30 }
  0xe9   :  { %941 = vst.msk [vmem:[#allocation2 + $0x108] sm:$0xff] %vm907_vm2, %v784_v40  ;;  %v1244_v40 = vunpack.c.l.bf16 %v1331_v35 }
  0xec   :  { %v1381_v49 = vpop.f32.mrb[4].mxu0 }
  0xed   :  { %v677_v52 = vadd.f32 %v1381_v49, %v1164_v44  ;;  %v1413_v53 = vpop.f32.mrb[4].mxu1  ;;  %v668_v54 = vpop.f32.mrb[5].mxu0  ;;  %v1240_v44 = vunpack.c.l.bf16 %v1330_v37 }
  0xee   :  { %v805_v56 = vadd.f32 %v1413_v53, %v1228_v45  ;;  %v669_v57 = vadd.f32 %v1160_v46, %v668_v54  ;;  %v796_v58 = vpop.f32.mrb[5].mxu1  ;;  %v1382_v59 = vpop.f32.mrb[6].mxu0 }
  0xef   :  { %914 = vst.msk [vmem:[#allocation2 + $0x30] sm:$0xff] %vm907_vm2, %v677_v52  ;;  %v797_v60 = vadd.f32 %v1224_v47, %v796_v58  ;;  %v680_v61 = vadd.f32 %v1382_v59, %v1165_v48  ;;  %v1414_v62 = vpop.f32.mrb[6].mxu1  ;;  %v671_v63 = vpop.f32.mrb[7].mxu0  ;;  %v1245_v47 = vunpack.c.h.bf16 %v1331_v35  ;;  %v1317_v52 = vld [vmem:[%s1948_s4 + $0x48] sm:$0xff]  }
  0xf0   :  { %946 = vst.msk [vmem:[#allocation2 + $0x130] sm:$0xff] %vm907_vm2, %v805_v56  ;;  %912 = vst.msk [vmem:[#allocation2 + $0x20] sm:$0xff] %vm907_vm2, %v669_v57  ;;  %v808_v1 = vadd.f32 %v1414_v62, %v1229_v50  ;;  %v672_v3 = vadd.f32 %v1161_v51, %v671_v63  ;;  %v799_v4 = vpop.f32.mrb[7].mxu1  ;;  %v1241_v51 = vunpack.c.h.bf16 %v1330_v37  ;;  %v1316_v56 = vld [vmem:[%s1948_s4 + $0x40] sm:$0xff]   ;;  %v1333_v62 = vld [vmem:[%s1948_s4 + $0xc8] sm:$0xff]  }
  0xf1   :  { %944 = vst.msk [vmem:[#allocation2 + $0x120] sm:$0xff] %vm907_vm2, %v797_v60  ;;  %915 = vst.msk [vmem:[#allocation2 + $0x38] sm:$0xff] %vm907_vm2, %v680_v61  ;;  %v800_v6 = vadd.f32 %v1225_v55, %v799_v4  ;;  %v1188_v61 = vunpack.c.l.bf16 %v1317_v52  ;;  %v1184_v0 = vunpack.c.l.bf16 %v1316_v56  ;;  %v1252_v5 = vunpack.c.l.bf16 %v1333_v62 }
  0xf2   :  { %947 = vst.msk [vmem:[#allocation2 + $0x138] sm:$0xff] %vm907_vm2, %v808_v1  ;;  %913 = vst.msk [vmem:[#allocation2 + $0x28] sm:$0xff] %vm907_vm2, %v672_v3  ;;  %v1332_v1 = vld [vmem:[%s1948_s4 + $0xc0] sm:$0xff]   ;;  %v1189_v3 = vunpack.c.h.bf16 %v1317_v52 }
  0xf3   :  { %945 = vst.msk [vmem:[#allocation2 + $0x128] sm:$0xff] %vm907_vm2, %v800_v6  ;;  %v1185_v6 = vunpack.c.h.bf16 %v1316_v56  ;;  %v1248_v10 = vunpack.c.l.bf16 %v1332_v1 }
  0xf5   :  { %v1385_v2 = vpop.f32.mrb[8].mxu0 }
  0xf6   :  { %v693_v15 = vadd.f32 %v1385_v2, %v1172_v9  ;;  %v684_v16 = vpop.f32.mrb[9].mxu0 }
  0xf7   :  { %v1417_v18 = vpop.f32.mrb[8].mxu1  ;;  %v685_v19 = vadd.f32 %v1168_v11, %v684_v16  ;;  %v1386_v20 = vpop.f32.mrb[10].mxu0  ;;  %v1319_v16 = vld [vmem:[%s1948_s4 + $0x58] sm:$0xff]  }
  0xf8   :  { %918 = vst.msk [vmem:[#allocation2 + $0x50] sm:$0xff] %vm907_vm2, %v693_v15  ;;  %v821_v22 = vadd.f32 %v1417_v18, %v1236_v12  ;;  %v812_v23 = vpop.f32.mrb[9].mxu1  ;;  %v696_v24 = vadd.f32 %v1386_v20, %v1173_v13  ;;  %v687_v25 = vpop.f32.mrb[11].mxu0  ;;  %v1253_v13 = vunpack.c.h.bf16 %v1333_v62  ;;  %v1249_v15 = vunpack.c.h.bf16 %v1332_v1  ;;  %v1318_v20 = vld [vmem:[%s1948_s4 + $0x50] sm:$0xff]  }
  0xf9   :  { %916 = vst.msk [vmem:[#allocation2 + $0x40] sm:$0xff] %vm907_vm2, %v685_v19  ;;  %v813_v27 = vadd.f32 %v1232_v14, %v812_v23  ;;  %v1418_v28 = vpop.f32.mrb[10].mxu1  ;;  %v688_v29 = vadd.f32 %v1169_v8, %v687_v25  ;;  %v1196_v25 = vunpack.c.l.bf16 %v1319_v16  ;;  %v1197_v30 = vunpack.c.h.bf16 %v1319_v16 }
  0xfa   :  { %950 = vst.msk [vmem:[#allocation2 + $0x150] sm:$0xff] %vm907_vm2, %v821_v22  ;;  %919 = vst.msk [vmem:[#allocation2 + $0x58] sm:$0xff] %vm907_vm2, %v696_v24  ;;  %v824_v31 = vadd.f32 %v1418_v28, %v1237_v17  ;;  %v815_v32 = vpop.f32.mrb[11].mxu1  ;;  %v1192_v28 = vunpack.c.l.bf16 %v1318_v20 }
  0xfb   :  { %948 = vst.msk [vmem:[#allocation2 + $0x140] sm:$0xff] %vm907_vm2, %v813_v27  ;;  %917 = vst.msk [vmem:[#allocation2 + $0x48] sm:$0xff] %vm907_vm2, %v688_v29  ;;  %v816_v33 = vadd.f32 %v1233_v21, %v815_v32  ;;  %v1334_v29 = vld [vmem:[%s1948_s4 + $0xd0] sm:$0xff]   ;;  %v1260_v32 = vunpack.c.l.bf16 %v1335_v26 }
  0xfc   :  { %951 = vst.msk [vmem:[#allocation2 + $0x158] sm:$0xff] %vm907_vm2, %v824_v31 }
  0xfd   :  { %949 = vst.msk [vmem:[#allocation2 + $0x148] sm:$0xff] %vm907_vm2, %v816_v33  ;;  %v1193_v33 = vunpack.c.h.bf16 %v1318_v20 }
  0xfe   :  { %v1389_v39 = vpop.f32.mrb[12].mxu0 }
  0xff   :  { %v709_v42 = vadd.f32 %v1389_v39, %v1180_v34  ;;  %v700_v43 = vpop.f32.mrb[13].mxu0  ;;  %v1261_v39 = vunpack.c.h.bf16 %v1335_v26 }
 0x100   :  { %v701_v45 = vadd.f32 %v1176_v36, %v700_v43  ;;  %v1390_v46 = vpop.f32.mrb[14].mxu0  ;;  %v1256_v36 = vunpack.c.l.bf16 %v1334_v29  ;;  %v1257_v43 = vunpack.c.h.bf16 %v1334_v29 }
 0x101   :  { %922 = vst.msk [vmem:[#allocation2 + $0x70] sm:$0xff] %vm907_vm2, %v709_v42  ;;  %v1421_v48 = vpop.f32.mrb[12].mxu1  ;;  %v712_v49 = vadd.f32 %v1390_v46, %v1181_v38  ;;  %v703_v50 = vpop.f32.mrb[15].mxu0 }
 0x102   :  { %v837_v53 = vadd.f32 %v1421_v48, %v1244_v40  ;;  %920 = vst.msk [vmem:[#allocation2 + $0x60] sm:$0xff] %vm907_vm2, %v701_v45  ;;  %v828_v54 = vpop.f32.mrb[13].mxu1  ;;  %v704_v55 = vadd.f32 %v1177_v41, %v703_v50  ;;  %v1320_v48 = vld [vmem:[%s1948_s4 + $0x60] sm:$0xff]  }
 0x103   :  { %v829_v57 = vadd.f32 %v1240_v44, %v828_v54  ;;  %923 = vst.msk [vmem:[#allocation2 + $0x78] sm:$0xff] %vm907_vm2, %v712_v49  ;;  %v1422_v58 = vpop.f32.mrb[14].mxu1  ;;  %v1321_v44 = vld [vmem:[%s1948_s4 + $0x68] sm:$0xff]   ;;  %v1200_v56 = vunpack.c.l.bf16 %v1320_v48 }
 0x104   :  { %954 = vst.msk [vmem:[#allocation2 + $0x170] sm:$0xff] %vm907_vm2, %v837_v53  ;;  %v840_v59 = vadd.f32 %v1422_v58, %v1245_v47  ;;  %921 = vst.msk [vmem:[#allocation2 + $0x68] sm:$0xff] %vm907_vm2, %v704_v55  ;;  %v831_v60 = vpop.f32.mrb[15].mxu1  ;;  %v1204_v53 = vunpack.c.l.bf16 %v1321_v44  ;;  %v1337_v54 = vld [vmem:[%s1948_s4 + $0xe8] sm:$0xff]   ;;  %v1205_v58 = vunpack.c.h.bf16 %v1321_v44 }
 0x105   :  { %952 = vst.msk [vmem:[#allocation2 + $0x160] sm:$0xff] %vm907_vm2, %v829_v57  ;;  %v832_v63 = vadd.f32 %v1241_v51, %v831_v60  ;;  %v1336_v57 = vld [vmem:[%s1948_s4 + $0xe0] sm:$0xff]   ;;  %v1268_v60 = vunpack.c.l.bf16 %v1337_v54 }
 0x106   :  { %955 = vst.msk [vmem:[#allocation2 + $0x178] sm:$0xff] %vm907_vm2, %v840_v59 }
 0x107   :  { %953 = vst.msk [vmem:[#allocation2 + $0x168] sm:$0xff] %vm907_vm2, %v832_v63  ;;  %v1393_v4 = vpop.f32.mrb[16].mxu0 }
 0x108   :  { %v725_v7 = vadd.f32 %v1393_v4, %v1188_v61  ;;  %v716_v9 = vpop.f32.mrb[17].mxu0  ;;  %v1201_v61 = vunpack.c.h.bf16 %v1320_v48  ;;  %v1269_v4 = vunpack.c.h.bf16 %v1337_v54 }
 0x109   :  { %v717_v11 = vadd.f32 %v1184_v0, %v716_v9  ;;  %v1394_v12 = vpop.f32.mrb[18].mxu0  ;;  %v1264_v0 = vunpack.c.l.bf16 %v1336_v57  ;;  %v1265_v9 = vunpack.c.h.bf16 %v1336_v57 }
 0x10a   :  { %926 = vst.msk [vmem:[#allocation2 + $0x90] sm:$0xff] %vm907_vm2, %v725_v7  ;;  %v1425_v2 = vpop.f32.mrb[16].mxu1  ;;  %v728_v14 = vadd.f32 %v1394_v12, %v1189_v3  ;;  %v719_v8 = vpop.f32.mrb[19].mxu0 }
 0x10b   :  { %v853_v17 = vadd.f32 %v1425_v2, %v1252_v5  ;;  %924 = vst.msk [vmem:[#allocation2 + $0x80] sm:$0xff] %vm907_vm2, %v717_v11  ;;  %v844_v18 = vpop.f32.mrb[17].mxu1  ;;  %v720_v19 = vadd.f32 %v1185_v6, %v719_v8  ;;  %v1322_v2 = vld [vmem:[%s1948_s4 + $0x70] sm:$0xff]  }
 0x10c   :  { %v845_v21 = vadd.f32 %v1248_v10, %v844_v18  ;;  %927 = vst.msk [vmem:[#allocation2 + $0x98] sm:$0xff] %vm907_vm2, %v728_v14  ;;  %v1426_v22 = vpop.f32.mrb[18].mxu1  ;;  %v1323_v10 = vld [vmem:[%s1948_s4 + $0x78] sm:$0xff]   ;;  %v1208_v20 = vunpack.c.l.bf16 %v1322_v2 }
 0x10d   :  { %958 = vst.msk [vmem:[#allocation2 + $0x190] sm:$0xff] %vm907_vm2, %v853_v17  ;;  %v856_v23 = vadd.f32 %v1426_v22, %v1253_v13  ;;  %925 = vst.msk [vmem:[#allocation2 + $0x88] sm:$0xff] %vm907_vm2, %v720_v19  ;;  %v847_v24 = vpop.f32.mrb[19].mxu1  ;;  %v1212_v17 = vunpack.c.l.bf16 %v1323_v10  ;;  %v1339_v18 = vld [vmem:[%s1948_s4 + $0xf8] sm:$0xff]   ;;  %v1213_v22 = vunpack.c.h.bf16 %v1323_v10 }
 0x10e   :  { %956 = vst.msk [vmem:[#allocation2 + $0x180] sm:$0xff] %vm907_vm2, %v845_v21  ;;  %v848_v27 = vadd.f32 %v1249_v15, %v847_v24  ;;  %v1338_v21 = vld [vmem:[%s1948_s4 + $0xf0] sm:$0xff]   ;;  %v1276_v24 = vunpack.c.l.bf16 %v1339_v18  ;;  %s1470_s4 = smov [#allocation2]  }
 0x10f   :  { %959 = vst.msk [vmem:[#allocation2 + $0x198] sm:$0xff] %vm907_vm2, %v856_v23  ;;  %s977_s9 = sshll.u32 %s1470_s4, 4  ;;  %s978_s9 = int_to_ptr.vmem [resolvable:$true] %s977_s9 }
 0x110   :  { %957 = vst.msk [vmem:[#allocation2 + $0x188] sm:$0xff] %vm907_vm2, %v848_v27  ;;  %v1397_v31 = vpop.f32.mrb[20].mxu0  ;;  %s1446_s10 = scalar_lea.vmem %s978_s9, 8192  ;;  %p1451_p1 = scmp.lt.s32.totalorder %s978_s9, %s978_s9 }
 0x111   :  { %v741_v34 = vadd.f32 %v1397_v31, %v1196_v25  ;;  %v732_v35 = vpop.f32.mrb[21].mxu0  ;;  %v1209_v25 = vunpack.c.h.bf16 %v1322_v2  ;;  %v1277_v31 = vunpack.c.h.bf16 %v1339_v18  ;;  %p1447_p0 = scmp.ne.s32.totalorder %s978_s9, %s1446_s10  ;;  %p1452_p2 = scmp.lt.s32.totalorder %s1446_s10, %s1446_s10 }
 0x112   :  { %v733_v37 = vadd.f32 %v1192_v28, %v732_v35  ;;  %v1398_v38 = vpop.f32.mrb[22].mxu0  ;;  %v1272_v28 = vunpack.c.l.bf16 %v1338_v21  ;;  %v1273_v35 = vunpack.c.h.bf16 %v1338_v21 }
 0x113   :  { %930 = vst.msk [vmem:[#allocation2 + $0xb0] sm:$0xff] %vm907_vm2, %v741_v34  ;;  %v1429_v40 = vpop.f32.mrb[20].mxu1  ;;  %v744_v41 = vadd.f32 %v1398_v38, %v1197_v30  ;;  %v735_v42 = vpop.f32.mrb[23].mxu0  ;;  %p1453_p3 = por %p1452_p2, %p1451_p1 }
 0x114   :  { %v869_v45 = vadd.f32 %v1429_v40, %v1260_v32  ;;  %928 = vst.msk [vmem:[#allocation2 + $0xa0] sm:$0xff] %vm907_vm2, %v733_v37  ;;  %v860_v46 = vpop.f32.mrb[21].mxu1  ;;  %v736_v47 = vadd.f32 %v1193_v33, %v735_v42 }
 0x115   :  { %v861_v49 = vadd.f32 %v1256_v36, %v860_v46  ;;  %931 = vst.msk [vmem:[#allocation2 + $0xb8] sm:$0xff] %vm907_vm2, %v744_v41  ;;  %v1430_v50 = vpop.f32.mrb[22].mxu1  ;;  %p1454_p4 = pnand %p1453_p3, %p1447_p0 }
 0x116   :  { %962 = vst.msk [vmem:[#allocation2 + $0x1b0] sm:$0xff] %vm907_vm2, %v869_v45  ;;  %v872_v51 = vadd.f32 %v1430_v50, %v1261_v39  ;;  %929 = vst.msk [vmem:[#allocation2 + $0xa8] sm:$0xff] %vm907_vm2, %v736_v47  ;;  %v863_v52 = vpop.f32.mrb[23].mxu1 }
 0x117   :  { %960 = vst.msk [vmem:[#allocation2 + $0x1a0] sm:$0xff] %vm907_vm2, %v861_v49  ;;  %v864_v55 = vadd.f32 %v1257_v43, %v863_v52 }
 0x118   :  { %963 = vst.msk [vmem:[#allocation2 + $0x1b8] sm:$0xff] %vm907_vm2, %v872_v51 }
 0x119   :  { %961 = vst.msk [vmem:[#allocation2 + $0x1a8] sm:$0xff] %vm907_vm2, %v864_v55  ;;  %v1401_v59 = vpop.f32.mrb[24].mxu0 }
 0x11a   :  { %v757_v62 = vadd.f32 %v1401_v59, %v1204_v53  ;;  %v748_v63 = vpop.f32.mrb[25].mxu0 }
 0x11b   :  { %v749_v1 = vadd.f32 %v1200_v56, %v748_v63  ;;  %v1402_v3 = vpop.f32.mrb[26].mxu0 }
 0x11c   :  { %934 = vst.msk [vmem:[#allocation2 + $0xd0] sm:$0xff] %vm907_vm2, %v757_v62  ;;  %v1433_v5 = vpop.f32.mrb[24].mxu1  ;;  %v760_v6 = vadd.f32 %v1402_v3, %v1205_v58  ;;  %v751_v7 = vpop.f32.mrb[27].mxu0 }
 0x11d   :  { %v885_v11 = vadd.f32 %v1433_v5, %v1268_v60  ;;  %932 = vst.msk [vmem:[#allocation2 + $0xc0] sm:$0xff] %vm907_vm2, %v749_v1  ;;  %v876_v12 = vpop.f32.mrb[25].mxu1  ;;  %v752_v13 = vadd.f32 %v1201_v61, %v751_v7 }
 0x11e   :  { %v877_v14 = vadd.f32 %v1264_v0, %v876_v12  ;;  %935 = vst.msk [vmem:[#allocation2 + $0xd8] sm:$0xff] %vm907_vm2, %v760_v6  ;;  %v1434_v8 = vpop.f32.mrb[26].mxu1 }
 0x11f   :  { %966 = vst.msk [vmem:[#allocation2 + $0x1d0] sm:$0xff] %vm907_vm2, %v885_v11  ;;  %v888_v15 = vadd.f32 %v1434_v8, %v1269_v4  ;;  %933 = vst.msk [vmem:[#allocation2 + $0xc8] sm:$0xff] %vm907_vm2, %v752_v13  ;;  %v879_v16 = vpop.f32.mrb[27].mxu1 }
 0x120   :  { %964 = vst.msk [vmem:[#allocation2 + $0x1c0] sm:$0xff] %vm907_vm2, %v877_v14  ;;  %v880_v19 = vadd.f32 %v1265_v9, %v879_v16 }
 0x121   :  { %967 = vst.msk [vmem:[#allocation2 + $0x1d8] sm:$0xff] %vm907_vm2, %v888_v15 }
 0x122   :  { %965 = vst.msk [vmem:[#allocation2 + $0x1c8] sm:$0xff] %vm907_vm2, %v880_v19  ;;  %v1405_v23 = vpop.f32.mrb[28].mxu0 }
 0x123   :  { %v773_v26 = vadd.f32 %v1405_v23, %v1212_v17  ;;  %v764_v27 = vpop.f32.mrb[29].mxu0 }
 0x124   :  { %v765_v29 = vadd.f32 %v1208_v20, %v764_v27  ;;  %v1406_v30 = vpop.f32.mrb[30].mxu0 }
 0x125   :  { %938 = vst.msk [vmem:[#allocation2 + $0xf0] sm:$0xff] %vm907_vm2, %v773_v26  ;;  %v1437_v32 = vpop.f32.mrb[28].mxu1  ;;  %v776_v33 = vadd.f32 %v1406_v30, %v1213_v22  ;;  %v767_v34 = vpop.f32.mrb[31].mxu0 }
 0x126   :  { %v901_v36 = vadd.f32 %v1437_v32, %v1276_v24  ;;  %936 = vst.msk [vmem:[#allocation2 + $0xe0] sm:$0xff] %vm907_vm2, %v765_v29  ;;  %v892_v37 = vpop.f32.mrb[29].mxu1  ;;  %v768_v38 = vadd.f32 %v1209_v25, %v767_v34 }
 0x127   :  { %v893_v39 = vadd.f32 %v1272_v28, %v892_v37  ;;  %939 = vst.msk [vmem:[#allocation2 + $0xf8] sm:$0xff] %vm907_vm2, %v776_v33  ;;  %v1438_v40 = vpop.f32.mrb[30].mxu1 }
 0x128   :  { %970 = vst.msk [vmem:[#allocation2 + $0x1f0] sm:$0xff] %vm907_vm2, %v901_v36  ;;  %v904_v41 = vadd.f32 %v1438_v40, %v1277_v31  ;;  %937 = vst.msk [vmem:[#allocation2 + $0xe8] sm:$0xff] %vm907_vm2, %v768_v38  ;;  %v895_v42 = vpop.f32.mrb[31].mxu1 }
 0x129   :  { %968 = vst.msk [vmem:[#allocation2 + $0x1e0] sm:$0xff] %vm907_vm2, %v893_v39  ;;  %v896_v43 = vadd.f32 %v1273_v35, %v895_v42 }
 0x12a   :  { %971 = vst.msk [vmem:[#allocation2 + $0x1f8] sm:$0xff] %vm907_vm2, %v904_v41 }
 0x12b   :  { %969 = vst.msk [vmem:[#allocation2 + $0x1e8] sm:$0xff] %vm907_vm2, %v896_v43 }
 0x12c   :  { %1457 = shalt.err (!%p1454_p4)
}
 0x12d   :  { %s1458_s13 = scalar_lea.hbm %s1949_s5, 8192 }
 0x12e   :  { %p1459_p5 = scmp.ne.s32.totalorder %s1949_s5, %s1458_s13  ;;  %p1462_p6 = scmp.lt.u32.totalorder %s1458_s13, %s1949_s5 }
 0x130   :  { %p1464_p7 = pnand %p1462_p6, %p1459_p5 }
 0x132   :  { %1467 = shalt.err (!%p1464_p7)
}
 0x133   :  { %s1471_s18 = smov 128   ;;  %s1472_s19 = smov 8  }
 0x134   :  { %983 = dma.vmem_to_hbm [thread:$0]  %s978_s9, 8192, %s1949_s5, [#allocation3], %s1471_s18, %s1471_s18, %s1472_s19  }
 0x135   :  { %1468 = dma.done.wait [#allocation3], 8192  }
 0x136   :  { %1469 = vsyncadd [#allocation3], 4294959104 }
 0x137   :  { %987 = vsyncpa [#allocation3], 1 }

</bundles_post_ra>
